<compile_context>
chip_gen: v7x
topology: tpu7x:2x2x1
jax: 0.10.0
libtpu: 0.0.40
codegen_flags: <defaults>
</compile_context>

<pallas_src>
import functools

import jax
import jax.numpy as jnp
from jax.experimental import pallas as pl
from jax.experimental.pallas import tpu as pltpu

KSIZE = 4
PAD = 1
LRELU_SLOPE = 0.2
BN_EPS = 1e-5


# --------------------------------------------------------------------------- #
# Kernel: implicit-GEMM conv + fused bias / BatchNorm / LeakyReLU epilogue.
# --------------------------------------------------------------------------- #
def _conv_kernel(*refs, k, s, Wph, L, n_valid, use_bias, use_bn, use_act):
    if use_bn:
        w_ref, x_ref, g_ref, beta_ref, mask_ref, o_ref = refs
    elif use_bias:
        w_ref, x_ref, b_ref, o_ref = refs
    else:
        w_ref, x_ref, o_ref = refs

    tcout = w_ref.shape[1]
    acc = jnp.zeros((tcout, L), jnp.float32)
    # k*k tap matmuls, each a contiguous (static-offset) lane slice of the
    # phase-flattened input: bf16 x bf16 -> f32 on the MXU.
    for ki in range(k):
        for kj in range(k):
            t = ki * k + kj
            ph = (ki % s) * s + (kj % s)              # which stride-phase plane
            d = (ki // s) * Wph + (kj // s)           # static column shift
            acc = acc + jnp.dot(w_ref[t], x_ref[ph, :, pl.ds(d, L)],
                                preferred_element_type=jnp.float32)

    y = acc
    if use_bn:
        # Per-channel stats over the N*Ho*Wo valid columns only (mask kills the
        # few ragged-edge columns of the extended layout).  Two-pass variance.
        m = mask_ref[...]                             # [1, L] f32 validity mask
        inv_n = 1.0 / n_valid
        mean = jnp.sum(y * m, axis=1, keepdims=True) * inv_n
        cent = y - mean
        var = jnp.sum(cent * cent * m, axis=1, keepdims=True) * inv_n
        y = cent * jax.lax.rsqrt(var + BN_EPS)
        y = y * g_ref[...] + beta_ref[...]
        # bias is structurally zero for BN layers -> no bias add (review #9)
    elif use_bias:
        y = y + b_ref[...]
    if use_act:
        y = jnp.where(y > 0, y, LRELU_SLOPE * y)
    o_ref[...] = y.astype(o_ref.dtype)


# --------------------------------------------------------------------------- #
# JAX-side glue (no patch-matrix materialization, 1x memory).
# --------------------------------------------------------------------------- #
def _prep_phases(x_cnhw, k, s, pad):
    """[C,N,H,W] bf16 -> phase-flattened [s*s, C, N*Hph*Wph] (zero-padded).

    Tap (ki,kj) of the conv is then the contiguous column window
    [d, d+L) of phase ((ki%s)*s + kj%s) with d = (ki//s)*Wph + (kj//s)."""
    C, N, H, W = x_cnhw.shape
    Hp, Wp = H + 2 * pad, W + 2 * pad
    Ho = (Hp - k) // s + 1
    Wo = (Wp - k) // s + 1
    Hph = -(-Hp // s)
    Wph = -(-Wp // s)
    xp = jnp.pad(x_cnhw, ((0, 0), (0, 0),
                          (pad, pad + s * Hph - Hp),
                          (pad, pad + s * Wph - Wp)))
    xph = xp.reshape(C, N, Hph, s, Wph, s).transpose(3, 5, 0, 1, 2, 4)
    Mph = N * Hph * Wph
    xflat = xph.reshape(s * s, C, Mph)
    qmax = (k - 1) // s
    L = Mph - (qmax * Wph + qmax)                     # max tap shift trimmed off
    return xflat, Ho, Wo, Hph, Wph, L


def _valid_mask(N, Ho, Wo, Hph, Wph, L):
    j = jnp.arange(L)
    rem = j % (Hph * Wph)
    u = rem // Wph
    v = rem % Wph
    return ((u < Ho) & (v < Wo)).astype(jnp.float32).reshape(1, L)


def conv_block(x_cnhw, p, *, is_last):
    C, N, H, W = x_cnhw.shape
    s = p["stride"]
    w = p["w"]                                        # [k*k, Cout, Cin] bf16
    Cout = w.shape[1]
    xflat, Ho, Wo, Hph, Wph, L = _prep_phases(x_cnhw, KSIZE, s, PAD)
    Mph = xflat.shape[-1]
    n_valid = float(N * Ho * Wo)

    # Cout-parallel grid: BN stats are per-channel so tiles are independent and
    # "parallel" is safe across v7x's two TensorCores (review #5).
    tcout = 32 if (Cout > 32 and Cout % 32 == 0) else Cout
    grid = (Cout // tcout,)
    out_dtype = jnp.float32 if is_last else jnp.bfloat16

    kern = functools.partial(_conv_kernel, k=KSIZE, s=s, Wph=Wph, L=L,
                             n_valid=n_valid, use_bias=p["use_bias"],
                             use_bn=p["use_bn"], use_act=p["use_act"])

    in_arrays = [w, xflat]
    in_specs = [pl.BlockSpec((KSIZE * KSIZE, tcout, C), lambda co: (0, co, 0)),
                pl.BlockSpec((s * s, C, Mph), lambda co: (0, 0, 0))]
    if p["use_bn"]:
        in_arrays += [p["gamma"], p["beta"], _valid_mask(N, Ho, Wo, Hph, Wph, L)]
        in_specs += [pl.BlockSpec((tcout, 1), lambda co: (co, 0)),
                     pl.BlockSpec((tcout, 1), lambda co: (co, 0)),
                     pl.BlockSpec((1, L), lambda co: (0, 0))]
    elif p["use_bias"]:
        in_arrays += [p["b"]]
        in_specs += [pl.BlockSpec((tcout, 1), lambda co: (co, 0))]

    y_ext = pl.pallas_call(
        kern,
        out_shape=jax.ShapeDtypeStruct((Cout, L), out_dtype),
        grid=grid,
        in_specs=in_specs,
        out_specs=pl.BlockSpec((tcout, L), lambda co: (co, 0)),
        compiler_params=pltpu.CompilerParams(
            dimension_semantics=("parallel",),
            # Explicit, well under v7x's 64 MiB physical and above v5e's 16 MiB
            # scoped default (review v5e item); demo working set is < 1 MiB.
            vmem_limit_bytes=32 * 1024 * 1024),
    )(*in_arrays)

    # Drop the ragged-edge columns and restore [Cout, N, Ho, Wo] (cheap, 1x).
    y_full = jnp.pad(y_ext, ((0, 0), (0, Mph - L)))
    return y_full.reshape(Cout, N, Hph, Wph)[:, :, :Ho, :Wo]


# --------------------------------------------------------------------------- #
# Parameters (pre-packed / pre-cast once, review #10) and forward pass.
# --------------------------------------------------------------------------- #
def init_discriminator_params(key, input_channel, ndf, n_layers=3):
    # (cin, cout, stride, use_bias, use_bn, use_act) — mirrors Discriminator
    # with norm='batch' (=> bias=False on the BN-normalized convs).
    specs = [(input_channel, ndf, 2, True, False, True)]
    nf_mult = 1
    for n in range(1, n_layers):
        nf_prev, nf_mult = nf_mult, min(2 ** n, 8)
        specs.append((ndf * nf_prev, ndf * nf_mult, 2, False, True, True))
    nf_prev, nf_mult = nf_mult, min(2 ** n_layers, 8)
    specs.append((ndf * nf_prev, ndf * nf_mult, 1, False, True, True))
    specs.append((ndf * nf_mult, 1, 1, True, False, False))

    params = []
    for (cin, cout, stride, use_bias, use_bn, use_act) in specs:
        key, kw, kb = jax.random.split(key, 3)
        fan_in = float(cin * KSIZE * KSIZE)
        w = jax.random.uniform(kw, (cout, cin, KSIZE, KSIZE), jnp.float32,
                               -1.0, 1.0) / jnp.sqrt(fan_in)
        # tap-major [k*k, Cout, Cin] bf16, packed once at init time
        w_packed = jnp.transpose(w, (2, 3, 0, 1)).reshape(
            KSIZE * KSIZE, cout, cin).astype(jnp.bfloat16)
        if use_bias:
            b = jax.random.uniform(kb, (cout,), jnp.float32, -1.0, 1.0) / jnp.sqrt(fan_in)
        else:
            b = jnp.zeros((cout,), jnp.float32)
        params.append(dict(
            w=w_packed,
            b=b.reshape(cout, 1).astype(jnp.float32),
            gamma=jnp.ones((cout, 1), jnp.float32),
            beta=jnp.zeros((cout, 1), jnp.float32),
            stride=stride, use_bias=use_bias, use_bn=use_bn, use_act=use_act))
    return params


def discriminator_forward(x_nchw, params):
    # One NCHW -> channel-first transpose; bf16 cast BEFORE any padding (review #1).
    x = jnp.transpose(x_nchw, (1, 0, 2, 3)).astype(jnp.bfloat16)
    for i, p in enumerate(params):
        x = conv_block(x, p, is_last=(i == len(params) - 1))
    return jnp.transpose(x, (1, 0, 2, 3))             # last layer is already f32


# --------------------------------------------------------------------------- #
# Independent reference (XLA conv path) for the self-test.
# --------------------------------------------------------------------------- #
def _reference_forward(x_nchw, params):
    x = x_nchw.astype(jnp.bfloat16)
    for i, p in enumerate(params):
        Cout, Cin = p["w"].shape[1], p["w"].shape[2]
        w_oihw = p["w"].reshape(KSIZE, KSIZE, Cout, Cin).transpose(2, 3, 0, 1)
        s = p["stride"]
        y = jax.lax.conv_general_dilated(
            x, w_oihw, window_strides=(s, s), padding=((PAD, PAD), (PAD, PAD)),
            dimension_numbers=("NCHW", "OIHW", "NCHW"),
            preferred_element_type=jnp.float32)
        if p["use_bn"]:
            mean = jnp.mean(y, axis=(0, 2, 3), keepdims=True)
            var = jnp.mean((y - mean) ** 2, axis=(0, 2, 3), keepdims=True)
            y = (y - mean) * jax.lax.rsqrt(var + BN_EPS)
            y = y * p["gamma"].reshape(1, Cout, 1, 1) + p["beta"].reshape(1, Cout, 1, 1)
        elif p["use_bias"]:
            y = y + p["b"].reshape(1, Cout, 1, 1)
        if p["use_act"]:
            y = jnp.where(y > 0, y, LRELU_SLOPE * y)
        x = y if i == len(params) - 1 else y.astype(jnp.bfloat16)
    return x


if __name__ == "__main__":
    key = jax.random.PRNGKey(0)
    k_params, k_x = jax.random.split(key)

    input_channel, ndf, n_layers = 3, 8, 3
    params = init_discriminator_params(k_params, input_channel, ndf, n_layers)

    # 32x32 input so the rf-70 PatchGAN (n_layers=3) yields a valid 2x2 patch map.
    x = jax.random.normal(k_x, (2, input_channel, 32, 32), dtype=jnp.float32)

    fwd = jax.jit(lambda inp: discriminator_forward(inp, params))
    out = jax.block_until_ready(fwd(x))

    assert out.shape == (2, 1, 2, 2), out.shape
    assert bool(jnp.all(jnp.isfinite(out)))

    ref = _reference_forward(x, params)
    max_err = float(jnp.max(jnp.abs(out - ref)))
    assert jnp.allclose(out, ref, rtol=1e-2, atol=1e-2), max_err

    print("KERNEL_OK")
</pallas_src>

<mosaic_0001>
module attributes {stable_mosaic.version = 11 : i64} {
  func.func @_conv_kernel(%arg0: i32, %arg1: memref<16x8x3xbf16, #tpu.memory_space<vmem>>, %arg2: memref<4x3x578xbf16, #tpu.memory_space<vmem>>, %arg3: memref<8x1xf32, #tpu.memory_space<vmem>>, %arg4: memref<8x560xbf16, #tpu.memory_space<vmem>>) attributes {dimension_semantics = [#tpu.dimension_semantics<parallel>], iteration_bounds = array<i64: 1>, scalar_prefetch = 0 : i64, scratch_operands = 0 : i64, tpu.core_type = #tpu.core_type<tc>, window_params = [{transform_indices = @transform_0, window_bounds = array<i64: 16, 8, 3>}, {pipeline_mode = #tpu.pipeline_mode<synchronous>, transform_indices = @transform_1, window_bounds = array<i64: 4, 3, 578>}, {transform_indices = @transform_2, window_bounds = array<i64: 8, 1>}, {transform_indices = @transform_3, window_bounds = array<i64: 8, 560>}]} {
    %cst = arith.constant 0.000000e+00 : f32
    %0 = vector.broadcast %cst : f32 to vector<8x560xf32>
    %c0 = arith.constant 0 : index
    %c0_0 = arith.constant 0 : index
    %c0_1 = arith.constant 0 : index
    %1 = vector.load %arg1[%c0, %c0_0, %c0_1] : memref<16x8x3xbf16, #tpu.memory_space<vmem>>, vector<1x8x3xbf16>
    %2 = vector.shape_cast %1 : vector<1x8x3xbf16> to vector<8x3xbf16>
    %c0_2 = arith.constant 0 : index
    %c0_3 = arith.constant 0 : index
    %c0_4 = arith.constant 0 : index
    %3 = vector.load %arg2[%c0_2, %c0_3, %c0_4] : memref<4x3x578xbf16, #tpu.memory_space<vmem>>, vector<1x3x560xbf16>
    %4 = vector.shape_cast %3 : vector<1x3x560xbf16> to vector<3x560xbf16>
    %cst_5 = arith.constant dense<0.000000e+00> : vector<8x560xf32>
    %5 = tpu.matmul %2, %4, %cst_5 {dimension_numbers = #tpu.dot_dimension_numbers<[1], [0], [0], [1], [0, 0, 1, 1], [], []>} : vector<8x3xbf16>, vector<3x560xbf16>, vector<8x560xf32> -> vector<8x560xf32>
    %6 = arith.addf %0, %5 : vector<8x560xf32>
    %c1 = arith.constant 1 : index
    %c0_6 = arith.constant 0 : index
    %c0_7 = arith.constant 0 : index
    %7 = vector.load %arg1[%c1, %c0_6, %c0_7] : memref<16x8x3xbf16, #tpu.memory_space<vmem>>, vector<1x8x3xbf16>
    %8 = vector.shape_cast %7 : vector<1x8x3xbf16> to vector<8x3xbf16>
    %c1_8 = arith.constant 1 : index
    %c0_9 = arith.constant 0 : index
    %c0_10 = arith.constant 0 : index
    %9 = vector.load %arg2[%c1_8, %c0_9, %c0_10] : memref<4x3x578xbf16, #tpu.memory_space<vmem>>, vector<1x3x560xbf16>
    %10 = vector.shape_cast %9 : vector<1x3x560xbf16> to vector<3x560xbf16>
    %cst_11 = arith.constant dense<0.000000e+00> : vector<8x560xf32>
    %11 = tpu.matmul %8, %10, %cst_11 {dimension_numbers = #tpu.dot_dimension_numbers<[1], [0], [0], [1], [0, 0, 1, 1], [], []>} : vector<8x3xbf16>, vector<3x560xbf16>, vector<8x560xf32> -> vector<8x560xf32>
    %12 = arith.addf %6, %11 : vector<8x560xf32>
    %c2 = arith.constant 2 : index
    %c0_12 = arith.constant 0 : index
    %c0_13 = arith.constant 0 : index
    %13 = vector.load %arg1[%c2, %c0_12, %c0_13] : memref<16x8x3xbf16, #tpu.memory_space<vmem>>, vector<1x8x3xbf16>
    %14 = vector.shape_cast %13 : vector<1x8x3xbf16> to vector<8x3xbf16>
    %c0_14 = arith.constant 0 : index
    %c0_15 = arith.constant 0 : index
    %c1_16 = arith.constant 1 : index
    %15 = vector.load %arg2[%c0_14, %c0_15, %c1_16] : memref<4x3x578xbf16, #tpu.memory_space<vmem>>, vector<1x3x560xbf16>
    %16 = vector.shape_cast %15 : vector<1x3x560xbf16> to vector<3x560xbf16>
    %cst_17 = arith.constant dense<0.000000e+00> : vector<8x560xf32>
    %17 = tpu.matmul %14, %16, %cst_17 {dimension_numbers = #tpu.dot_dimension_numbers<[1], [0], [0], [1], [0, 0, 1, 1], [], []>} : vector<8x3xbf16>, vector<3x560xbf16>, vector<8x560xf32> -> vector<8x560xf32>
    %18 = arith.addf %12, %17 : vector<8x560xf32>
    %c3 = arith.constant 3 : index
    %c0_18 = arith.constant 0 : index
    %c0_19 = arith.constant 0 : index
    %19 = vector.load %arg1[%c3, %c0_18, %c0_19] : memref<16x8x3xbf16, #tpu.memory_space<vmem>>, vector<1x8x3xbf16>
    %20 = vector.shape_cast %19 : vector<1x8x3xbf16> to vector<8x3xbf16>
    %c1_20 = arith.constant 1 : index
    %c0_21 = arith.constant 0 : index
    %c1_22 = arith.constant 1 : index
    %21 = vector.load %arg2[%c1_20, %c0_21, %c1_22] : memref<4x3x578xbf16, #tpu.memory_space<vmem>>, vector<1x3x560xbf16>
    %22 = vector.shape_cast %21 : vector<1x3x560xbf16> to vector<3x560xbf16>
    %cst_23 = arith.constant dense<0.000000e+00> : vector<8x560xf32>
    %23 = tpu.matmul %20, %22, %cst_23 {dimension_numbers = #tpu.dot_dimension_numbers<[1], [0], [0], [1], [0, 0, 1, 1], [], []>} : vector<8x3xbf16>, vector<3x560xbf16>, vector<8x560xf32> -> vector<8x560xf32>
    %24 = arith.addf %18, %23 : vector<8x560xf32>
    %c4 = arith.constant 4 : index
    %c0_24 = arith.constant 0 : index
    %c0_25 = arith.constant 0 : index
    %25 = vector.load %arg1[%c4, %c0_24, %c0_25] : memref<16x8x3xbf16, #tpu.memory_space<vmem>>, vector<1x8x3xbf16>
    %26 = vector.shape_cast %25 : vector<1x8x3xbf16> to vector<8x3xbf16>
    %c2_26 = arith.constant 2 : index
    %c0_27 = arith.constant 0 : index
    %c0_28 = arith.constant 0 : index
    %27 = vector.load %arg2[%c2_26, %c0_27, %c0_28] : memref<4x3x578xbf16, #tpu.memory_space<vmem>>, vector<1x3x560xbf16>
    %28 = vector.shape_cast %27 : vector<1x3x560xbf16> to vector<3x560xbf16>
    %cst_29 = arith.constant dense<0.000000e+00> : vector<8x560xf32>
    %29 = tpu.matmul %26, %28, %cst_29 {dimension_numbers = #tpu.dot_dimension_numbers<[1], [0], [0], [1], [0, 0, 1, 1], [], []>} : vector<8x3xbf16>, vector<3x560xbf16>, vector<8x560xf32> -> vector<8x560xf32>
    %30 = arith.addf %24, %29 : vector<8x560xf32>
    %c5 = arith.constant 5 : index
    %c0_30 = arith.constant 0 : index
    %c0_31 = arith.constant 0 : index
    %31 = vector.load %arg1[%c5, %c0_30, %c0_31] : memref<16x8x3xbf16, #tpu.memory_space<vmem>>, vector<1x8x3xbf16>
    %32 = vector.shape_cast %31 : vector<1x8x3xbf16> to vector<8x3xbf16>
    %c3_32 = arith.constant 3 : index
    %c0_33 = arith.constant 0 : index
    %c0_34 = arith.constant 0 : index
    %33 = vector.load %arg2[%c3_32, %c0_33, %c0_34] : memref<4x3x578xbf16, #tpu.memory_space<vmem>>, vector<1x3x560xbf16>
    %34 = vector.shape_cast %33 : vector<1x3x560xbf16> to vector<3x560xbf16>
    %cst_35 = arith.constant dense<0.000000e+00> : vector<8x560xf32>
    %35 = tpu.matmul %32, %34, %cst_35 {dimension_numbers = #tpu.dot_dimension_numbers<[1], [0], [0], [1], [0, 0, 1, 1], [], []>} : vector<8x3xbf16>, vector<3x560xbf16>, vector<8x560xf32> -> vector<8x560xf32>
    %36 = arith.addf %30, %35 : vector<8x560xf32>
    %c6 = arith.constant 6 : index
    %c0_36 = arith.constant 0 : index
    %c0_37 = arith.constant 0 : index
    %37 = vector.load %arg1[%c6, %c0_36, %c0_37] : memref<16x8x3xbf16, #tpu.memory_space<vmem>>, vector<1x8x3xbf16>
    %38 = vector.shape_cast %37 : vector<1x8x3xbf16> to vector<8x3xbf16>
    %c2_38 = arith.constant 2 : index
    %c0_39 = arith.constant 0 : index
    %c1_40 = arith.constant 1 : index
    %39 = vector.load %arg2[%c2_38, %c0_39, %c1_40] : memref<4x3x578xbf16, #tpu.memory_space<vmem>>, vector<1x3x560xbf16>
    %40 = vector.shape_cast %39 : vector<1x3x560xbf16> to vector<3x560xbf16>
    %cst_41 = arith.constant dense<0.000000e+00> : vector<8x560xf32>
    %41 = tpu.matmul %38, %40, %cst_41 {dimension_numbers = #tpu.dot_dimension_numbers<[1], [0], [0], [1], [0, 0, 1, 1], [], []>} : vector<8x3xbf16>, vector<3x560xbf16>, vector<8x560xf32> -> vector<8x560xf32>
    %42 = arith.addf %36, %41 : vector<8x560xf32>
    %c7 = arith.constant 7 : index
    %c0_42 = arith.constant 0 : index
    %c0_43 = arith.constant 0 : index
    %43 = vector.load %arg1[%c7, %c0_42, %c0_43] : memref<16x8x3xbf16, #tpu.memory_space<vmem>>, vector<1x8x3xbf16>
    %44 = vector.shape_cast %43 : vector<1x8x3xbf16> to vector<8x3xbf16>
    %c3_44 = arith.constant 3 : index
    %c0_45 = arith.constant 0 : index
    %c1_46 = arith.constant 1 : index
    %45 = vector.load %arg2[%c3_44, %c0_45, %c1_46] : memref<4x3x578xbf16, #tpu.memory_space<vmem>>, vector<1x3x560xbf16>
    %46 = vector.shape_cast %45 : vector<1x3x560xbf16> to vector<3x560xbf16>
    %cst_47 = arith.constant dense<0.000000e+00> : vector<8x560xf32>
    %47 = tpu.matmul %44, %46, %cst_47 {dimension_numbers = #tpu.dot_dimension_numbers<[1], [0], [0], [1], [0, 0, 1, 1], [], []>} : vector<8x3xbf16>, vector<3x560xbf16>, vector<8x560xf32> -> vector<8x560xf32>
    %48 = arith.addf %42, %47 : vector<8x560xf32>
    %c8 = arith.constant 8 : index
    %c0_48 = arith.constant 0 : index
    %c0_49 = arith.constant 0 : index
    %49 = vector.load %arg1[%c8, %c0_48, %c0_49] : memref<16x8x3xbf16, #tpu.memory_space<vmem>>, vector<1x8x3xbf16>
    %50 = vector.shape_cast %49 : vector<1x8x3xbf16> to vector<8x3xbf16>
    %c0_50 = arith.constant 0 : index
    %c0_51 = arith.constant 0 : index
    %c17 = arith.constant 17 : index
    %51 = vector.load %arg2[%c0_50, %c0_51, %c17] : memref<4x3x578xbf16, #tpu.memory_space<vmem>>, vector<1x3x560xbf16>
    %52 = vector.shape_cast %51 : vector<1x3x560xbf16> to vector<3x560xbf16>
    %cst_52 = arith.constant dense<0.000000e+00> : vector<8x560xf32>
    %53 = tpu.matmul %50, %52, %cst_52 {dimension_numbers = #tpu.dot_dimension_numbers<[1], [0], [0], [1], [0, 0, 1, 1], [], []>} : vector<8x3xbf16>, vector<3x560xbf16>, vector<8x560xf32> -> vector<8x560xf32>
    %54 = arith.addf %48, %53 : vector<8x560xf32>
    %c9 = arith.constant 9 : index
    %c0_53 = arith.constant 0 : index
    %c0_54 = arith.constant 0 : index
    %55 = vector.load %arg1[%c9, %c0_53, %c0_54] : memref<16x8x3xbf16, #tpu.memory_space<vmem>>, vector<1x8x3xbf16>
    %56 = vector.shape_cast %55 : vector<1x8x3xbf16> to vector<8x3xbf16>
    %c1_55 = arith.constant 1 : index
    %c0_56 = arith.constant 0 : index
    %c17_57 = arith.constant 17 : index
    %57 = vector.load %arg2[%c1_55, %c0_56, %c17_57] : memref<4x3x578xbf16, #tpu.memory_space<vmem>>, vector<1x3x560xbf16>
    %58 = vector.shape_cast %57 : vector<1x3x560xbf16> to vector<3x560xbf16>
    %cst_58 = arith.constant dense<0.000000e+00> : vector<8x560xf32>
    %59 = tpu.matmul %56, %58, %cst_58 {dimension_numbers = #tpu.dot_dimension_numbers<[1], [0], [0], [1], [0, 0, 1, 1], [], []>} : vector<8x3xbf16>, vector<3x560xbf16>, vector<8x560xf32> -> vector<8x560xf32>
    %60 = arith.addf %54, %59 : vector<8x560xf32>
    %c10 = arith.constant 10 : index
    %c0_59 = arith.constant 0 : index
    %c0_60 = arith.constant 0 : index
    %61 = vector.load %arg1[%c10, %c0_59, %c0_60] : memref<16x8x3xbf16, #tpu.memory_space<vmem>>, vector<1x8x3xbf16>
    %62 = vector.shape_cast %61 : vector<1x8x3xbf16> to vector<8x3xbf16>
    %c0_61 = arith.constant 0 : index
    %c0_62 = arith.constant 0 : index
    %c18 = arith.constant 18 : index
    %63 = vector.load %arg2[%c0_61, %c0_62, %c18] : memref<4x3x578xbf16, #tpu.memory_space<vmem>>, vector<1x3x560xbf16>
    %64 = vector.shape_cast %63 : vector<1x3x560xbf16> to vector<3x560xbf16>
    %cst_63 = arith.constant dense<0.000000e+00> : vector<8x560xf32>
    %65 = tpu.matmul %62, %64, %cst_63 {dimension_numbers = #tpu.dot_dimension_numbers<[1], [0], [0], [1], [0, 0, 1, 1], [], []>} : vector<8x3xbf16>, vector<3x560xbf16>, vector<8x560xf32> -> vector<8x560xf32>
    %66 = arith.addf %60, %65 : vector<8x560xf32>
    %c11 = arith.constant 11 : index
    %c0_64 = arith.constant 0 : index
    %c0_65 = arith.constant 0 : index
    %67 = vector.load %arg1[%c11, %c0_64, %c0_65] : memref<16x8x3xbf16, #tpu.memory_space<vmem>>, vector<1x8x3xbf16>
    %68 = vector.shape_cast %67 : vector<1x8x3xbf16> to vector<8x3xbf16>
    %c1_66 = arith.constant 1 : index
    %c0_67 = arith.constant 0 : index
    %c18_68 = arith.constant 18 : index
    %69 = vector.load %arg2[%c1_66, %c0_67, %c18_68] : memref<4x3x578xbf16, #tpu.memory_space<vmem>>, vector<1x3x560xbf16>
    %70 = vector.shape_cast %69 : vector<1x3x560xbf16> to vector<3x560xbf16>
    %cst_69 = arith.constant dense<0.000000e+00> : vector<8x560xf32>
    %71 = tpu.matmul %68, %70, %cst_69 {dimension_numbers = #tpu.dot_dimension_numbers<[1], [0], [0], [1], [0, 0, 1, 1], [], []>} : vector<8x3xbf16>, vector<3x560xbf16>, vector<8x560xf32> -> vector<8x560xf32>
    %72 = arith.addf %66, %71 : vector<8x560xf32>
    %c12 = arith.constant 12 : index
    %c0_70 = arith.constant 0 : index
    %c0_71 = arith.constant 0 : index
    %73 = vector.load %arg1[%c12, %c0_70, %c0_71] : memref<16x8x3xbf16, #tpu.memory_space<vmem>>, vector<1x8x3xbf16>
    %74 = vector.shape_cast %73 : vector<1x8x3xbf16> to vector<8x3xbf16>
    %c2_72 = arith.constant 2 : index
    %c0_73 = arith.constant 0 : index
    %c17_74 = arith.constant 17 : index
    %75 = vector.load %arg2[%c2_72, %c0_73, %c17_74] : memref<4x3x578xbf16, #tpu.memory_space<vmem>>, vector<1x3x560xbf16>
    %76 = vector.shape_cast %75 : vector<1x3x560xbf16> to vector<3x560xbf16>
    %cst_75 = arith.constant dense<0.000000e+00> : vector<8x560xf32>
    %77 = tpu.matmul %74, %76, %cst_75 {dimension_numbers = #tpu.dot_dimension_numbers<[1], [0], [0], [1], [0, 0, 1, 1], [], []>} : vector<8x3xbf16>, vector<3x560xbf16>, vector<8x560xf32> -> vector<8x560xf32>
    %78 = arith.addf %72, %77 : vector<8x560xf32>
    %c13 = arith.constant 13 : index
    %c0_76 = arith.constant 0 : index
    %c0_77 = arith.constant 0 : index
    %79 = vector.load %arg1[%c13, %c0_76, %c0_77] : memref<16x8x3xbf16, #tpu.memory_space<vmem>>, vector<1x8x3xbf16>
    %80 = vector.shape_cast %79 : vector<1x8x3xbf16> to vector<8x3xbf16>
    %c3_78 = arith.constant 3 : index
    %c0_79 = arith.constant 0 : index
    %c17_80 = arith.constant 17 : index
    %81 = vector.load %arg2[%c3_78, %c0_79, %c17_80] : memref<4x3x578xbf16, #tpu.memory_space<vmem>>, vector<1x3x560xbf16>
    %82 = vector.shape_cast %81 : vector<1x3x560xbf16> to vector<3x560xbf16>
    %cst_81 = arith.constant dense<0.000000e+00> : vector<8x560xf32>
    %83 = tpu.matmul %80, %82, %cst_81 {dimension_numbers = #tpu.dot_dimension_numbers<[1], [0], [0], [1], [0, 0, 1, 1], [], []>} : vector<8x3xbf16>, vector<3x560xbf16>, vector<8x560xf32> -> vector<8x560xf32>
    %84 = arith.addf %78, %83 : vector<8x560xf32>
    %c14 = arith.constant 14 : index
    %c0_82 = arith.constant 0 : index
    %c0_83 = arith.constant 0 : index
    %85 = vector.load %arg1[%c14, %c0_82, %c0_83] : memref<16x8x3xbf16, #tpu.memory_space<vmem>>, vector<1x8x3xbf16>
    %86 = vector.shape_cast %85 : vector<1x8x3xbf16> to vector<8x3xbf16>
    %c2_84 = arith.constant 2 : index
    %c0_85 = arith.constant 0 : index
    %c18_86 = arith.constant 18 : index
    %87 = vector.load %arg2[%c2_84, %c0_85, %c18_86] : memref<4x3x578xbf16, #tpu.memory_space<vmem>>, vector<1x3x560xbf16>
    %88 = vector.shape_cast %87 : vector<1x3x560xbf16> to vector<3x560xbf16>
    %cst_87 = arith.constant dense<0.000000e+00> : vector<8x560xf32>
    %89 = tpu.matmul %86, %88, %cst_87 {dimension_numbers = #tpu.dot_dimension_numbers<[1], [0], [0], [1], [0, 0, 1, 1], [], []>} : vector<8x3xbf16>, vector<3x560xbf16>, vector<8x560xf32> -> vector<8x560xf32>
    %90 = arith.addf %84, %89 : vector<8x560xf32>
    %c15 = arith.constant 15 : index
    %c0_88 = arith.constant 0 : index
    %c0_89 = arith.constant 0 : index
    %91 = vector.load %arg1[%c15, %c0_88, %c0_89] : memref<16x8x3xbf16, #tpu.memory_space<vmem>>, vector<1x8x3xbf16>
    %92 = vector.shape_cast %91 : vector<1x8x3xbf16> to vector<8x3xbf16>
    %c3_90 = arith.constant 3 : index
    %c0_91 = arith.constant 0 : index
    %c18_92 = arith.constant 18 : index
    %93 = vector.load %arg2[%c3_90, %c0_91, %c18_92] : memref<4x3x578xbf16, #tpu.memory_space<vmem>>, vector<1x3x560xbf16>
    %94 = vector.shape_cast %93 : vector<1x3x560xbf16> to vector<3x560xbf16>
    %cst_93 = arith.constant dense<0.000000e+00> : vector<8x560xf32>
    %95 = tpu.matmul %92, %94, %cst_93 {dimension_numbers = #tpu.dot_dimension_numbers<[1], [0], [0], [1], [0, 0, 1, 1], [], []>} : vector<8x3xbf16>, vector<3x560xbf16>, vector<8x560xf32> -> vector<8x560xf32>
    %96 = arith.addf %90, %95 : vector<8x560xf32>
    %c0_94 = arith.constant 0 : index
    %c0_95 = arith.constant 0 : index
    %97 = vector.load %arg3[%c0_94, %c0_95] : memref<8x1xf32, #tpu.memory_space<vmem>>, vector<8x1xf32>
    %98 = vector.broadcast %97 : vector<8x1xf32> to vector<8x560xf32>
    %99 = arith.addf %96, %98 : vector<8x560xf32>
    %cst_96 = arith.constant 0.000000e+00 : f32
    %100 = vector.broadcast %cst_96 : f32 to vector<8x560xf32>
    %101 = arith.cmpf ogt, %99, %100 : vector<8x560xf32>
    %cst_97 = arith.constant 2.000000e-01 : f32
    %102 = vector.broadcast %cst_97 : f32 to vector<8x560xf32>
    %103 = arith.mulf %102, %99 : vector<8x560xf32>
    %104 = arith.select %101, %99, %103 : vector<8x560xi1>, vector<8x560xf32>
    %105 = arith.truncf %104 : vector<8x560xf32> to vector<8x560xbf16>
    %c0_98 = arith.constant 0 : index
    %c0_99 = arith.constant 0 : index
    %106 = vector.load %arg4[%c0_98, %c0_99] : memref<8x560xbf16, #tpu.memory_space<vmem>>, vector<8x560xbf16>
    tpu.vector_store %arg4[%c0_98, %c0_99], %105 {strides = array<i32>} : memref<8x560xbf16, #tpu.memory_space<vmem>>, vector<8x560xbf16>,
    return
  }
  func.func @transform_0(%arg0: i32) -> (i32, i32, i32) {
    %c0_i32 = arith.constant 0 : i32
    %c0_i32_0 = arith.constant 0 : i32
    %c0_i32_1 = arith.constant 0 : i32
    return %c0_i32, %arg0, %c0_i32_0 : i32, i32, i32
  }
  func.func @transform_1(%arg0: i32) -> (i32, i32, i32) {
    %c0_i32 = arith.constant 0 : i32
    %c0_i32_0 = arith.constant 0 : i32
    %c0_i32_1 = arith.constant 0 : i32
    %c0_i32_2 = arith.constant 0 : i32
    return %c0_i32, %c0_i32_0, %c0_i32_1 : i32, i32, i32
  }
  func.func @transform_2(%arg0: i32) -> (i32, i32) {
    %c0_i32 = arith.constant 0 : i32
    %c0_i32_0 = arith.constant 0 : i32
    return %arg0, %c0_i32 : i32, i32
  }
  func.func @transform_3(%arg0: i32) -> (i32, i32) {
    %c0_i32 = arith.constant 0 : i32
    %c0_i32_0 = arith.constant 0 : i32
    return %arg0, %c0_i32 : i32, i32
  }
}

module attributes {stable_mosaic.version = 11 : i64} {
  func.func @_conv_kernel(%arg0: i32, %arg1: memref<16x16x8xbf16, #tpu.memory_space<vmem>>, %arg2: memref<4x8x162xbf16, #tpu.memory_space<vmem>>, %arg3: memref<16x1xf32, #tpu.memory_space<vmem>>, %arg4: memref<16x1xf32, #tpu.memory_space<vmem>>, %arg5: memref<1x152xf32, #tpu.memory_space<vmem>>, %arg6: memref<16x152xbf16, #tpu.memory_space<vmem>>) attributes {dimension_semantics = [#tpu.dimension_semantics<parallel>], iteration_bounds = array<i64: 1>, scalar_prefetch = 0 : i64, scratch_operands = 0 : i64, tpu.core_type = #tpu.core_type<tc>, window_params = [{transform_indices = @transform_0, window_bounds = array<i64: 16, 16, 8>}, {pipeline_mode = #tpu.pipeline_mode<synchronous>, transform_indices = @transform_1, window_bounds = array<i64: 4, 8, 162>}, {transform_indices = @transform_2, window_bounds = array<i64: 16, 1>}, {transform_indices = @transform_3, window_bounds = array<i64: 16, 1>}, {pipeline_mode = #tpu.pipeline_mode<synchronous>, transform_indices = @transform_4, window_bounds = array<i64: 1, 152>}, {transform_indices = @transform_5, window_bounds = array<i64: 16, 152>}]} {
    %cst = arith.constant 0.000000e+00 : f32
    %0 = vector.broadcast %cst : f32 to vector<16x152xf32>
    %c0 = arith.constant 0 : index
    %c0_0 = arith.constant 0 : index
    %c0_1 = arith.constant 0 : index
    %1 = vector.load %arg1[%c0, %c0_0, %c0_1] : memref<16x16x8xbf16, #tpu.memory_space<vmem>>, vector<1x16x8xbf16>
    %2 = vector.shape_cast %1 : vector<1x16x8xbf16> to vector<16x8xbf16>
    %c0_2 = arith.constant 0 : index
    %c0_3 = arith.constant 0 : index
    %c0_4 = arith.constant 0 : index
    %3 = vector.load %arg2[%c0_2, %c0_3, %c0_4] : memref<4x8x162xbf16, #tpu.memory_space<vmem>>, vector<1x8x152xbf16>
    %4 = vector.shape_cast %3 : vector<1x8x152xbf16> to vector<8x152xbf16>
    %cst_5 = arith.constant dense<0.000000e+00> : vector<16x152xf32>
    %5 = tpu.matmul %2, %4, %cst_5 {dimension_numbers = #tpu.dot_dimension_numbers<[1], [0], [0], [1], [0, 0, 1, 1], [], []>} : vector<16x8xbf16>, vector<8x152xbf16>, vector<16x152xf32> -> vector<16x152xf32>
    %6 = arith.addf %0, %5 : vector<16x152xf32>
    %c1 = arith.constant 1 : index
    %c0_6 = arith.constant 0 : index
    %c0_7 = arith.constant 0 : index
    %7 = vector.load %arg1[%c1, %c0_6, %c0_7] : memref<16x16x8xbf16, #tpu.memory_space<vmem>>, vector<1x16x8xbf16>
    %8 = vector.shape_cast %7 : vector<1x16x8xbf16> to vector<16x8xbf16>
    %c1_8 = arith.constant 1 : index
    %c0_9 = arith.constant 0 : index
    %c0_10 = arith.constant 0 : index
    %9 = vector.load %arg2[%c1_8, %c0_9, %c0_10] : memref<4x8x162xbf16, #tpu.memory_space<vmem>>, vector<1x8x152xbf16>
    %10 = vector.shape_cast %9 : vector<1x8x152xbf16> to vector<8x152xbf16>
    %cst_11 = arith.constant dense<0.000000e+00> : vector<16x152xf32>
    %11 = tpu.matmul %8, %10, %cst_11 {dimension_numbers = #tpu.dot_dimension_numbers<[1], [0], [0], [1], [0, 0, 1, 1], [], []>} : vector<16x8xbf16>, vector<8x152xbf16>, vector<16x152xf32> -> vector<16x152xf32>
    %12 = arith.addf %6, %11 : vector<16x152xf32>
    %c2 = arith.constant 2 : index
    %c0_12 = arith.constant 0 : index
    %c0_13 = arith.constant 0 : index
    %13 = vector.load %arg1[%c2, %c0_12, %c0_13] : memref<16x16x8xbf16, #tpu.memory_space<vmem>>, vector<1x16x8xbf16>
    %14 = vector.shape_cast %13 : vector<1x16x8xbf16> to vector<16x8xbf16>
    %c0_14 = arith.constant 0 : index
    %c0_15 = arith.constant 0 : index
    %c1_16 = arith.constant 1 : index
    %15 = vector.load %arg2[%c0_14, %c0_15, %c1_16] : memref<4x8x162xbf16, #tpu.memory_space<vmem>>, vector<1x8x152xbf16>
    %16 = vector.shape_cast %15 : vector<1x8x152xbf16> to vector<8x152xbf16>
    %cst_17 = arith.constant dense<0.000000e+00> : vector<16x152xf32>
    %17 = tpu.matmul %14, %16, %cst_17 {dimension_numbers = #tpu.dot_dimension_numbers<[1], [0], [0], [1], [0, 0, 1, 1], [], []>} : vector<16x8xbf16>, vector<8x152xbf16>, vector<16x152xf32> -> vector<16x152xf32>
    %18 = arith.addf %12, %17 : vector<16x152xf32>
    %c3 = arith.constant 3 : index
    %c0_18 = arith.constant 0 : index
    %c0_19 = arith.constant 0 : index
    %19 = vector.load %arg1[%c3, %c0_18, %c0_19] : memref<16x16x8xbf16, #tpu.memory_space<vmem>>, vector<1x16x8xbf16>
    %20 = vector.shape_cast %19 : vector<1x16x8xbf16> to vector<16x8xbf16>
    %c1_20 = arith.constant 1 : index
    %c0_21 = arith.constant 0 : index
    %c1_22 = arith.constant 1 : index
    %21 = vector.load %arg2[%c1_20, %c0_21, %c1_22] : memref<4x8x162xbf16, #tpu.memory_space<vmem>>, vector<1x8x152xbf16>
    %22 = vector.shape_cast %21 : vector<1x8x152xbf16> to vector<8x152xbf16>
    %cst_23 = arith.constant dense<0.000000e+00> : vector<16x152xf32>
    %23 = tpu.matmul %20, %22, %cst_23 {dimension_numbers = #tpu.dot_dimension_numbers<[1], [0], [0], [1], [0, 0, 1, 1], [], []>} : vector<16x8xbf16>, vector<8x152xbf16>, vector<16x152xf32> -> vector<16x152xf32>
    %24 = arith.addf %18, %23 : vector<16x152xf32>
    %c4 = arith.constant 4 : index
    %c0_24 = arith.constant 0 : index
    %c0_25 = arith.constant 0 : index
    %25 = vector.load %arg1[%c4, %c0_24, %c0_25] : memref<16x16x8xbf16, #tpu.memory_space<vmem>>, vector<1x16x8xbf16>
    %26 = vector.shape_cast %25 : vector<1x16x8xbf16> to vector<16x8xbf16>
    %c2_26 = arith.constant 2 : index
    %c0_27 = arith.constant 0 : index
    %c0_28 = arith.constant 0 : index
    %27 = vector.load %arg2[%c2_26, %c0_27, %c0_28] : memref<4x8x162xbf16, #tpu.memory_space<vmem>>, vector<1x8x152xbf16>
    %28 = vector.shape_cast %27 : vector<1x8x152xbf16> to vector<8x152xbf16>
    %cst_29 = arith.constant dense<0.000000e+00> : vector<16x152xf32>
    %29 = tpu.matmul %26, %28, %cst_29 {dimension_numbers = #tpu.dot_dimension_numbers<[1], [0], [0], [1], [0, 0, 1, 1], [], []>} : vector<16x8xbf16>, vector<8x152xbf16>, vector<16x152xf32> -> vector<16x152xf32>
    %30 = arith.addf %24, %29 : vector<16x152xf32>
    %c5 = arith.constant 5 : index
    %c0_30 = arith.constant 0 : index
    %c0_31 = arith.constant 0 : index
    %31 = vector.load %arg1[%c5, %c0_30, %c0_31] : memref<16x16x8xbf16, #tpu.memory_space<vmem>>, vector<1x16x8xbf16>
    %32 = vector.shape_cast %31 : vector<1x16x8xbf16> to vector<16x8xbf16>
    %c3_32 = arith.constant 3 : index
    %c0_33 = arith.constant 0 : index
    %c0_34 = arith.constant 0 : index
    %33 = vector.load %arg2[%c3_32, %c0_33, %c0_34] : memref<4x8x162xbf16, #tpu.memory_space<vmem>>, vector<1x8x152xbf16>
    %34 = vector.shape_cast %33 : vector<1x8x152xbf16> to vector<8x152xbf16>
    %cst_35 = arith.constant dense<0.000000e+00> : vector<16x152xf32>
    %35 = tpu.matmul %32, %34, %cst_35 {dimension_numbers = #tpu.dot_dimension_numbers<[1], [0], [0], [1], [0, 0, 1, 1], [], []>} : vector<16x8xbf16>, vector<8x152xbf16>, vector<16x152xf32> -> vector<16x152xf32>
    %36 = arith.addf %30, %35 : vector<16x152xf32>
    %c6 = arith.constant 6 : index
    %c0_36 = arith.constant 0 : index
    %c0_37 = arith.constant 0 : index
    %37 = vector.load %arg1[%c6, %c0_36, %c0_37] : memref<16x16x8xbf16, #tpu.memory_space<vmem>>, vector<1x16x8xbf16>
    %38 = vector.shape_cast %37 : vector<1x16x8xbf16> to vector<16x8xbf16>
    %c2_38 = arith.constant 2 : index
    %c0_39 = arith.constant 0 : index
    %c1_40 = arith.constant 1 : index
    %39 = vector.load %arg2[%c2_38, %c0_39, %c1_40] : memref<4x8x162xbf16, #tpu.memory_space<vmem>>, vector<1x8x152xbf16>
    %40 = vector.shape_cast %39 : vector<1x8x152xbf16> to vector<8x152xbf16>
    %cst_41 = arith.constant dense<0.000000e+00> : vector<16x152xf32>
    %41 = tpu.matmul %38, %40, %cst_41 {dimension_numbers = #tpu.dot_dimension_numbers<[1], [0], [0], [1], [0, 0, 1, 1], [], []>} : vector<16x8xbf16>, vector<8x152xbf16>, vector<16x152xf32> -> vector<16x152xf32>
    %42 = arith.addf %36, %41 : vector<16x152xf32>
    %c7 = arith.constant 7 : index
    %c0_42 = arith.constant 0 : index
    %c0_43 = arith.constant 0 : index
    %43 = vector.load %arg1[%c7, %c0_42, %c0_43] : memref<16x16x8xbf16, #tpu.memory_space<vmem>>, vector<1x16x8xbf16>
    %44 = vector.shape_cast %43 : vector<1x16x8xbf16> to vector<16x8xbf16>
    %c3_44 = arith.constant 3 : index
    %c0_45 = arith.constant 0 : index
    %c1_46 = arith.constant 1 : index
    %45 = vector.load %arg2[%c3_44, %c0_45, %c1_46] : memref<4x8x162xbf16, #tpu.memory_space<vmem>>, vector<1x8x152xbf16>
    %46 = vector.shape_cast %45 : vector<1x8x152xbf16> to vector<8x152xbf16>
    %cst_47 = arith.constant dense<0.000000e+00> : vector<16x152xf32>
    %47 = tpu.matmul %44, %46, %cst_47 {dimension_numbers = #tpu.dot_dimension_numbers<[1], [0], [0], [1], [0, 0, 1, 1], [], []>} : vector<16x8xbf16>, vector<8x152xbf16>, vector<16x152xf32> -> vector<16x152xf32>
    %48 = arith.addf %42, %47 : vector<16x152xf32>
    %c8 = arith.constant 8 : index
    %c0_48 = arith.constant 0 : index
    %c0_49 = arith.constant 0 : index
    %49 = vector.load %arg1[%c8, %c0_48, %c0_49] : memref<16x16x8xbf16, #tpu.memory_space<vmem>>, vector<1x16x8xbf16>
    %50 = vector.shape_cast %49 : vector<1x16x8xbf16> to vector<16x8xbf16>
    %c0_50 = arith.constant 0 : index
    %c0_51 = arith.constant 0 : index
    %c9 = arith.constant 9 : index
    %51 = vector.load %arg2[%c0_50, %c0_51, %c9] : memref<4x8x162xbf16, #tpu.memory_space<vmem>>, vector<1x8x152xbf16>
    %52 = vector.shape_cast %51 : vector<1x8x152xbf16> to vector<8x152xbf16>
    %cst_52 = arith.constant dense<0.000000e+00> : vector<16x152xf32>
    %53 = tpu.matmul %50, %52, %cst_52 {dimension_numbers = #tpu.dot_dimension_numbers<[1], [0], [0], [1], [0, 0, 1, 1], [], []>} : vector<16x8xbf16>, vector<8x152xbf16>, vector<16x152xf32> -> vector<16x152xf32>
    %54 = arith.addf %48, %53 : vector<16x152xf32>
    %c9_53 = arith.constant 9 : index
    %c0_54 = arith.constant 0 : index
    %c0_55 = arith.constant 0 : index
    %55 = vector.load %arg1[%c9_53, %c0_54, %c0_55] : memref<16x16x8xbf16, #tpu.memory_space<vmem>>, vector<1x16x8xbf16>
    %56 = vector.shape_cast %55 : vector<1x16x8xbf16> to vector<16x8xbf16>
    %c1_56 = arith.constant 1 : index
    %c0_57 = arith.constant 0 : index
    %c9_58 = arith.constant 9 : index
    %57 = vector.load %arg2[%c1_56, %c0_57, %c9_58] : memref<4x8x162xbf16, #tpu.memory_space<vmem>>, vector<1x8x152xbf16>
    %58 = vector.shape_cast %57 : vector<1x8x152xbf16> to vector<8x152xbf16>
    %cst_59 = arith.constant dense<0.000000e+00> : vector<16x152xf32>
    %59 = tpu.matmul %56, %58, %cst_59 {dimension_numbers = #tpu.dot_dimension_numbers<[1], [0], [0], [1], [0, 0, 1, 1], [], []>} : vector<16x8xbf16>, vector<8x152xbf16>, vector<16x152xf32> -> vector<16x152xf32>
    %60 = arith.addf %54, %59 : vector<16x152xf32>
    %c10 = arith.constant 10 : index
    %c0_60 = arith.constant 0 : index
    %c0_61 = arith.constant 0 : index
    %61 = vector.load %arg1[%c10, %c0_60, %c0_61] : memref<16x16x8xbf16, #tpu.memory_space<vmem>>, vector<1x16x8xbf16>
    %62 = vector.shape_cast %61 : vector<1x16x8xbf16> to vector<16x8xbf16>
    %c0_62 = arith.constant 0 : index
    %c0_63 = arith.constant 0 : index
    %c10_64 = arith.constant 10 : index
    %63 = vector.load %arg2[%c0_62, %c0_63, %c10_64] : memref<4x8x162xbf16, #tpu.memory_space<vmem>>, vector<1x8x152xbf16>
    %64 = vector.shape_cast %63 : vector<1x8x152xbf16> to vector<8x152xbf16>
    %cst_65 = arith.constant dense<0.000000e+00> : vector<16x152xf32>
    %65 = tpu.matmul %62, %64, %cst_65 {dimension_numbers = #tpu.dot_dimension_numbers<[1], [0], [0], [1], [0, 0, 1, 1], [], []>} : vector<16x8xbf16>, vector<8x152xbf16>, vector<16x152xf32> -> vector<16x152xf32>
    %66 = arith.addf %60, %65 : vector<16x152xf32>
    %c11 = arith.constant 11 : index
    %c0_66 = arith.constant 0 : index
    %c0_67 = arith.constant 0 : index
    %67 = vector.load %arg1[%c11, %c0_66, %c0_67] : memref<16x16x8xbf16, #tpu.memory_space<vmem>>, vector<1x16x8xbf16>
    %68 = vector.shape_cast %67 : vector<1x16x8xbf16> to vector<16x8xbf16>
    %c1_68 = arith.constant 1 : index
    %c0_69 = arith.constant 0 : index
    %c10_70 = arith.constant 10 : index
    %69 = vector.load %arg2[%c1_68, %c0_69, %c10_70] : memref<4x8x162xbf16, #tpu.memory_space<vmem>>, vector<1x8x152xbf16>
    %70 = vector.shape_cast %69 : vector<1x8x152xbf16> to vector<8x152xbf16>
    %cst_71 = arith.constant dense<0.000000e+00> : vector<16x152xf32>
    %71 = tpu.matmul %68, %70, %cst_71 {dimension_numbers = #tpu.dot_dimension_numbers<[1], [0], [0], [1], [0, 0, 1, 1], [], []>} : vector<16x8xbf16>, vector<8x152xbf16>, vector<16x152xf32> -> vector<16x152xf32>
    %72 = arith.addf %66, %71 : vector<16x152xf32>
    %c12 = arith.constant 12 : index
    %c0_72 = arith.constant 0 : index
    %c0_73 = arith.constant 0 : index
    %73 = vector.load %arg1[%c12, %c0_72, %c0_73] : memref<16x16x8xbf16, #tpu.memory_space<vmem>>, vector<1x16x8xbf16>
    %74 = vector.shape_cast %73 : vector<1x16x8xbf16> to vector<16x8xbf16>
    %c2_74 = arith.constant 2 : index
    %c0_75 = arith.constant 0 : index
    %c9_76 = arith.constant 9 : index
    %75 = vector.load %arg2[%c2_74, %c0_75, %c9_76] : memref<4x8x162xbf16, #tpu.memory_space<vmem>>, vector<1x8x152xbf16>
    %76 = vector.shape_cast %75 : vector<1x8x152xbf16> to vector<8x152xbf16>
    %cst_77 = arith.constant dense<0.000000e+00> : vector<16x152xf32>
    %77 = tpu.matmul %74, %76, %cst_77 {dimension_numbers = #tpu.dot_dimension_numbers<[1], [0], [0], [1], [0, 0, 1, 1], [], []>} : vector<16x8xbf16>, vector<8x152xbf16>, vector<16x152xf32> -> vector<16x152xf32>
    %78 = arith.addf %72, %77 : vector<16x152xf32>
    %c13 = arith.constant 13 : index
    %c0_78 = arith.constant 0 : index
    %c0_79 = arith.constant 0 : index
    %79 = vector.load %arg1[%c13, %c0_78, %c0_79] : memref<16x16x8xbf16, #tpu.memory_space<vmem>>, vector<1x16x8xbf16>
    %80 = vector.shape_cast %79 : vector<1x16x8xbf16> to vector<16x8xbf16>
    %c3_80 = arith.constant 3 : index
    %c0_81 = arith.constant 0 : index
    %c9_82 = arith.constant 9 : index
    %81 = vector.load %arg2[%c3_80, %c0_81, %c9_82] : memref<4x8x162xbf16, #tpu.memory_space<vmem>>, vector<1x8x152xbf16>
    %82 = vector.shape_cast %81 : vector<1x8x152xbf16> to vector<8x152xbf16>
    %cst_83 = arith.constant dense<0.000000e+00> : vector<16x152xf32>
    %83 = tpu.matmul %80, %82, %cst_83 {dimension_numbers = #tpu.dot_dimension_numbers<[1], [0], [0], [1], [0, 0, 1, 1], [], []>} : vector<16x8xbf16>, vector<8x152xbf16>, vector<16x152xf32> -> vector<16x152xf32>
    %84 = arith.addf %78, %83 : vector<16x152xf32>
    %c14 = arith.constant 14 : index
    %c0_84 = arith.constant 0 : index
    %c0_85 = arith.constant 0 : index
    %85 = vector.load %arg1[%c14, %c0_84, %c0_85] : memref<16x16x8xbf16, #tpu.memory_space<vmem>>, vector<1x16x8xbf16>
    %86 = vector.shape_cast %85 : vector<1x16x8xbf16> to vector<16x8xbf16>
    %c2_86 = arith.constant 2 : index
    %c0_87 = arith.constant 0 : index
    %c10_88 = arith.constant 10 : index
    %87 = vector.load %arg2[%c2_86, %c0_87, %c10_88] : memref<4x8x162xbf16, #tpu.memory_space<vmem>>, vector<1x8x152xbf16>
    %88 = vector.shape_cast %87 : vector<1x8x152xbf16> to vector<8x152xbf16>
    %cst_89 = arith.constant dense<0.000000e+00> : vector<16x152xf32>
    %89 = tpu.matmul %86, %88, %cst_89 {dimension_numbers = #tpu.dot_dimension_numbers<[1], [0], [0], [1], [0, 0, 1, 1], [], []>} : vector<16x8xbf16>, vector<8x152xbf16>, vector<16x152xf32> -> vector<16x152xf32>
    %90 = arith.addf %84, %89 : vector<16x152xf32>
    %c15 = arith.constant 15 : index
    %c0_90 = arith.constant 0 : index
    %c0_91 = arith.constant 0 : index
    %91 = vector.load %arg1[%c15, %c0_90, %c0_91] : memref<16x16x8xbf16, #tpu.memory_space<vmem>>, vector<1x16x8xbf16>
    %92 = vector.shape_cast %91 : vector<1x16x8xbf16> to vector<16x8xbf16>
    %c3_92 = arith.constant 3 : index
    %c0_93 = arith.constant 0 : index
    %c10_94 = arith.constant 10 : index
    %93 = vector.load %arg2[%c3_92, %c0_93, %c10_94] : memref<4x8x162xbf16, #tpu.memory_space<vmem>>, vector<1x8x152xbf16>
    %94 = vector.shape_cast %93 : vector<1x8x152xbf16> to vector<8x152xbf16>
    %cst_95 = arith.constant dense<0.000000e+00> : vector<16x152xf32>
    %95 = tpu.matmul %92, %94, %cst_95 {dimension_numbers = #tpu.dot_dimension_numbers<[1], [0], [0], [1], [0, 0, 1, 1], [], []>} : vector<16x8xbf16>, vector<8x152xbf16>, vector<16x152xf32> -> vector<16x152xf32>
    %96 = arith.addf %90, %95 : vector<16x152xf32>
    %c0_96 = arith.constant 0 : index
    %c0_97 = arith.constant 0 : index
    %97 = vector.load %arg5[%c0_96, %c0_97] : memref<1x152xf32, #tpu.memory_space<vmem>>, vector<1x152xf32>
    %98 = vector.broadcast %97 : vector<1x152xf32> to vector<16x152xf32>
    %99 = arith.mulf %96, %98 : vector<16x152xf32>
    %cst_98 = arith.constant dense<0.000000e+00> : vector<16xf32>
    %100 = vector.multi_reduction <add>, %99, %cst_98 [1] : vector<16x152xf32> to vector<16xf32>
    %101 = vector.shape_cast %100 : vector<16xf32> to vector<16x1xf32>
    %cst_99 = arith.constant 7.812500e-03 : f32
    %102 = vector.broadcast %cst_99 : f32 to vector<16x1xf32>
    %103 = arith.mulf %101, %102 : vector<16x1xf32>
    %104 = vector.broadcast %103 : vector<16x1xf32> to vector<16x152xf32>
    %105 = arith.subf %96, %104 : vector<16x152xf32>
    %106 = arith.mulf %105, %105 : vector<16x152xf32>
    %107 = vector.broadcast %97 : vector<1x152xf32> to vector<16x152xf32>
    %108 = arith.mulf %106, %107 : vector<16x152xf32>
    %cst_100 = arith.constant dense<0.000000e+00> : vector<16xf32>
    %109 = vector.multi_reduction <add>, %108, %cst_100 [1] : vector<16x152xf32> to vector<16xf32>
    %110 = vector.shape_cast %109 : vector<16xf32> to vector<16x1xf32>
    %cst_101 = arith.constant 7.812500e-03 : f32
    %111 = vector.broadcast %cst_101 : f32 to vector<16x1xf32>
    %112 = arith.mulf %110, %111 : vector<16x1xf32>
    %cst_102 = arith.constant 9.99999974E-6 : f32
    %113 = vector.broadcast %cst_102 : f32 to vector<16x1xf32>
    %114 = arith.addf %112, %113 : vector<16x1xf32>
    %115 = math.rsqrt %114 : vector<16x1xf32>
    %116 = vector.broadcast %115 : vector<16x1xf32> to vector<16x152xf32>
    %117 = arith.mulf %105, %116 : vector<16x152xf32>
    %c0_103 = arith.constant 0 : index
    %c0_104 = arith.constant 0 : index
    %118 = vector.load %arg3[%c0_103, %c0_104] : memref<16x1xf32, #tpu.memory_space<vmem>>, vector<16x1xf32>
    %119 = vector.broadcast %118 : vector<16x1xf32> to vector<16x152xf32>
    %120 = arith.mulf %117, %119 : vector<16x152xf32>
    %c0_105 = arith.constant 0 : index
    %c0_106 = arith.constant 0 : index
    %121 = vector.load %arg4[%c0_105, %c0_106] : memref<16x1xf32, #tpu.memory_space<vmem>>, vector<16x1xf32>
    %122 = vector.broadcast %121 : vector<16x1xf32> to vector<16x152xf32>
    %123 = arith.addf %120, %122 : vector<16x152xf32>
    %cst_107 = arith.constant 0.000000e+00 : f32
    %124 = vector.broadcast %cst_107 : f32 to vector<16x152xf32>
    %125 = arith.cmpf ogt, %123, %124 : vector<16x152xf32>
    %cst_108 = arith.constant 2.000000e-01 : f32
    %126 = vector.broadcast %cst_108 : f32 to vector<16x152xf32>
    %127 = arith.mulf %126, %123 : vector<16x152xf32>
    %128 = arith.select %125, %123, %127 : vector<16x152xi1>, vector<16x152xf32>
    %129 = arith.truncf %128 : vector<16x152xf32> to vector<16x152xbf16>
    %c0_109 = arith.constant 0 : index
    %c0_110 = arith.constant 0 : index
    %130 = vector.load %arg6[%c0_109, %c0_110] : memref<16x152xbf16, #tpu.memory_space<vmem>>, vector<16x152xbf16>
    tpu.vector_store %arg6[%c0_109, %c0_110], %129 {strides = array<i32>} : memref<16x152xbf16, #tpu.memory_space<vmem>>, vector<16x152xbf16>,
    return
  }
  func.func @transform_0(%arg0: i32) -> (i32, i32, i32) {
    %c0_i32 = arith.constant 0 : i32
    %c0_i32_0 = arith.constant 0 : i32
    %c0_i32_1 = arith.constant 0 : i32
    return %c0_i32, %arg0, %c0_i32_0 : i32, i32, i32
  }
  func.func @transform_1(%arg0: i32) -> (i32, i32, i32) {
    %c0_i32 = arith.constant 0 : i32
    %c0_i32_0 = arith.constant 0 : i32
    %c0_i32_1 = arith.constant 0 : i32
    %c0_i32_2 = arith.constant 0 : i32
    return %c0_i32, %c0_i32_0, %c0_i32_1 : i32, i32, i32
  }
  func.func @transform_2(%arg0: i32) -> (i32, i32) {
    %c0_i32 = arith.constant 0 : i32
    %c0_i32_0 = arith.constant 0 : i32
    return %arg0, %c0_i32 : i32, i32
  }
  func.func @transform_3(%arg0: i32) -> (i32, i32) {
    %c0_i32 = arith.constant 0 : i32
    %c0_i32_0 = arith.constant 0 : i32
    return %arg0, %c0_i32 : i32, i32
  }
  func.func @transform_4(%arg0: i32) -> (i32, i32) {
    %c0_i32 = arith.constant 0 : i32
    %c0_i32_0 = arith.constant 0 : i32
    %c0_i32_1 = arith.constant 0 : i32
    return %c0_i32, %c0_i32_0 : i32, i32
  }
  func.func @transform_5(%arg0: i32) -> (i32, i32) {
    %c0_i32 = arith.constant 0 : i32
    %c0_i32_0 = arith.constant 0 : i32
    return %arg0, %c0_i32 : i32, i32
  }
}

module attributes {stable_mosaic.version = 11 : i64} {
  func.func @_conv_kernel(%arg0: i32, %arg1: memref<16x32x16xbf16, #tpu.memory_space<vmem>>, %arg2: memref<4x16x50xbf16, #tpu.memory_space<vmem>>, %arg3: memref<32x1xf32, #tpu.memory_space<vmem>>, %arg4: memref<32x1xf32, #tpu.memory_space<vmem>>, %arg5: memref<1x44xf32, #tpu.memory_space<vmem>>, %arg6: memref<32x44xbf16, #tpu.memory_space<vmem>>) attributes {dimension_semantics = [#tpu.dimension_semantics<parallel>], iteration_bounds = array<i64: 1>, scalar_prefetch = 0 : i64, scratch_operands = 0 : i64, tpu.core_type = #tpu.core_type<tc>, window_params = [{transform_indices = @transform_0, window_bounds = array<i64: 16, 32, 16>}, {pipeline_mode = #tpu.pipeline_mode<synchronous>, transform_indices = @transform_1, window_bounds = array<i64: 4, 16, 50>}, {transform_indices = @transform_2, window_bounds = array<i64: 32, 1>}, {transform_indices = @transform_3, window_bounds = array<i64: 32, 1>}, {pipeline_mode = #tpu.pipeline_mode<synchronous>, transform_indices = @transform_4, window_bounds = array<i64: 1, 44>}, {transform_indices = @transform_5, window_bounds = array<i64: 32, 44>}]} {
    %cst = arith.constant 0.000000e+00 : f32
    %0 = vector.broadcast %cst : f32 to vector<32x44xf32>
    %c0 = arith.constant 0 : index
    %c0_0 = arith.constant 0 : index
    %c0_1 = arith.constant 0 : index
    %1 = vector.load %arg1[%c0, %c0_0, %c0_1] : memref<16x32x16xbf16, #tpu.memory_space<vmem>>, vector<1x32x16xbf16>
    %2 = vector.shape_cast %1 : vector<1x32x16xbf16> to vector<32x16xbf16>
    %c0_2 = arith.constant 0 : index
    %c0_3 = arith.constant 0 : index
    %c0_4 = arith.constant 0 : index
    %3 = vector.load %arg2[%c0_2, %c0_3, %c0_4] : memref<4x16x50xbf16, #tpu.memory_space<vmem>>, vector<1x16x44xbf16>
    %4 = vector.shape_cast %3 : vector<1x16x44xbf16> to vector<16x44xbf16>
    %cst_5 = arith.constant dense<0.000000e+00> : vector<32x44xf32>
    %5 = tpu.matmul %2, %4, %cst_5 {dimension_numbers = #tpu.dot_dimension_numbers<[1], [0], [0], [1], [0, 0, 1, 1], [], []>} : vector<32x16xbf16>, vector<16x44xbf16>, vector<32x44xf32> -> vector<32x44xf32>
    %6 = arith.addf %0, %5 : vector<32x44xf32>
    %c1 = arith.constant 1 : index
    %c0_6 = arith.constant 0 : index
    %c0_7 = arith.constant 0 : index
    %7 = vector.load %arg1[%c1, %c0_6, %c0_7] : memref<16x32x16xbf16, #tpu.memory_space<vmem>>, vector<1x32x16xbf16>
    %8 = vector.shape_cast %7 : vector<1x32x16xbf16> to vector<32x16xbf16>
    %c1_8 = arith.constant 1 : index
    %c0_9 = arith.constant 0 : index
    %c0_10 = arith.constant 0 : index
    %9 = vector.load %arg2[%c1_8, %c0_9, %c0_10] : memref<4x16x50xbf16, #tpu.memory_space<vmem>>, vector<1x16x44xbf16>
    %10 = vector.shape_cast %9 : vector<1x16x44xbf16> to vector<16x44xbf16>
    %cst_11 = arith.constant dense<0.000000e+00> : vector<32x44xf32>
    %11 = tpu.matmul %8, %10, %cst_11 {dimension_numbers = #tpu.dot_dimension_numbers<[1], [0], [0], [1], [0, 0, 1, 1], [], []>} : vector<32x16xbf16>, vector<16x44xbf16>, vector<32x44xf32> -> vector<32x44xf32>
    %12 = arith.addf %6, %11 : vector<32x44xf32>
    %c2 = arith.constant 2 : index
    %c0_12 = arith.constant 0 : index
    %c0_13 = arith.constant 0 : index
    %13 = vector.load %arg1[%c2, %c0_12, %c0_13] : memref<16x32x16xbf16, #tpu.memory_space<vmem>>, vector<1x32x16xbf16>
    %14 = vector.shape_cast %13 : vector<1x32x16xbf16> to vector<32x16xbf16>
    %c0_14 = arith.constant 0 : index
    %c0_15 = arith.constant 0 : index
    %c1_16 = arith.constant 1 : index
    %15 = vector.load %arg2[%c0_14, %c0_15, %c1_16] : memref<4x16x50xbf16, #tpu.memory_space<vmem>>, vector<1x16x44xbf16>
    %16 = vector.shape_cast %15 : vector<1x16x44xbf16> to vector<16x44xbf16>
    %cst_17 = arith.constant dense<0.000000e+00> : vector<32x44xf32>
    %17 = tpu.matmul %14, %16, %cst_17 {dimension_numbers = #tpu.dot_dimension_numbers<[1], [0], [0], [1], [0, 0, 1, 1], [], []>} : vector<32x16xbf16>, vector<16x44xbf16>, vector<32x44xf32> -> vector<32x44xf32>
    %18 = arith.addf %12, %17 : vector<32x44xf32>
    %c3 = arith.constant 3 : index
    %c0_18 = arith.constant 0 : index
    %c0_19 = arith.constant 0 : index
    %19 = vector.load %arg1[%c3, %c0_18, %c0_19] : memref<16x32x16xbf16, #tpu.memory_space<vmem>>, vector<1x32x16xbf16>
    %20 = vector.shape_cast %19 : vector<1x32x16xbf16> to vector<32x16xbf16>
    %c1_20 = arith.constant 1 : index
    %c0_21 = arith.constant 0 : index
    %c1_22 = arith.constant 1 : index
    %21 = vector.load %arg2[%c1_20, %c0_21, %c1_22] : memref<4x16x50xbf16, #tpu.memory_space<vmem>>, vector<1x16x44xbf16>
    %22 = vector.shape_cast %21 : vector<1x16x44xbf16> to vector<16x44xbf16>
    %cst_23 = arith.constant dense<0.000000e+00> : vector<32x44xf32>
    %23 = tpu.matmul %20, %22, %cst_23 {dimension_numbers = #tpu.dot_dimension_numbers<[1], [0], [0], [1], [0, 0, 1, 1], [], []>} : vector<32x16xbf16>, vector<16x44xbf16>, vector<32x44xf32> -> vector<32x44xf32>
    %24 = arith.addf %18, %23 : vector<32x44xf32>
    %c4 = arith.constant 4 : index
    %c0_24 = arith.constant 0 : index
    %c0_25 = arith.constant 0 : index
    %25 = vector.load %arg1[%c4, %c0_24, %c0_25] : memref<16x32x16xbf16, #tpu.memory_space<vmem>>, vector<1x32x16xbf16>
    %26 = vector.shape_cast %25 : vector<1x32x16xbf16> to vector<32x16xbf16>
    %c2_26 = arith.constant 2 : index
    %c0_27 = arith.constant 0 : index
    %c0_28 = arith.constant 0 : index
    %27 = vector.load %arg2[%c2_26, %c0_27, %c0_28] : memref<4x16x50xbf16, #tpu.memory_space<vmem>>, vector<1x16x44xbf16>
    %28 = vector.shape_cast %27 : vector<1x16x44xbf16> to vector<16x44xbf16>
    %cst_29 = arith.constant dense<0.000000e+00> : vector<32x44xf32>
    %29 = tpu.matmul %26, %28, %cst_29 {dimension_numbers = #tpu.dot_dimension_numbers<[1], [0], [0], [1], [0, 0, 1, 1], [], []>} : vector<32x16xbf16>, vector<16x44xbf16>, vector<32x44xf32> -> vector<32x44xf32>
    %30 = arith.addf %24, %29 : vector<32x44xf32>
    %c5 = arith.constant 5 : index
    %c0_30 = arith.constant 0 : index
    %c0_31 = arith.constant 0 : index
    %31 = vector.load %arg1[%c5, %c0_30, %c0_31] : memref<16x32x16xbf16, #tpu.memory_space<vmem>>, vector<1x32x16xbf16>
    %32 = vector.shape_cast %31 : vector<1x32x16xbf16> to vector<32x16xbf16>
    %c3_32 = arith.constant 3 : index
    %c0_33 = arith.constant 0 : index
    %c0_34 = arith.constant 0 : index
    %33 = vector.load %arg2[%c3_32, %c0_33, %c0_34] : memref<4x16x50xbf16, #tpu.memory_space<vmem>>, vector<1x16x44xbf16>
    %34 = vector.shape_cast %33 : vector<1x16x44xbf16> to vector<16x44xbf16>
    %cst_35 = arith.constant dense<0.000000e+00> : vector<32x44xf32>
    %35 = tpu.matmul %32, %34, %cst_35 {dimension_numbers = #tpu.dot_dimension_numbers<[1], [0], [0], [1], [0, 0, 1, 1], [], []>} : vector<32x16xbf16>, vector<16x44xbf16>, vector<32x44xf32> -> vector<32x44xf32>
    %36 = arith.addf %30, %35 : vector<32x44xf32>
    %c6 = arith.constant 6 : index
    %c0_36 = arith.constant 0 : index
    %c0_37 = arith.constant 0 : index
    %37 = vector.load %arg1[%c6, %c0_36, %c0_37] : memref<16x32x16xbf16, #tpu.memory_space<vmem>>, vector<1x32x16xbf16>
    %38 = vector.shape_cast %37 : vector<1x32x16xbf16> to vector<32x16xbf16>
    %c2_38 = arith.constant 2 : index
    %c0_39 = arith.constant 0 : index
    %c1_40 = arith.constant 1 : index
    %39 = vector.load %arg2[%c2_38, %c0_39, %c1_40] : memref<4x16x50xbf16, #tpu.memory_space<vmem>>, vector<1x16x44xbf16>
    %40 = vector.shape_cast %39 : vector<1x16x44xbf16> to vector<16x44xbf16>
    %cst_41 = arith.constant dense<0.000000e+00> : vector<32x44xf32>
    %41 = tpu.matmul %38, %40, %cst_41 {dimension_numbers = #tpu.dot_dimension_numbers<[1], [0], [0], [1], [0, 0, 1, 1], [], []>} : vector<32x16xbf16>, vector<16x44xbf16>, vector<32x44xf32> -> vector<32x44xf32>
    %42 = arith.addf %36, %41 : vector<32x44xf32>
    %c7 = arith.constant 7 : index
    %c0_42 = arith.constant 0 : index
    %c0_43 = arith.constant 0 : index
    %43 = vector.load %arg1[%c7, %c0_42, %c0_43] : memref<16x32x16xbf16, #tpu.memory_space<vmem>>, vector<1x32x16xbf16>
    %44 = vector.shape_cast %43 : vector<1x32x16xbf16> to vector<32x16xbf16>
    %c3_44 = arith.constant 3 : index
    %c0_45 = arith.constant 0 : index
    %c1_46 = arith.constant 1 : index
    %45 = vector.load %arg2[%c3_44, %c0_45, %c1_46] : memref<4x16x50xbf16, #tpu.memory_space<vmem>>, vector<1x16x44xbf16>
    %46 = vector.shape_cast %45 : vector<1x16x44xbf16> to vector<16x44xbf16>
    %cst_47 = arith.constant dense<0.000000e+00> : vector<32x44xf32>
    %47 = tpu.matmul %44, %46, %cst_47 {dimension_numbers = #tpu.dot_dimension_numbers<[1], [0], [0], [1], [0, 0, 1, 1], [], []>} : vector<32x16xbf16>, vector<16x44xbf16>, vector<32x44xf32> -> vector<32x44xf32>
    %48 = arith.addf %42, %47 : vector<32x44xf32>
    %c8 = arith.constant 8 : index
    %c0_48 = arith.constant 0 : index
    %c0_49 = arith.constant 0 : index
    %49 = vector.load %arg1[%c8, %c0_48, %c0_49] : memref<16x32x16xbf16, #tpu.memory_space<vmem>>, vector<1x32x16xbf16>
    %50 = vector.shape_cast %49 : vector<1x32x16xbf16> to vector<32x16xbf16>
    %c0_50 = arith.constant 0 : index
    %c0_51 = arith.constant 0 : index
    %c5_52 = arith.constant 5 : index
    %51 = vector.load %arg2[%c0_50, %c0_51, %c5_52] : memref<4x16x50xbf16, #tpu.memory_space<vmem>>, vector<1x16x44xbf16>
    %52 = vector.shape_cast %51 : vector<1x16x44xbf16> to vector<16x44xbf16>
    %cst_53 = arith.constant dense<0.000000e+00> : vector<32x44xf32>
    %53 = tpu.matmul %50, %52, %cst_53 {dimension_numbers = #tpu.dot_dimension_numbers<[1], [0], [0], [1], [0, 0, 1, 1], [], []>} : vector<32x16xbf16>, vector<16x44xbf16>, vector<32x44xf32> -> vector<32x44xf32>
    %54 = arith.addf %48, %53 : vector<32x44xf32>
    %c9 = arith.constant 9 : index
    %c0_54 = arith.constant 0 : index
    %c0_55 = arith.constant 0 : index
    %55 = vector.load %arg1[%c9, %c0_54, %c0_55] : memref<16x32x16xbf16, #tpu.memory_space<vmem>>, vector<1x32x16xbf16>
    %56 = vector.shape_cast %55 : vector<1x32x16xbf16> to vector<32x16xbf16>
    %c1_56 = arith.constant 1 : index
    %c0_57 = arith.constant 0 : index
    %c5_58 = arith.constant 5 : index
    %57 = vector.load %arg2[%c1_56, %c0_57, %c5_58] : memref<4x16x50xbf16, #tpu.memory_space<vmem>>, vector<1x16x44xbf16>
    %58 = vector.shape_cast %57 : vector<1x16x44xbf16> to vector<16x44xbf16>
    %cst_59 = arith.constant dense<0.000000e+00> : vector<32x44xf32>
    %59 = tpu.matmul %56, %58, %cst_59 {dimension_numbers = #tpu.dot_dimension_numbers<[1], [0], [0], [1], [0, 0, 1, 1], [], []>} : vector<32x16xbf16>, vector<16x44xbf16>, vector<32x44xf32> -> vector<32x44xf32>
    %60 = arith.addf %54, %59 : vector<32x44xf32>
    %c10 = arith.constant 10 : index
    %c0_60 = arith.constant 0 : index
    %c0_61 = arith.constant 0 : index
    %61 = vector.load %arg1[%c10, %c0_60, %c0_61] : memref<16x32x16xbf16, #tpu.memory_space<vmem>>, vector<1x32x16xbf16>
    %62 = vector.shape_cast %61 : vector<1x32x16xbf16> to vector<32x16xbf16>
    %c0_62 = arith.constant 0 : index
    %c0_63 = arith.constant 0 : index
    %c6_64 = arith.constant 6 : index
    %63 = vector.load %arg2[%c0_62, %c0_63, %c6_64] : memref<4x16x50xbf16, #tpu.memory_space<vmem>>, vector<1x16x44xbf16>
    %64 = vector.shape_cast %63 : vector<1x16x44xbf16> to vector<16x44xbf16>
    %cst_65 = arith.constant dense<0.000000e+00> : vector<32x44xf32>
    %65 = tpu.matmul %62, %64, %cst_65 {dimension_numbers = #tpu.dot_dimension_numbers<[1], [0], [0], [1], [0, 0, 1, 1], [], []>} : vector<32x16xbf16>, vector<16x44xbf16>, vector<32x44xf32> -> vector<32x44xf32>
    %66 = arith.addf %60, %65 : vector<32x44xf32>
    %c11 = arith.constant 11 : index
    %c0_66 = arith.constant 0 : index
    %c0_67 = arith.constant 0 : index
    %67 = vector.load %arg1[%c11, %c0_66, %c0_67] : memref<16x32x16xbf16, #tpu.memory_space<vmem>>, vector<1x32x16xbf16>
    %68 = vector.shape_cast %67 : vector<1x32x16xbf16> to vector<32x16xbf16>
    %c1_68 = arith.constant 1 : index
    %c0_69 = arith.constant 0 : index
    %c6_70 = arith.constant 6 : index
    %69 = vector.load %arg2[%c1_68, %c0_69, %c6_70] : memref<4x16x50xbf16, #tpu.memory_space<vmem>>, vector<1x16x44xbf16>
    %70 = vector.shape_cast %69 : vector<1x16x44xbf16> to vector<16x44xbf16>
    %cst_71 = arith.constant dense<0.000000e+00> : vector<32x44xf32>
    %71 = tpu.matmul %68, %70, %cst_71 {dimension_numbers = #tpu.dot_dimension_numbers<[1], [0], [0], [1], [0, 0, 1, 1], [], []>} : vector<32x16xbf16>, vector<16x44xbf16>, vector<32x44xf32> -> vector<32x44xf32>
    %72 = arith.addf %66, %71 : vector<32x44xf32>
    %c12 = arith.constant 12 : index
    %c0_72 = arith.constant 0 : index
    %c0_73 = arith.constant 0 : index
    %73 = vector.load %arg1[%c12, %c0_72, %c0_73] : memref<16x32x16xbf16, #tpu.memory_space<vmem>>, vector<1x32x16xbf16>
    %74 = vector.shape_cast %73 : vector<1x32x16xbf16> to vector<32x16xbf16>
    %c2_74 = arith.constant 2 : index
    %c0_75 = arith.constant 0 : index
    %c5_76 = arith.constant 5 : index
    %75 = vector.load %arg2[%c2_74, %c0_75, %c5_76] : memref<4x16x50xbf16, #tpu.memory_space<vmem>>, vector<1x16x44xbf16>
    %76 = vector.shape_cast %75 : vector<1x16x44xbf16> to vector<16x44xbf16>
    %cst_77 = arith.constant dense<0.000000e+00> : vector<32x44xf32>
    %77 = tpu.matmul %74, %76, %cst_77 {dimension_numbers = #tpu.dot_dimension_numbers<[1], [0], [0], [1], [0, 0, 1, 1], [], []>} : vector<32x16xbf16>, vector<16x44xbf16>, vector<32x44xf32> -> vector<32x44xf32>
    %78 = arith.addf %72, %77 : vector<32x44xf32>
    %c13 = arith.constant 13 : index
    %c0_78 = arith.constant 0 : index
    %c0_79 = arith.constant 0 : index
    %79 = vector.load %arg1[%c13, %c0_78, %c0_79] : memref<16x32x16xbf16, #tpu.memory_space<vmem>>, vector<1x32x16xbf16>
    %80 = vector.shape_cast %79 : vector<1x32x16xbf16> to vector<32x16xbf16>
    %c3_80 = arith.constant 3 : index
    %c0_81 = arith.constant 0 : index
    %c5_82 = arith.constant 5 : index
    %81 = vector.load %arg2[%c3_80, %c0_81, %c5_82] : memref<4x16x50xbf16, #tpu.memory_space<vmem>>, vector<1x16x44xbf16>
    %82 = vector.shape_cast %81 : vector<1x16x44xbf16> to vector<16x44xbf16>
    %cst_83 = arith.constant dense<0.000000e+00> : vector<32x44xf32>
    %83 = tpu.matmul %80, %82, %cst_83 {dimension_numbers = #tpu.dot_dimension_numbers<[1], [0], [0], [1], [0, 0, 1, 1], [], []>} : vector<32x16xbf16>, vector<16x44xbf16>, vector<32x44xf32> -> vector<32x44xf32>
    %84 = arith.addf %78, %83 : vector<32x44xf32>
    %c14 = arith.constant 14 : index
    %c0_84 = arith.constant 0 : index
    %c0_85 = arith.constant 0 : index
    %85 = vector.load %arg1[%c14, %c0_84, %c0_85] : memref<16x32x16xbf16, #tpu.memory_space<vmem>>, vector<1x32x16xbf16>
    %86 = vector.shape_cast %85 : vector<1x32x16xbf16> to vector<32x16xbf16>
    %c2_86 = arith.constant 2 : index
    %c0_87 = arith.constant 0 : index
    %c6_88 = arith.constant 6 : index
    %87 = vector.load %arg2[%c2_86, %c0_87, %c6_88] : memref<4x16x50xbf16, #tpu.memory_space<vmem>>, vector<1x16x44xbf16>
    %88 = vector.shape_cast %87 : vector<1x16x44xbf16> to vector<16x44xbf16>
    %cst_89 = arith.constant dense<0.000000e+00> : vector<32x44xf32>
    %89 = tpu.matmul %86, %88, %cst_89 {dimension_numbers = #tpu.dot_dimension_numbers<[1], [0], [0], [1], [0, 0, 1, 1], [], []>} : vector<32x16xbf16>, vector<16x44xbf16>, vector<32x44xf32> -> vector<32x44xf32>
    %90 = arith.addf %84, %89 : vector<32x44xf32>
    %c15 = arith.constant 15 : index
    %c0_90 = arith.constant 0 : index
    %c0_91 = arith.constant 0 : index
    %91 = vector.load %arg1[%c15, %c0_90, %c0_91] : memref<16x32x16xbf16, #tpu.memory_space<vmem>>, vector<1x32x16xbf16>
    %92 = vector.shape_cast %91 : vector<1x32x16xbf16> to vector<32x16xbf16>
    %c3_92 = arith.constant 3 : index
    %c0_93 = arith.constant 0 : index
    %c6_94 = arith.constant 6 : index
    %93 = vector.load %arg2[%c3_92, %c0_93, %c6_94] : memref<4x16x50xbf16, #tpu.memory_space<vmem>>, vector<1x16x44xbf16>
    %94 = vector.shape_cast %93 : vector<1x16x44xbf16> to vector<16x44xbf16>
    %cst_95 = arith.constant dense<0.000000e+00> : vector<32x44xf32>
    %95 = tpu.matmul %92, %94, %cst_95 {dimension_numbers = #tpu.dot_dimension_numbers<[1], [0], [0], [1], [0, 0, 1, 1], [], []>} : vector<32x16xbf16>, vector<16x44xbf16>, vector<32x44xf32> -> vector<32x44xf32>
    %96 = arith.addf %90, %95 : vector<32x44xf32>
    %c0_96 = arith.constant 0 : index
    %c0_97 = arith.constant 0 : index
    %97 = vector.load %arg5[%c0_96, %c0_97] : memref<1x44xf32, #tpu.memory_space<vmem>>, vector<1x44xf32>
    %98 = vector.broadcast %97 : vector<1x44xf32> to vector<32x44xf32>
    %99 = arith.mulf %96, %98 : vector<32x44xf32>
    %cst_98 = arith.constant dense<0.000000e+00> : vector<32xf32>
    %100 = vector.multi_reduction <add>, %99, %cst_98 [1] : vector<32x44xf32> to vector<32xf32>
    %101 = vector.shape_cast %100 : vector<32xf32> to vector<32x1xf32>
    %cst_99 = arith.constant 3.125000e-02 : f32
    %102 = vector.broadcast %cst_99 : f32 to vector<32x1xf32>
    %103 = arith.mulf %101, %102 : vector<32x1xf32>
    %104 = vector.broadcast %103 : vector<32x1xf32> to vector<32x44xf32>
    %105 = arith.subf %96, %104 : vector<32x44xf32>
    %106 = arith.mulf %105, %105 : vector<32x44xf32>
    %107 = vector.broadcast %97 : vector<1x44xf32> to vector<32x44xf32>
    %108 = arith.mulf %106, %107 : vector<32x44xf32>
    %cst_100 = arith.constant dense<0.000000e+00> : vector<32xf32>
    %109 = vector.multi_reduction <add>, %108, %cst_100 [1] : vector<32x44xf32> to vector<32xf32>
    %110 = vector.shape_cast %109 : vector<32xf32> to vector<32x1xf32>
    %cst_101 = arith.constant 3.125000e-02 : f32
    %111 = vector.broadcast %cst_101 : f32 to vector<32x1xf32>
    %112 = arith.mulf %110, %111 : vector<32x1xf32>
    %cst_102 = arith.constant 9.99999974E-6 : f32
    %113 = vector.broadcast %cst_102 : f32 to vector<32x1xf32>
    %114 = arith.addf %112, %113 : vector<32x1xf32>
    %115 = math.rsqrt %114 : vector<32x1xf32>
    %116 = vector.broadcast %115 : vector<32x1xf32> to vector<32x44xf32>
    %117 = arith.mulf %105, %116 : vector<32x44xf32>
    %c0_103 = arith.constant 0 : index
    %c0_104 = arith.constant 0 : index
    %118 = vector.load %arg3[%c0_103, %c0_104] : memref<32x1xf32, #tpu.memory_space<vmem>>, vector<32x1xf32>
    %119 = vector.broadcast %118 : vector<32x1xf32> to vector<32x44xf32>
    %120 = arith.mulf %117, %119 : vector<32x44xf32>
    %c0_105 = arith.constant 0 : index
    %c0_106 = arith.constant 0 : index
    %121 = vector.load %arg4[%c0_105, %c0_106] : memref<32x1xf32, #tpu.memory_space<vmem>>, vector<32x1xf32>
    %122 = vector.broadcast %121 : vector<32x1xf32> to vector<32x44xf32>
    %123 = arith.addf %120, %122 : vector<32x44xf32>
    %cst_107 = arith.constant 0.000000e+00 : f32
    %124 = vector.broadcast %cst_107 : f32 to vector<32x44xf32>
    %125 = arith.cmpf ogt, %123, %124 : vector<32x44xf32>
    %cst_108 = arith.constant 2.000000e-01 : f32
    %126 = vector.broadcast %cst_108 : f32 to vector<32x44xf32>
    %127 = arith.mulf %126, %123 : vector<32x44xf32>
    %128 = arith.select %125, %123, %127 : vector<32x44xi1>, vector<32x44xf32>
    %129 = arith.truncf %128 : vector<32x44xf32> to vector<32x44xbf16>
    %c0_109 = arith.constant 0 : index
    %c0_110 = arith.constant 0 : index
    %130 = vector.load %arg6[%c0_109, %c0_110] : memref<32x44xbf16, #tpu.memory_space<vmem>>, vector<32x44xbf16>
    tpu.vector_store %arg6[%c0_109, %c0_110], %129 {strides = array<i32>} : memref<32x44xbf16, #tpu.memory_space<vmem>>, vector<32x44xbf16>,
    return
  }
  func.func @transform_0(%arg0: i32) -> (i32, i32, i32) {
    %c0_i32 = arith.constant 0 : i32
    %c0_i32_0 = arith.constant 0 : i32
    %c0_i32_1 = arith.constant 0 : i32
    return %c0_i32, %arg0, %c0_i32_0 : i32, i32, i32
  }
  func.func @transform_1(%arg0: i32) -> (i32, i32, i32) {
    %c0_i32 = arith.constant 0 : i32
    %c0_i32_0 = arith.constant 0 : i32
    %c0_i32_1 = arith.constant 0 : i32
    %c0_i32_2 = arith.constant 0 : i32
    return %c0_i32, %c0_i32_0, %c0_i32_1 : i32, i32, i32
  }
  func.func @transform_2(%arg0: i32) -> (i32, i32) {
    %c0_i32 = arith.constant 0 : i32
    %c0_i32_0 = arith.constant 0 : i32
    return %arg0, %c0_i32 : i32, i32
  }
  func.func @transform_3(%arg0: i32) -> (i32, i32) {
    %c0_i32 = arith.constant 0 : i32
    %c0_i32_0 = arith.constant 0 : i32
    return %arg0, %c0_i32 : i32, i32
  }
  func.func @transform_4(%arg0: i32) -> (i32, i32) {
    %c0_i32 = arith.constant 0 : i32
    %c0_i32_0 = arith.constant 0 : i32
    %c0_i32_1 = arith.constant 0 : i32
    return %c0_i32, %c0_i32_0 : i32, i32
  }
  func.func @transform_5(%arg0: i32) -> (i32, i32) {
    %c0_i32 = arith.constant 0 : i32
    %c0_i32_0 = arith.constant 0 : i32
    return %arg0, %c0_i32 : i32, i32
  }
}

module attributes {stable_mosaic.version = 11 : i64} {
  func.func @_conv_kernel(%arg0: i32, %arg1: memref<16x32x32xbf16, #tpu.memory_space<vmem>>, %arg2: memref<1x32x72xbf16, #tpu.memory_space<vmem>>, %arg3: memref<32x1xf32, #tpu.memory_space<vmem>>, %arg4: memref<32x1xf32, #tpu.memory_space<vmem>>, %arg5: memref<1x51xf32, #tpu.memory_space<vmem>>, %arg6: memref<32x51xbf16, #tpu.memory_space<vmem>>) attributes {dimension_semantics = [#tpu.dimension_semantics<parallel>], iteration_bounds = array<i64: 2>, scalar_prefetch = 0 : i64, scratch_operands = 0 : i64, tpu.core_type = #tpu.core_type<tc>, window_params = [{transform_indices = @transform_0, window_bounds = array<i64: 16, 32, 32>}, {pipeline_mode = #tpu.pipeline_mode<synchronous>, transform_indices = @transform_1, window_bounds = array<i64: 1, 32, 72>}, {transform_indices = @transform_2, window_bounds = array<i64: 32, 1>}, {transform_indices = @transform_3, window_bounds = array<i64: 32, 1>}, {pipeline_mode = #tpu.pipeline_mode<synchronous>, transform_indices = @transform_4, window_bounds = array<i64: 1, 51>}, {transform_indices = @transform_5, window_bounds = array<i64: 32, 51>}]} {
    %cst = arith.constant 0.000000e+00 : f32
    %0 = vector.broadcast %cst : f32 to vector<32x51xf32>
    %c0 = arith.constant 0 : index
    %c0_0 = arith.constant 0 : index
    %c0_1 = arith.constant 0 : index
    %1 = vector.load %arg1[%c0, %c0_0, %c0_1] : memref<16x32x32xbf16, #tpu.memory_space<vmem>>, vector<1x32x32xbf16>
    %2 = vector.shape_cast %1 : vector<1x32x32xbf16> to vector<32x32xbf16>
    %c0_2 = arith.constant 0 : index
    %c0_3 = arith.constant 0 : index
    %c0_4 = arith.constant 0 : index
    %3 = vector.load %arg2[%c0_2, %c0_3, %c0_4] : memref<1x32x72xbf16, #tpu.memory_space<vmem>>, vector<1x32x51xbf16>
    %4 = vector.shape_cast %3 : vector<1x32x51xbf16> to vector<32x51xbf16>
    %cst_5 = arith.constant dense<0.000000e+00> : vector<32x51xf32>
    %5 = tpu.matmul %2, %4, %cst_5 {dimension_numbers = #tpu.dot_dimension_numbers<[1], [0], [0], [1], [0, 0, 1, 1], [], []>} : vector<32x32xbf16>, vector<32x51xbf16>, vector<32x51xf32> -> vector<32x51xf32>
    %6 = arith.addf %0, %5 : vector<32x51xf32>
    %c1 = arith.constant 1 : index
    %c0_6 = arith.constant 0 : index
    %c0_7 = arith.constant 0 : index
    %7 = vector.load %arg1[%c1, %c0_6, %c0_7] : memref<16x32x32xbf16, #tpu.memory_space<vmem>>, vector<1x32x32xbf16>
    %8 = vector.shape_cast %7 : vector<1x32x32xbf16> to vector<32x32xbf16>
    %c0_8 = arith.constant 0 : index
    %c0_9 = arith.constant 0 : index
    %c1_10 = arith.constant 1 : index
    %9 = vector.load %arg2[%c0_8, %c0_9, %c1_10] : memref<1x32x72xbf16, #tpu.memory_space<vmem>>, vector<1x32x51xbf16>
    %10 = vector.shape_cast %9 : vector<1x32x51xbf16> to vector<32x51xbf16>
    %cst_11 = arith.constant dense<0.000000e+00> : vector<32x51xf32>
    %11 = tpu.matmul %8, %10, %cst_11 {dimension_numbers = #tpu.dot_dimension_numbers<[1], [0], [0], [1], [0, 0, 1, 1], [], []>} : vector<32x32xbf16>, vector<32x51xbf16>, vector<32x51xf32> -> vector<32x51xf32>
    %12 = arith.addf %6, %11 : vector<32x51xf32>
    %c2 = arith.constant 2 : index
    %c0_12 = arith.constant 0 : index
    %c0_13 = arith.constant 0 : index
    %13 = vector.load %arg1[%c2, %c0_12, %c0_13] : memref<16x32x32xbf16, #tpu.memory_space<vmem>>, vector<1x32x32xbf16>
    %14 = vector.shape_cast %13 : vector<1x32x32xbf16> to vector<32x32xbf16>
    %c0_14 = arith.constant 0 : index
    %c0_15 = arith.constant 0 : index
    %c2_16 = arith.constant 2 : index
    %15 = vector.load %arg2[%c0_14, %c0_15, %c2_16] : memref<1x32x72xbf16, #tpu.memory_space<vmem>>, vector<1x32x51xbf16>
    %16 = vector.shape_cast %15 : vector<1x32x51xbf16> to vector<32x51xbf16>
    %cst_17 = arith.constant dense<0.000000e+00> : vector<32x51xf32>
    %17 = tpu.matmul %14, %16, %cst_17 {dimension_numbers = #tpu.dot_dimension_numbers<[1], [0], [0], [1], [0, 0, 1, 1], [], []>} : vector<32x32xbf16>, vector<32x51xbf16>, vector<32x51xf32> -> vector<32x51xf32>
    %18 = arith.addf %12, %17 : vector<32x51xf32>
    %c3 = arith.constant 3 : index
    %c0_18 = arith.constant 0 : index
    %c0_19 = arith.constant 0 : index
    %19 = vector.load %arg1[%c3, %c0_18, %c0_19] : memref<16x32x32xbf16, #tpu.memory_space<vmem>>, vector<1x32x32xbf16>
    %20 = vector.shape_cast %19 : vector<1x32x32xbf16> to vector<32x32xbf16>
    %c0_20 = arith.constant 0 : index
    %c0_21 = arith.constant 0 : index
    %c3_22 = arith.constant 3 : index
    %21 = vector.load %arg2[%c0_20, %c0_21, %c3_22] : memref<1x32x72xbf16, #tpu.memory_space<vmem>>, vector<1x32x51xbf16>
    %22 = vector.shape_cast %21 : vector<1x32x51xbf16> to vector<32x51xbf16>
    %cst_23 = arith.constant dense<0.000000e+00> : vector<32x51xf32>
    %23 = tpu.matmul %20, %22, %cst_23 {dimension_numbers = #tpu.dot_dimension_numbers<[1], [0], [0], [1], [0, 0, 1, 1], [], []>} : vector<32x32xbf16>, vector<32x51xbf16>, vector<32x51xf32> -> vector<32x51xf32>
    %24 = arith.addf %18, %23 : vector<32x51xf32>
    %c4 = arith.constant 4 : index
    %c0_24 = arith.constant 0 : index
    %c0_25 = arith.constant 0 : index
    %25 = vector.load %arg1[%c4, %c0_24, %c0_25] : memref<16x32x32xbf16, #tpu.memory_space<vmem>>, vector<1x32x32xbf16>
    %26 = vector.shape_cast %25 : vector<1x32x32xbf16> to vector<32x32xbf16>
    %c0_26 = arith.constant 0 : index
    %c0_27 = arith.constant 0 : index
    %c6 = arith.constant 6 : index
    %27 = vector.load %arg2[%c0_26, %c0_27, %c6] : memref<1x32x72xbf16, #tpu.memory_space<vmem>>, vector<1x32x51xbf16>
    %28 = vector.shape_cast %27 : vector<1x32x51xbf16> to vector<32x51xbf16>
    %cst_28 = arith.constant dense<0.000000e+00> : vector<32x51xf32>
    %29 = tpu.matmul %26, %28, %cst_28 {dimension_numbers = #tpu.dot_dimension_numbers<[1], [0], [0], [1], [0, 0, 1, 1], [], []>} : vector<32x32xbf16>, vector<32x51xbf16>, vector<32x51xf32> -> vector<32x51xf32>
    %30 = arith.addf %24, %29 : vector<32x51xf32>
    %c5 = arith.constant 5 : index
    %c0_29 = arith.constant 0 : index
    %c0_30 = arith.constant 0 : index
    %31 = vector.load %arg1[%c5, %c0_29, %c0_30] : memref<16x32x32xbf16, #tpu.memory_space<vmem>>, vector<1x32x32xbf16>
    %32 = vector.shape_cast %31 : vector<1x32x32xbf16> to vector<32x32xbf16>
    %c0_31 = arith.constant 0 : index
    %c0_32 = arith.constant 0 : index
    %c7 = arith.constant 7 : index
    %33 = vector.load %arg2[%c0_31, %c0_32, %c7] : memref<1x32x72xbf16, #tpu.memory_space<vmem>>, vector<1x32x51xbf16>
    %34 = vector.shape_cast %33 : vector<1x32x51xbf16> to vector<32x51xbf16>
    %cst_33 = arith.constant dense<0.000000e+00> : vector<32x51xf32>
    %35 = tpu.matmul %32, %34, %cst_33 {dimension_numbers = #tpu.dot_dimension_numbers<[1], [0], [0], [1], [0, 0, 1, 1], [], []>} : vector<32x32xbf16>, vector<32x51xbf16>, vector<32x51xf32> -> vector<32x51xf32>
    %36 = arith.addf %30, %35 : vector<32x51xf32>
    %c6_34 = arith.constant 6 : index
    %c0_35 = arith.constant 0 : index
    %c0_36 = arith.constant 0 : index
    %37 = vector.load %arg1[%c6_34, %c0_35, %c0_36] : memref<16x32x32xbf16, #tpu.memory_space<vmem>>, vector<1x32x32xbf16>
    %38 = vector.shape_cast %37 : vector<1x32x32xbf16> to vector<32x32xbf16>
    %c0_37 = arith.constant 0 : index
    %c0_38 = arith.constant 0 : index
    %c8 = arith.constant 8 : index
    %39 = vector.load %arg2[%c0_37, %c0_38, %c8] : memref<1x32x72xbf16, #tpu.memory_space<vmem>>, vector<1x32x51xbf16>
    %40 = vector.shape_cast %39 : vector<1x32x51xbf16> to vector<32x51xbf16>
    %cst_39 = arith.constant dense<0.000000e+00> : vector<32x51xf32>
    %41 = tpu.matmul %38, %40, %cst_39 {dimension_numbers = #tpu.dot_dimension_numbers<[1], [0], [0], [1], [0, 0, 1, 1], [], []>} : vector<32x32xbf16>, vector<32x51xbf16>, vector<32x51xf32> -> vector<32x51xf32>
    %42 = arith.addf %36, %41 : vector<32x51xf32>
    %c7_40 = arith.constant 7 : index
    %c0_41 = arith.constant 0 : index
    %c0_42 = arith.constant 0 : index
    %43 = vector.load %arg1[%c7_40, %c0_41, %c0_42] : memref<16x32x32xbf16, #tpu.memory_space<vmem>>, vector<1x32x32xbf16>
    %44 = vector.shape_cast %43 : vector<1x32x32xbf16> to vector<32x32xbf16>
    %c0_43 = arith.constant 0 : index
    %c0_44 = arith.constant 0 : index
    %c9 = arith.constant 9 : index
    %45 = vector.load %arg2[%c0_43, %c0_44, %c9] : memref<1x32x72xbf16, #tpu.memory_space<vmem>>, vector<1x32x51xbf16>
    %46 = vector.shape_cast %45 : vector<1x32x51xbf16> to vector<32x51xbf16>
    %cst_45 = arith.constant dense<0.000000e+00> : vector<32x51xf32>
    %47 = tpu.matmul %44, %46, %cst_45 {dimension_numbers = #tpu.dot_dimension_numbers<[1], [0], [0], [1], [0, 0, 1, 1], [], []>} : vector<32x32xbf16>, vector<32x51xbf16>, vector<32x51xf32> -> vector<32x51xf32>
    %48 = arith.addf %42, %47 : vector<32x51xf32>
    %c8_46 = arith.constant 8 : index
    %c0_47 = arith.constant 0 : index
    %c0_48 = arith.constant 0 : index
    %49 = vector.load %arg1[%c8_46, %c0_47, %c0_48] : memref<16x32x32xbf16, #tpu.memory_space<vmem>>, vector<1x32x32xbf16>
    %50 = vector.shape_cast %49 : vector<1x32x32xbf16> to vector<32x32xbf16>
    %c0_49 = arith.constant 0 : index
    %c0_50 = arith.constant 0 : index
    %c12 = arith.constant 12 : index
    %51 = vector.load %arg2[%c0_49, %c0_50, %c12] : memref<1x32x72xbf16, #tpu.memory_space<vmem>>, vector<1x32x51xbf16>
    %52 = vector.shape_cast %51 : vector<1x32x51xbf16> to vector<32x51xbf16>
    %cst_51 = arith.constant dense<0.000000e+00> : vector<32x51xf32>
    %53 = tpu.matmul %50, %52, %cst_51 {dimension_numbers = #tpu.dot_dimension_numbers<[1], [0], [0], [1], [0, 0, 1, 1], [], []>} : vector<32x32xbf16>, vector<32x51xbf16>, vector<32x51xf32> -> vector<32x51xf32>
    %54 = arith.addf %48, %53 : vector<32x51xf32>
    %c9_52 = arith.constant 9 : index
    %c0_53 = arith.constant 0 : index
    %c0_54 = arith.constant 0 : index
    %55 = vector.load %arg1[%c9_52, %c0_53, %c0_54] : memref<16x32x32xbf16, #tpu.memory_space<vmem>>, vector<1x32x32xbf16>
    %56 = vector.shape_cast %55 : vector<1x32x32xbf16> to vector<32x32xbf16>
    %c0_55 = arith.constant 0 : index
    %c0_56 = arith.constant 0 : index
    %c13 = arith.constant 13 : index
    %57 = vector.load %arg2[%c0_55, %c0_56, %c13] : memref<1x32x72xbf16, #tpu.memory_space<vmem>>, vector<1x32x51xbf16>
    %58 = vector.shape_cast %57 : vector<1x32x51xbf16> to vector<32x51xbf16>
    %cst_57 = arith.constant dense<0.000000e+00> : vector<32x51xf32>
    %59 = tpu.matmul %56, %58, %cst_57 {dimension_numbers = #tpu.dot_dimension_numbers<[1], [0], [0], [1], [0, 0, 1, 1], [], []>} : vector<32x32xbf16>, vector<32x51xbf16>, vector<32x51xf32> -> vector<32x51xf32>
    %60 = arith.addf %54, %59 : vector<32x51xf32>
    %c10 = arith.constant 10 : index
    %c0_58 = arith.constant 0 : index
    %c0_59 = arith.constant 0 : index
    %61 = vector.load %arg1[%c10, %c0_58, %c0_59] : memref<16x32x32xbf16, #tpu.memory_space<vmem>>, vector<1x32x32xbf16>
    %62 = vector.shape_cast %61 : vector<1x32x32xbf16> to vector<32x32xbf16>
    %c0_60 = arith.constant 0 : index
    %c0_61 = arith.constant 0 : index
    %c14 = arith.constant 14 : index
    %63 = vector.load %arg2[%c0_60, %c0_61, %c14] : memref<1x32x72xbf16, #tpu.memory_space<vmem>>, vector<1x32x51xbf16>
    %64 = vector.shape_cast %63 : vector<1x32x51xbf16> to vector<32x51xbf16>
    %cst_62 = arith.constant dense<0.000000e+00> : vector<32x51xf32>
    %65 = tpu.matmul %62, %64, %cst_62 {dimension_numbers = #tpu.dot_dimension_numbers<[1], [0], [0], [1], [0, 0, 1, 1], [], []>} : vector<32x32xbf16>, vector<32x51xbf16>, vector<32x51xf32> -> vector<32x51xf32>
    %66 = arith.addf %60, %65 : vector<32x51xf32>
    %c11 = arith.constant 11 : index
    %c0_63 = arith.constant 0 : index
    %c0_64 = arith.constant 0 : index
    %67 = vector.load %arg1[%c11, %c0_63, %c0_64] : memref<16x32x32xbf16, #tpu.memory_space<vmem>>, vector<1x32x32xbf16>
    %68 = vector.shape_cast %67 : vector<1x32x32xbf16> to vector<32x32xbf16>
    %c0_65 = arith.constant 0 : index
    %c0_66 = arith.constant 0 : index
    %c15 = arith.constant 15 : index
    %69 = vector.load %arg2[%c0_65, %c0_66, %c15] : memref<1x32x72xbf16, #tpu.memory_space<vmem>>, vector<1x32x51xbf16>
    %70 = vector.shape_cast %69 : vector<1x32x51xbf16> to vector<32x51xbf16>
    %cst_67 = arith.constant dense<0.000000e+00> : vector<32x51xf32>
    %71 = tpu.matmul %68, %70, %cst_67 {dimension_numbers = #tpu.dot_dimension_numbers<[1], [0], [0], [1], [0, 0, 1, 1], [], []>} : vector<32x32xbf16>, vector<32x51xbf16>, vector<32x51xf32> -> vector<32x51xf32>
    %72 = arith.addf %66, %71 : vector<32x51xf32>
    %c12_68 = arith.constant 12 : index
    %c0_69 = arith.constant 0 : index
    %c0_70 = arith.constant 0 : index
    %73 = vector.load %arg1[%c12_68, %c0_69, %c0_70] : memref<16x32x32xbf16, #tpu.memory_space<vmem>>, vector<1x32x32xbf16>
    %74 = vector.shape_cast %73 : vector<1x32x32xbf16> to vector<32x32xbf16>
    %c0_71 = arith.constant 0 : index
    %c0_72 = arith.constant 0 : index
    %c18 = arith.constant 18 : index
    %75 = vector.load %arg2[%c0_71, %c0_72, %c18] : memref<1x32x72xbf16, #tpu.memory_space<vmem>>, vector<1x32x51xbf16>
    %76 = vector.shape_cast %75 : vector<1x32x51xbf16> to vector<32x51xbf16>
    %cst_73 = arith.constant dense<0.000000e+00> : vector<32x51xf32>
    %77 = tpu.matmul %74, %76, %cst_73 {dimension_numbers = #tpu.dot_dimension_numbers<[1], [0], [0], [1], [0, 0, 1, 1], [], []>} : vector<32x32xbf16>, vector<32x51xbf16>, vector<32x51xf32> -> vector<32x51xf32>
    %78 = arith.addf %72, %77 : vector<32x51xf32>
    %c13_74 = arith.constant 13 : index
    %c0_75 = arith.constant 0 : index
    %c0_76 = arith.constant 0 : index
    %79 = vector.load %arg1[%c13_74, %c0_75, %c0_76] : memref<16x32x32xbf16, #tpu.memory_space<vmem>>, vector<1x32x32xbf16>
    %80 = vector.shape_cast %79 : vector<1x32x32xbf16> to vector<32x32xbf16>
    %c0_77 = arith.constant 0 : index
    %c0_78 = arith.constant 0 : index
    %c19 = arith.constant 19 : index
    %81 = vector.load %arg2[%c0_77, %c0_78, %c19] : memref<1x32x72xbf16, #tpu.memory_space<vmem>>, vector<1x32x51xbf16>
    %82 = vector.shape_cast %81 : vector<1x32x51xbf16> to vector<32x51xbf16>
    %cst_79 = arith.constant dense<0.000000e+00> : vector<32x51xf32>
    %83 = tpu.matmul %80, %82, %cst_79 {dimension_numbers = #tpu.dot_dimension_numbers<[1], [0], [0], [1], [0, 0, 1, 1], [], []>} : vector<32x32xbf16>, vector<32x51xbf16>, vector<32x51xf32> -> vector<32x51xf32>
    %84 = arith.addf %78, %83 : vector<32x51xf32>
    %c14_80 = arith.constant 14 : index
    %c0_81 = arith.constant 0 : index
    %c0_82 = arith.constant 0 : index
    %85 = vector.load %arg1[%c14_80, %c0_81, %c0_82] : memref<16x32x32xbf16, #tpu.memory_space<vmem>>, vector<1x32x32xbf16>
    %86 = vector.shape_cast %85 : vector<1x32x32xbf16> to vector<32x32xbf16>
    %c0_83 = arith.constant 0 : index
    %c0_84 = arith.constant 0 : index
    %c20 = arith.constant 20 : index
    %87 = vector.load %arg2[%c0_83, %c0_84, %c20] : memref<1x32x72xbf16, #tpu.memory_space<vmem>>, vector<1x32x51xbf16>
    %88 = vector.shape_cast %87 : vector<1x32x51xbf16> to vector<32x51xbf16>
    %cst_85 = arith.constant dense<0.000000e+00> : vector<32x51xf32>
    %89 = tpu.matmul %86, %88, %cst_85 {dimension_numbers = #tpu.dot_dimension_numbers<[1], [0], [0], [1], [0, 0, 1, 1], [], []>} : vector<32x32xbf16>, vector<32x51xbf16>, vector<32x51xf32> -> vector<32x51xf32>
    %90 = arith.addf %84, %89 : vector<32x51xf32>
    %c15_86 = arith.constant 15 : index
    %c0_87 = arith.constant 0 : index
    %c0_88 = arith.constant 0 : index
    %91 = vector.load %arg1[%c15_86, %c0_87, %c0_88] : memref<16x32x32xbf16, #tpu.memory_space<vmem>>, vector<1x32x32xbf16>
    %92 = vector.shape_cast %91 : vector<1x32x32xbf16> to vector<32x32xbf16>
    %c0_89 = arith.constant 0 : index
    %c0_90 = arith.constant 0 : index
    %c21 = arith.constant 21 : index
    %93 = vector.load %arg2[%c0_89, %c0_90, %c21] : memref<1x32x72xbf16, #tpu.memory_space<vmem>>, vector<1x32x51xbf16>
    %94 = vector.shape_cast %93 : vector<1x32x51xbf16> to vector<32x51xbf16>
    %cst_91 = arith.constant dense<0.000000e+00> : vector<32x51xf32>
    %95 = tpu.matmul %92, %94, %cst_91 {dimension_numbers = #tpu.dot_dimension_numbers<[1], [0], [0], [1], [0, 0, 1, 1], [], []>} : vector<32x32xbf16>, vector<32x51xbf16>, vector<32x51xf32> -> vector<32x51xf32>
    %96 = arith.addf %90, %95 : vector<32x51xf32>
    %c0_92 = arith.constant 0 : index
    %c0_93 = arith.constant 0 : index
    %97 = vector.load %arg5[%c0_92, %c0_93] : memref<1x51xf32, #tpu.memory_space<vmem>>, vector<1x51xf32>
    %98 = vector.broadcast %97 : vector<1x51xf32> to vector<32x51xf32>
    %99 = arith.mulf %96, %98 : vector<32x51xf32>
    %cst_94 = arith.constant dense<0.000000e+00> : vector<32xf32>
    %100 = vector.multi_reduction <add>, %99, %cst_94 [1] : vector<32x51xf32> to vector<32xf32>
    %101 = vector.shape_cast %100 : vector<32xf32> to vector<32x1xf32>
    %cst_95 = arith.constant 0.055555556 : f32
    %102 = vector.broadcast %cst_95 : f32 to vector<32x1xf32>
    %103 = arith.mulf %101, %102 : vector<32x1xf32>
    %104 = vector.broadcast %103 : vector<32x1xf32> to vector<32x51xf32>
    %105 = arith.subf %96, %104 : vector<32x51xf32>
    %106 = arith.mulf %105, %105 : vector<32x51xf32>
    %107 = vector.broadcast %97 : vector<1x51xf32> to vector<32x51xf32>
    %108 = arith.mulf %106, %107 : vector<32x51xf32>
    %cst_96 = arith.constant dense<0.000000e+00> : vector<32xf32>
    %109 = vector.multi_reduction <add>, %108, %cst_96 [1] : vector<32x51xf32> to vector<32xf32>
    %110 = vector.shape_cast %109 : vector<32xf32> to vector<32x1xf32>
    %cst_97 = arith.constant 0.055555556 : f32
    %111 = vector.broadcast %cst_97 : f32 to vector<32x1xf32>
    %112 = arith.mulf %110, %111 : vector<32x1xf32>
    %cst_98 = arith.constant 9.99999974E-6 : f32
    %113 = vector.broadcast %cst_98 : f32 to vector<32x1xf32>
    %114 = arith.addf %112, %113 : vector<32x1xf32>
    %115 = math.rsqrt %114 : vector<32x1xf32>
    %116 = vector.broadcast %115 : vector<32x1xf32> to vector<32x51xf32>
    %117 = arith.mulf %105, %116 : vector<32x51xf32>
    %c0_99 = arith.constant 0 : index
    %c0_100 = arith.constant 0 : index
    %118 = vector.load %arg3[%c0_99, %c0_100] : memref<32x1xf32, #tpu.memory_space<vmem>>, vector<32x1xf32>
    %119 = vector.broadcast %118 : vector<32x1xf32> to vector<32x51xf32>
    %120 = arith.mulf %117, %119 : vector<32x51xf32>
    %c0_101 = arith.constant 0 : index
    %c0_102 = arith.constant 0 : index
    %121 = vector.load %arg4[%c0_101, %c0_102] : memref<32x1xf32, #tpu.memory_space<vmem>>, vector<32x1xf32>
    %122 = vector.broadcast %121 : vector<32x1xf32> to vector<32x51xf32>
    %123 = arith.addf %120, %122 : vector<32x51xf32>
    %cst_103 = arith.constant 0.000000e+00 : f32
    %124 = vector.broadcast %cst_103 : f32 to vector<32x51xf32>
    %125 = arith.cmpf ogt, %123, %124 : vector<32x51xf32>
    %cst_104 = arith.constant 2.000000e-01 : f32
    %126 = vector.broadcast %cst_104 : f32 to vector<32x51xf32>
    %127 = arith.mulf %126, %123 : vector<32x51xf32>
    %128 = arith.select %125, %123, %127 : vector<32x51xi1>, vector<32x51xf32>
    %129 = arith.truncf %128 : vector<32x51xf32> to vector<32x51xbf16>
    %c0_105 = arith.constant 0 : index
    %c0_106 = arith.constant 0 : index
    %130 = vector.load %arg6[%c0_105, %c0_106] : memref<32x51xbf16, #tpu.memory_space<vmem>>, vector<32x51xbf16>
    tpu.vector_store %arg6[%c0_105, %c0_106], %129 {strides = array<i32>} : memref<32x51xbf16, #tpu.memory_space<vmem>>, vector<32x51xbf16>,
    return
  }
  func.func @transform_0(%arg0: i32) -> (i32, i32, i32) {
    %c0_i32 = arith.constant 0 : i32
    %c0_i32_0 = arith.constant 0 : i32
    %c0_i32_1 = arith.constant 0 : i32
    return %c0_i32, %arg0, %c0_i32_0 : i32, i32, i32
  }
  func.func @transform_1(%arg0: i32) -> (i32, i32, i32) {
    %c0_i32 = arith.constant 0 : i32
    %c0_i32_0 = arith.constant 0 : i32
    %c0_i32_1 = arith.constant 0 : i32
    %c0_i32_2 = arith.constant 0 : i32
    return %c0_i32, %c0_i32_0, %c0_i32_1 : i32, i32, i32
  }
  func.func @transform_2(%arg0: i32) -> (i32, i32) {
    %c0_i32 = arith.constant 0 : i32
    %c0_i32_0 = arith.constant 0 : i32
    return %arg0, %c0_i32 : i32, i32
  }
  func.func @transform_3(%arg0: i32) -> (i32, i32) {
    %c0_i32 = arith.constant 0 : i32
    %c0_i32_0 = arith.constant 0 : i32
    return %arg0, %c0_i32 : i32, i32
  }
  func.func @transform_4(%arg0: i32) -> (i32, i32) {
    %c0_i32 = arith.constant 0 : i32
    %c0_i32_0 = arith.constant 0 : i32
    %c0_i32_1 = arith.constant 0 : i32
    return %c0_i32, %c0_i32_0 : i32, i32
  }
  func.func @transform_5(%arg0: i32) -> (i32, i32) {
    %c0_i32 = arith.constant 0 : i32
    %c0_i32_0 = arith.constant 0 : i32
    return %arg0, %c0_i32 : i32, i32
  }
}

module attributes {stable_mosaic.version = 11 : i64} {
  func.func @_conv_kernel(%arg0: i32, %arg1: memref<16x1x64xbf16, #tpu.memory_space<vmem>>, %arg2: memref<1x64x50xbf16, #tpu.memory_space<vmem>>, %arg3: memref<1x1xf32, #tpu.memory_space<vmem>>, %arg4: memref<1x32xf32, #tpu.memory_space<vmem>>) attributes {dimension_semantics = [#tpu.dimension_semantics<parallel>], iteration_bounds = array<i64: 1>, scalar_prefetch = 0 : i64, scratch_operands = 0 : i64, tpu.core_type = #tpu.core_type<tc>, window_params = [{transform_indices = @transform_0, window_bounds = array<i64: 16, 1, 64>}, {pipeline_mode = #tpu.pipeline_mode<synchronous>, transform_indices = @transform_1, window_bounds = array<i64: 1, 64, 50>}, {transform_indices = @transform_2, window_bounds = array<i64: 1, 1>}, {transform_indices = @transform_3, window_bounds = array<i64: 1, 32>}]} {
    %cst = arith.constant 0.000000e+00 : f32
    %0 = vector.broadcast %cst : f32 to vector<1x32xf32>
    %c0 = arith.constant 0 : index
    %c0_0 = arith.constant 0 : index
    %c0_1 = arith.constant 0 : index
    %1 = vector.load %arg1[%c0, %c0_0, %c0_1] : memref<16x1x64xbf16, #tpu.memory_space<vmem>>, vector<1x1x64xbf16>
    %2 = vector.shape_cast %1 : vector<1x1x64xbf16> to vector<1x64xbf16>
    %c0_2 = arith.constant 0 : index
    %c0_3 = arith.constant 0 : index
    %c0_4 = arith.constant 0 : index
    %3 = vector.load %arg2[%c0_2, %c0_3, %c0_4] : memref<1x64x50xbf16, #tpu.memory_space<vmem>>, vector<1x64x32xbf16>
    %4 = vector.shape_cast %3 : vector<1x64x32xbf16> to vector<64x32xbf16>
    %cst_5 = arith.constant dense<0.000000e+00> : vector<1x32xf32>
    %5 = tpu.matmul %2, %4, %cst_5 {dimension_numbers = #tpu.dot_dimension_numbers<[1], [0], [0], [1], [0, 0, 1, 1], [], []>} : vector<1x64xbf16>, vector<64x32xbf16>, vector<1x32xf32> -> vector<1x32xf32>
    %6 = arith.addf %0, %5 : vector<1x32xf32>
    %c1 = arith.constant 1 : index
    %c0_6 = arith.constant 0 : index
    %c0_7 = arith.constant 0 : index
    %7 = vector.load %arg1[%c1, %c0_6, %c0_7] : memref<16x1x64xbf16, #tpu.memory_space<vmem>>, vector<1x1x64xbf16>
    %8 = vector.shape_cast %7 : vector<1x1x64xbf16> to vector<1x64xbf16>
    %c0_8 = arith.constant 0 : index
    %c0_9 = arith.constant 0 : index
    %c1_10 = arith.constant 1 : index
    %9 = vector.load %arg2[%c0_8, %c0_9, %c1_10] : memref<1x64x50xbf16, #tpu.memory_space<vmem>>, vector<1x64x32xbf16>
    %10 = vector.shape_cast %9 : vector<1x64x32xbf16> to vector<64x32xbf16>
    %cst_11 = arith.constant dense<0.000000e+00> : vector<1x32xf32>
    %11 = tpu.matmul %8, %10, %cst_11 {dimension_numbers = #tpu.dot_dimension_numbers<[1], [0], [0], [1], [0, 0, 1, 1], [], []>} : vector<1x64xbf16>, vector<64x32xbf16>, vector<1x32xf32> -> vector<1x32xf32>
    %12 = arith.addf %6, %11 : vector<1x32xf32>
    %c2 = arith.constant 2 : index
    %c0_12 = arith.constant 0 : index
    %c0_13 = arith.constant 0 : index
    %13 = vector.load %arg1[%c2, %c0_12, %c0_13] : memref<16x1x64xbf16, #tpu.memory_space<vmem>>, vector<1x1x64xbf16>
    %14 = vector.shape_cast %13 : vector<1x1x64xbf16> to vector<1x64xbf16>
    %c0_14 = arith.constant 0 : index
    %c0_15 = arith.constant 0 : index
    %c2_16 = arith.constant 2 : index
    %15 = vector.load %arg2[%c0_14, %c0_15, %c2_16] : memref<1x64x50xbf16, #tpu.memory_space<vmem>>, vector<1x64x32xbf16>
    %16 = vector.shape_cast %15 : vector<1x64x32xbf16> to vector<64x32xbf16>
    %cst_17 = arith.constant dense<0.000000e+00> : vector<1x32xf32>
    %17 = tpu.matmul %14, %16, %cst_17 {dimension_numbers = #tpu.dot_dimension_numbers<[1], [0], [0], [1], [0, 0, 1, 1], [], []>} : vector<1x64xbf16>, vector<64x32xbf16>, vector<1x32xf32> -> vector<1x32xf32>
    %18 = arith.addf %12, %17 : vector<1x32xf32>
    %c3 = arith.constant 3 : index
    %c0_18 = arith.constant 0 : index
    %c0_19 = arith.constant 0 : index
    %19 = vector.load %arg1[%c3, %c0_18, %c0_19] : memref<16x1x64xbf16, #tpu.memory_space<vmem>>, vector<1x1x64xbf16>
    %20 = vector.shape_cast %19 : vector<1x1x64xbf16> to vector<1x64xbf16>
    %c0_20 = arith.constant 0 : index
    %c0_21 = arith.constant 0 : index
    %c3_22 = arith.constant 3 : index
    %21 = vector.load %arg2[%c0_20, %c0_21, %c3_22] : memref<1x64x50xbf16, #tpu.memory_space<vmem>>, vector<1x64x32xbf16>
    %22 = vector.shape_cast %21 : vector<1x64x32xbf16> to vector<64x32xbf16>
    %cst_23 = arith.constant dense<0.000000e+00> : vector<1x32xf32>
    %23 = tpu.matmul %20, %22, %cst_23 {dimension_numbers = #tpu.dot_dimension_numbers<[1], [0], [0], [1], [0, 0, 1, 1], [], []>} : vector<1x64xbf16>, vector<64x32xbf16>, vector<1x32xf32> -> vector<1x32xf32>
    %24 = arith.addf %18, %23 : vector<1x32xf32>
    %c4 = arith.constant 4 : index
    %c0_24 = arith.constant 0 : index
    %c0_25 = arith.constant 0 : index
    %25 = vector.load %arg1[%c4, %c0_24, %c0_25] : memref<16x1x64xbf16, #tpu.memory_space<vmem>>, vector<1x1x64xbf16>
    %26 = vector.shape_cast %25 : vector<1x1x64xbf16> to vector<1x64xbf16>
    %c0_26 = arith.constant 0 : index
    %c0_27 = arith.constant 0 : index
    %c5 = arith.constant 5 : index
    %27 = vector.load %arg2[%c0_26, %c0_27, %c5] : memref<1x64x50xbf16, #tpu.memory_space<vmem>>, vector<1x64x32xbf16>
    %28 = vector.shape_cast %27 : vector<1x64x32xbf16> to vector<64x32xbf16>
    %cst_28 = arith.constant dense<0.000000e+00> : vector<1x32xf32>
    %29 = tpu.matmul %26, %28, %cst_28 {dimension_numbers = #tpu.dot_dimension_numbers<[1], [0], [0], [1], [0, 0, 1, 1], [], []>} : vector<1x64xbf16>, vector<64x32xbf16>, vector<1x32xf32> -> vector<1x32xf32>
    %30 = arith.addf %24, %29 : vector<1x32xf32>
    %c5_29 = arith.constant 5 : index
    %c0_30 = arith.constant 0 : index
    %c0_31 = arith.constant 0 : index
    %31 = vector.load %arg1[%c5_29, %c0_30, %c0_31] : memref<16x1x64xbf16, #tpu.memory_space<vmem>>, vector<1x1x64xbf16>
    %32 = vector.shape_cast %31 : vector<1x1x64xbf16> to vector<1x64xbf16>
    %c0_32 = arith.constant 0 : index
    %c0_33 = arith.constant 0 : index
    %c6 = arith.constant 6 : index
    %33 = vector.load %arg2[%c0_32, %c0_33, %c6] : memref<1x64x50xbf16, #tpu.memory_space<vmem>>, vector<1x64x32xbf16>
    %34 = vector.shape_cast %33 : vector<1x64x32xbf16> to vector<64x32xbf16>
    %cst_34 = arith.constant dense<0.000000e+00> : vector<1x32xf32>
    %35 = tpu.matmul %32, %34, %cst_34 {dimension_numbers = #tpu.dot_dimension_numbers<[1], [0], [0], [1], [0, 0, 1, 1], [], []>} : vector<1x64xbf16>, vector<64x32xbf16>, vector<1x32xf32> -> vector<1x32xf32>
    %36 = arith.addf %30, %35 : vector<1x32xf32>
    %c6_35 = arith.constant 6 : index
    %c0_36 = arith.constant 0 : index
    %c0_37 = arith.constant 0 : index
    %37 = vector.load %arg1[%c6_35, %c0_36, %c0_37] : memref<16x1x64xbf16, #tpu.memory_space<vmem>>, vector<1x1x64xbf16>
    %38 = vector.shape_cast %37 : vector<1x1x64xbf16> to vector<1x64xbf16>
    %c0_38 = arith.constant 0 : index
    %c0_39 = arith.constant 0 : index
    %c7 = arith.constant 7 : index
    %39 = vector.load %arg2[%c0_38, %c0_39, %c7] : memref<1x64x50xbf16, #tpu.memory_space<vmem>>, vector<1x64x32xbf16>
    %40 = vector.shape_cast %39 : vector<1x64x32xbf16> to vector<64x32xbf16>
    %cst_40 = arith.constant dense<0.000000e+00> : vector<1x32xf32>
    %41 = tpu.matmul %38, %40, %cst_40 {dimension_numbers = #tpu.dot_dimension_numbers<[1], [0], [0], [1], [0, 0, 1, 1], [], []>} : vector<1x64xbf16>, vector<64x32xbf16>, vector<1x32xf32> -> vector<1x32xf32>
    %42 = arith.addf %36, %41 : vector<1x32xf32>
    %c7_41 = arith.constant 7 : index
    %c0_42 = arith.constant 0 : index
    %c0_43 = arith.constant 0 : index
    %43 = vector.load %arg1[%c7_41, %c0_42, %c0_43] : memref<16x1x64xbf16, #tpu.memory_space<vmem>>, vector<1x1x64xbf16>
    %44 = vector.shape_cast %43 : vector<1x1x64xbf16> to vector<1x64xbf16>
    %c0_44 = arith.constant 0 : index
    %c0_45 = arith.constant 0 : index
    %c8 = arith.constant 8 : index
    %45 = vector.load %arg2[%c0_44, %c0_45, %c8] : memref<1x64x50xbf16, #tpu.memory_space<vmem>>, vector<1x64x32xbf16>
    %46 = vector.shape_cast %45 : vector<1x64x32xbf16> to vector<64x32xbf16>
    %cst_46 = arith.constant dense<0.000000e+00> : vector<1x32xf32>
    %47 = tpu.matmul %44, %46, %cst_46 {dimension_numbers = #tpu.dot_dimension_numbers<[1], [0], [0], [1], [0, 0, 1, 1], [], []>} : vector<1x64xbf16>, vector<64x32xbf16>, vector<1x32xf32> -> vector<1x32xf32>
    %48 = arith.addf %42, %47 : vector<1x32xf32>
    %c8_47 = arith.constant 8 : index
    %c0_48 = arith.constant 0 : index
    %c0_49 = arith.constant 0 : index
    %49 = vector.load %arg1[%c8_47, %c0_48, %c0_49] : memref<16x1x64xbf16, #tpu.memory_space<vmem>>, vector<1x1x64xbf16>
    %50 = vector.shape_cast %49 : vector<1x1x64xbf16> to vector<1x64xbf16>
    %c0_50 = arith.constant 0 : index
    %c0_51 = arith.constant 0 : index
    %c10 = arith.constant 10 : index
    %51 = vector.load %arg2[%c0_50, %c0_51, %c10] : memref<1x64x50xbf16, #tpu.memory_space<vmem>>, vector<1x64x32xbf16>
    %52 = vector.shape_cast %51 : vector<1x64x32xbf16> to vector<64x32xbf16>
    %cst_52 = arith.constant dense<0.000000e+00> : vector<1x32xf32>
    %53 = tpu.matmul %50, %52, %cst_52 {dimension_numbers = #tpu.dot_dimension_numbers<[1], [0], [0], [1], [0, 0, 1, 1], [], []>} : vector<1x64xbf16>, vector<64x32xbf16>, vector<1x32xf32> -> vector<1x32xf32>
    %54 = arith.addf %48, %53 : vector<1x32xf32>
    %c9 = arith.constant 9 : index
    %c0_53 = arith.constant 0 : index
    %c0_54 = arith.constant 0 : index
    %55 = vector.load %arg1[%c9, %c0_53, %c0_54] : memref<16x1x64xbf16, #tpu.memory_space<vmem>>, vector<1x1x64xbf16>
    %56 = vector.shape_cast %55 : vector<1x1x64xbf16> to vector<1x64xbf16>
    %c0_55 = arith.constant 0 : index
    %c0_56 = arith.constant 0 : index
    %c11 = arith.constant 11 : index
    %57 = vector.load %arg2[%c0_55, %c0_56, %c11] : memref<1x64x50xbf16, #tpu.memory_space<vmem>>, vector<1x64x32xbf16>
    %58 = vector.shape_cast %57 : vector<1x64x32xbf16> to vector<64x32xbf16>
    %cst_57 = arith.constant dense<0.000000e+00> : vector<1x32xf32>
    %59 = tpu.matmul %56, %58, %cst_57 {dimension_numbers = #tpu.dot_dimension_numbers<[1], [0], [0], [1], [0, 0, 1, 1], [], []>} : vector<1x64xbf16>, vector<64x32xbf16>, vector<1x32xf32> -> vector<1x32xf32>
    %60 = arith.addf %54, %59 : vector<1x32xf32>
    %c10_58 = arith.constant 10 : index
    %c0_59 = arith.constant 0 : index
    %c0_60 = arith.constant 0 : index
    %61 = vector.load %arg1[%c10_58, %c0_59, %c0_60] : memref<16x1x64xbf16, #tpu.memory_space<vmem>>, vector<1x1x64xbf16>
    %62 = vector.shape_cast %61 : vector<1x1x64xbf16> to vector<1x64xbf16>
    %c0_61 = arith.constant 0 : index
    %c0_62 = arith.constant 0 : index
    %c12 = arith.constant 12 : index
    %63 = vector.load %arg2[%c0_61, %c0_62, %c12] : memref<1x64x50xbf16, #tpu.memory_space<vmem>>, vector<1x64x32xbf16>
    %64 = vector.shape_cast %63 : vector<1x64x32xbf16> to vector<64x32xbf16>
    %cst_63 = arith.constant dense<0.000000e+00> : vector<1x32xf32>
    %65 = tpu.matmul %62, %64, %cst_63 {dimension_numbers = #tpu.dot_dimension_numbers<[1], [0], [0], [1], [0, 0, 1, 1], [], []>} : vector<1x64xbf16>, vector<64x32xbf16>, vector<1x32xf32> -> vector<1x32xf32>
    %66 = arith.addf %60, %65 : vector<1x32xf32>
    %c11_64 = arith.constant 11 : index
    %c0_65 = arith.constant 0 : index
    %c0_66 = arith.constant 0 : index
    %67 = vector.load %arg1[%c11_64, %c0_65, %c0_66] : memref<16x1x64xbf16, #tpu.memory_space<vmem>>, vector<1x1x64xbf16>
    %68 = vector.shape_cast %67 : vector<1x1x64xbf16> to vector<1x64xbf16>
    %c0_67 = arith.constant 0 : index
    %c0_68 = arith.constant 0 : index
    %c13 = arith.constant 13 : index
    %69 = vector.load %arg2[%c0_67, %c0_68, %c13] : memref<1x64x50xbf16, #tpu.memory_space<vmem>>, vector<1x64x32xbf16>
    %70 = vector.shape_cast %69 : vector<1x64x32xbf16> to vector<64x32xbf16>
    %cst_69 = arith.constant dense<0.000000e+00> : vector<1x32xf32>
    %71 = tpu.matmul %68, %70, %cst_69 {dimension_numbers = #tpu.dot_dimension_numbers<[1], [0], [0], [1], [0, 0, 1, 1], [], []>} : vector<1x64xbf16>, vector<64x32xbf16>, vector<1x32xf32> -> vector<1x32xf32>
    %72 = arith.addf %66, %71 : vector<1x32xf32>
    %c12_70 = arith.constant 12 : index
    %c0_71 = arith.constant 0 : index
    %c0_72 = arith.constant 0 : index
    %73 = vector.load %arg1[%c12_70, %c0_71, %c0_72] : memref<16x1x64xbf16, #tpu.memory_space<vmem>>, vector<1x1x64xbf16>
    %74 = vector.shape_cast %73 : vector<1x1x64xbf16> to vector<1x64xbf16>
    %c0_73 = arith.constant 0 : index
    %c0_74 = arith.constant 0 : index
    %c15 = arith.constant 15 : index
    %75 = vector.load %arg2[%c0_73, %c0_74, %c15] : memref<1x64x50xbf16, #tpu.memory_space<vmem>>, vector<1x64x32xbf16>
    %76 = vector.shape_cast %75 : vector<1x64x32xbf16> to vector<64x32xbf16>
    %cst_75 = arith.constant dense<0.000000e+00> : vector<1x32xf32>
    %77 = tpu.matmul %74, %76, %cst_75 {dimension_numbers = #tpu.dot_dimension_numbers<[1], [0], [0], [1], [0, 0, 1, 1], [], []>} : vector<1x64xbf16>, vector<64x32xbf16>, vector<1x32xf32> -> vector<1x32xf32>
    %78 = arith.addf %72, %77 : vector<1x32xf32>
    %c13_76 = arith.constant 13 : index
    %c0_77 = arith.constant 0 : index
    %c0_78 = arith.constant 0 : index
    %79 = vector.load %arg1[%c13_76, %c0_77, %c0_78] : memref<16x1x64xbf16, #tpu.memory_space<vmem>>, vector<1x1x64xbf16>
    %80 = vector.shape_cast %79 : vector<1x1x64xbf16> to vector<1x64xbf16>
    %c0_79 = arith.constant 0 : index
    %c0_80 = arith.constant 0 : index
    %c16 = arith.constant 16 : index
    %81 = vector.load %arg2[%c0_79, %c0_80, %c16] : memref<1x64x50xbf16, #tpu.memory_space<vmem>>, vector<1x64x32xbf16>
    %82 = vector.shape_cast %81 : vector<1x64x32xbf16> to vector<64x32xbf16>
    %cst_81 = arith.constant dense<0.000000e+00> : vector<1x32xf32>
    %83 = tpu.matmul %80, %82, %cst_81 {dimension_numbers = #tpu.dot_dimension_numbers<[1], [0], [0], [1], [0, 0, 1, 1], [], []>} : vector<1x64xbf16>, vector<64x32xbf16>, vector<1x32xf32> -> vector<1x32xf32>
    %84 = arith.addf %78, %83 : vector<1x32xf32>
    %c14 = arith.constant 14 : index
    %c0_82 = arith.constant 0 : index
    %c0_83 = arith.constant 0 : index
    %85 = vector.load %arg1[%c14, %c0_82, %c0_83] : memref<16x1x64xbf16, #tpu.memory_space<vmem>>, vector<1x1x64xbf16>
    %86 = vector.shape_cast %85 : vector<1x1x64xbf16> to vector<1x64xbf16>
    %c0_84 = arith.constant 0 : index
    %c0_85 = arith.constant 0 : index
    %c17 = arith.constant 17 : index
    %87 = vector.load %arg2[%c0_84, %c0_85, %c17] : memref<1x64x50xbf16, #tpu.memory_space<vmem>>, vector<1x64x32xbf16>
    %88 = vector.shape_cast %87 : vector<1x64x32xbf16> to vector<64x32xbf16>
    %cst_86 = arith.constant dense<0.000000e+00> : vector<1x32xf32>
    %89 = tpu.matmul %86, %88, %cst_86 {dimension_numbers = #tpu.dot_dimension_numbers<[1], [0], [0], [1], [0, 0, 1, 1], [], []>} : vector<1x64xbf16>, vector<64x32xbf16>, vector<1x32xf32> -> vector<1x32xf32>
    %90 = arith.addf %84, %89 : vector<1x32xf32>
    %c15_87 = arith.constant 15 : index
    %c0_88 = arith.constant 0 : index
    %c0_89 = arith.constant 0 : index
    %91 = vector.load %arg1[%c15_87, %c0_88, %c0_89] : memref<16x1x64xbf16, #tpu.memory_space<vmem>>, vector<1x1x64xbf16>
    %92 = vector.shape_cast %91 : vector<1x1x64xbf16> to vector<1x64xbf16>
    %c0_90 = arith.constant 0 : index
    %c0_91 = arith.constant 0 : index
    %c18 = arith.constant 18 : index
    %93 = vector.load %arg2[%c0_90, %c0_91, %c18] : memref<1x64x50xbf16, #tpu.memory_space<vmem>>, vector<1x64x32xbf16>
    %94 = vector.shape_cast %93 : vector<1x64x32xbf16> to vector<64x32xbf16>
    %cst_92 = arith.constant dense<0.000000e+00> : vector<1x32xf32>
    %95 = tpu.matmul %92, %94, %cst_92 {dimension_numbers = #tpu.dot_dimension_numbers<[1], [0], [0], [1], [0, 0, 1, 1], [], []>} : vector<1x64xbf16>, vector<64x32xbf16>, vector<1x32xf32> -> vector<1x32xf32>
    %96 = arith.addf %90, %95 : vector<1x32xf32>
    %c0_93 = arith.constant 0 : index
    %c0_94 = arith.constant 0 : index
    %97 = vector.load %arg3[%c0_93, %c0_94] : memref<1x1xf32, #tpu.memory_space<vmem>>, vector<1x1xf32>
    %98 = vector.broadcast %97 : vector<1x1xf32> to vector<1x32xf32>
    %99 = arith.addf %96, %98 : vector<1x32xf32>
    %c0_95 = arith.constant 0 : index
    %c0_96 = arith.constant 0 : index
    %100 = vector.load %arg4[%c0_95, %c0_96] : memref<1x32xf32, #tpu.memory_space<vmem>>, vector<1x32xf32>
    tpu.vector_store %arg4[%c0_95, %c0_96], %99 {strides = array<i32>} : memref<1x32xf32, #tpu.memory_space<vmem>>, vector<1x32xf32>,
    return
  }
  func.func @transform_0(%arg0: i32) -> (i32, i32, i32) {
    %c0_i32 = arith.constant 0 : i32
    %c0_i32_0 = arith.constant 0 : i32
    %c0_i32_1 = arith.constant 0 : i32
    return %c0_i32, %arg0, %c0_i32_0 : i32, i32, i32
  }
  func.func @transform_1(%arg0: i32) -> (i32, i32, i32) {
    %c0_i32 = arith.constant 0 : i32
    %c0_i32_0 = arith.constant 0 : i32
    %c0_i32_1 = arith.constant 0 : i32
    %c0_i32_2 = arith.constant 0 : i32
    return %c0_i32, %c0_i32_0, %c0_i32_1 : i32, i32, i32
  }
  func.func @transform_2(%arg0: i32) -> (i32, i32) {
    %c0_i32 = arith.constant 0 : i32
    %c0_i32_0 = arith.constant 0 : i32
    return %arg0, %c0_i32 : i32, i32
  }
  func.func @transform_3(%arg0: i32) -> (i32, i32) {
    %c0_i32 = arith.constant 0 : i32
    %c0_i32_0 = arith.constant 0 : i32
    return %arg0, %c0_i32 : i32, i32
  }
}

</mosaic_0001>

<bundles_post_ra>
// kernel: _lambda_.5
= control target key start
LH: loop header
LB: loop body
LE: loop exit
PB: predicated region body
PF: predicated region fallthrough
CT: control target
= control target key end

     0   :  { %v29_v0 = vlaneseq  ;;  %v3288_v1 = vmov 1983009808   ;;  %vm53_vm0 = vcmask 1040384   ;;  %vm54_vm1 = vcmask 1041408   ;;  %s3291_s16 = smov 127   ;;  %s3294_s6 = smov 111   ;;  %s4009_s1 = inlined_call_operand.vmem [shape: bf16[4,3,578], index: 1, kind: input, shape index: {}]   ;;  %s4010_s0 = inlined_call_operand.vmem [shape: bf16[16,8,3], index: 0, kind: input, shape index: {}]   ;;  %s4011_s2 = inlined_call_operand.vmem [shape: f32[8,1], index: 2, kind: input, shape index: {}]   ;;  %s4012_s3 = inlined_call_operand.vmem [shape: bf16[8,560], index: 3, kind: output, shape index: {}]  }
   0x1   :  { %v27_v2 = vunpack.c.l.s4 %v3288_v1  ;;  %v362_v3 = vld [vmem:[%s4009_s1] sm:$0xff]  ;;  %v3055_v7 = vld [vmem:[%s4009_s1 + $0xa] sm:$0xff]  ;;  %v3289_v10 = vmov 65535   ;;  %v3290_v12 = vmov 0   ;;  %vm49_vm2 = vcmask 23552   ;;  %v3076_v34 = vld [vmem:[%s4009_s1 + $0x14] sm:$0xff] }
   0x2   :  { %v30_v4 = vshrl.u32 %v29_v0, 7  ;;  %v366_v6 = vcombine.high %v362_v3, %v362_v3  ;;  %v556_v8 = vcombine.high %v3055_v7, %v3055_v7  ;;  %v55_v11 = vsel %vm53_vm0, 4294967295, %v3289_v10  ;;  %104 = vmatprep.mubr.bf16.mxu0 %v3290_v12  ;;  %145 = vmatprep.mubr.bf16.mxu1 %v3290_v12  ;;  %v3378_v27 = vld.sshfl [vmem:[%s4009_s1 + $0x8] sm:$0x3 pattern:$0x76325410] }
   0x3   :  { %v28_v5 = vunpack.c.0.s8 %v27_v2  ;;  %3283 = vset.pattern.permute.xlu0 %v3290_v12  ;;  %v3339_v17 = vsel %vm54_vm1, %v55_v11, 0  ;;  %v3383_v28 = vld.sshfl [vmem:[%s4009_s1 + $0x12] sm:$0x3 pattern:$0x76325410]  ;;  %v3292_v31 = vmov 0.0   ;;  %v1097_v36 = vcombine.high %v3076_v34, %v3076_v34 }
   0x4   :  { %v3038_v29 = vld [vmem:[%s4010_s0 + $0x4] sm:$0xf]  ;;  %v70_v30 = vand.u32 %v3383_v28, %v3339_v17  ;;  %vm3293_vm3 = vmmov 0   ;;  %v15_v38 = vld [vmem:[%s4010_s0] sm:$0xf]  ;;  %v236_v39 = vand.u32 %v3378_v27, %v3339_v17  ;;  %vm400_vm4 = vcmask 1039360  }
   0x5   :  { %v3322_v9 = vsub.s32 %v28_v5, %v30_v4  ;;  %v3083_v42 = vld [vmem:[%s4009_s1 + $0x1e] sm:$0xff]  ;;  %v3463_v47 = vld.sshfl [vmem:[%s4009_s1 + $0x1c] sm:$0x3 pattern:$0x76325410]  ;;  %vm1509_vm5 = vcmask 908288  }
   0x6   :  { %v1286_v46 = vcombine.high %v3083_v42, %v3083_v42  ;;  %v3487_v50 = vld.sshfl [vmem:[%s4009_s1 + $0x26] sm:$0x3 pattern:$0x76325410]  ;;  %s3295_s1 = smov 110   ;;  %vm1888_vm6 = vcmask 900096  }
   0x7   :  { %v3327_v13 = vrot.slane %v362_v3, %v3322_v9  ;;  %v3330_v14 = vrot.slane %v366_v6, %v3322_v9  ;;  %v3333_v15 = vrot.slane %v3055_v7, %v3322_v9  ;;  %v3337_v16 = vrot.slane %v556_v8, %v3322_v9  ;;  %v3049_v63 = vld [vmem:[%s4010_s0 + $0x8] sm:$0xf] }
   0x8   :  { %v3411_v35 = vrot.slane %v3076_v34, %v3322_v9  ;;  %v3431_v41 = vrot.slane %v1097_v36, %v3322_v9  ;;  %v3450_v44 = vrot.slane %v3083_v42, %v3322_v9  ;;  %v3474_v48 = vrot.slane %v1286_v46, %v3322_v9 }
   0x9   :  { %390 = vrot.lane.b32.xlu1 %v3327_v13, %s3291_s16  ;;  %v3345_v18 = vcombine.high %v3327_v13, %v3327_v13  ;;  %394 = vrot.lane.b32.xlu0 %v3330_v14, %s3291_s16  ;;  %v3351_v19 = vcombine.high %v3330_v14, %v3330_v14  ;;  %v3355_v20 = vcombine.high %v3333_v15, %v3333_v15  ;;  %vm3032_vm12 = vcmask 388096  }
   0xa   :  { %v3359_v21 = vcombine.high %v3337_v16, %v3337_v16  ;;  %v58_v23 = vand.u32 %v3333_v15, %v3339_v17  ;;  %v64_v24 = vand.u32 %v3337_v16, %v3339_v17  ;;  %v224_v32 = vand.u32 %v3327_v13, %v3339_v17 }
   0xb   :  { %v61_v22 = vand.u32 %v3355_v20, %v3339_v17  ;;  %v227_v26 = vand.u32 %v3345_v18, %v3339_v17  ;;  %v233_v33 = vand.u32 %v3351_v19, %v3339_v17  ;;  %v230_v37 = vand.u32 %v3330_v14, %v3339_v17 }
   0xc   :  { %v67_v25 = vand.u32 %v3359_v21, %v3339_v17  ;;  %v3428_v40 = vcombine.high %v3411_v35, %v3411_v35  ;;  %v3447_v43 = vcombine.high %v3431_v41, %v3431_v41  ;;  %v3458_v45 = vcombine.high %v3450_v44, %v3450_v44 }
   0xd   :  { %392 = vrot.lane.b32.xlu0 %v3345_v18, %s3291_s16  ;;  %396 = vrot.lane.b32.xlu1 %v3351_v19, %s3291_s16  ;;  %v3482_v49 = vcombine.high %v3474_v48, %v3474_v48  ;;  %v786_v34 = vand.u32 %v3463_v47, %v3339_v17  ;;  %v956_v42 = vand.u32 %v3474_v48, %v3339_v17 }
   0xe   :  { %72 = vmatprep.subr.bf16.mxu0 %v61_v22  ;;  %113 = vmatprep.subr.bf16.mxu1 %v67_v25  ;;  %v783_v22 = vand.u32 %v3447_v43, %v3339_v17  ;;  %v774_v25 = vand.u32 %v3411_v35, %v3339_v17 }
   0xf   :  { %73 = vmatpush1.bf16.msra.mxu0 %v58_v23  ;;  %114 = vmatpush1.bf16.msra.mxu1 %v64_v24 }
  0x10   :  { %3179 = vmatprep.subr.bf16.mxu0 %v3292_v31  ;;  %238 = vmatprep.subr.bf16.mxu1 %v227_v26 }
  0x11   :  { %398 = vrot.lane.b32.xlu0 %v3378_v27, %s3291_s16  ;;  %582 = vrot.lane.b32.xlu1 %v3355_v20, %s3291_s16 }
  0x12   :  { %3042 = vmatmul.mubr.msk.bf16.vlgmr.msra.gmra.mrb[0].mxu0 %vm49_vm2, %v3038_v29  ;;  %3043 = vmatmul.mubr.msk.bf16.vlgmr.msra.gmra.mrb[0].mxu1 %vm49_vm2, %v3038_v29 }
  0x13   :  { %3180 = vmatpush3.bf16.msra.mxu0 %v70_v30  ;;  %3181 = vmatprep.mubr.msk.bf16.mxu0 %vm3293_vm3, %v3292_v31 }
  0x14   :  { %239 = vmatpush1.bf16.msra.mxu1 %v224_v32  ;;  %279 = vmatprep.subr.bf16.mxu0 %v233_v33  ;;  %v3061_v33 = vld [vmem:[%s4010_s0 + $0x10] sm:$0xf] }
  0x15   :  { %584 = vrot.lane.b32.xlu0 %v3337_v16, %s3291_s16  ;;  %580 = vrot.lane.b32.xlu1 %v3333_v15, %s3291_s16 }
  0x16   :  { %270 = vmatprep.mubr.bf16.mxu1 %v3290_v12  ;;  %3185 = vmatprep.subr.bf16.mxu1 %v3292_v31 }
  0x19   :  { %586 = vrot.lane.b32.xlu0 %v3359_v21, %s3291_s16  ;;  %588 = vrot.lane.b32.xlu1 %v3383_v28, %s3291_s16 }
  0x1a   :  { %3182 = vmatmul.mubr.msk.bf16.vlgmr.msra.gmra.mrb[4].mxu0 %vm49_vm2, %v3038_v29  ;;  %3046 = vmatmul.mubr.msk.bf16.vlgmr.msra.gmra.mrb[4].mxu1 %vm49_vm2, %v15_v38  ;;  %v953_v29 = vand.u32 %v3458_v45, %v3339_v17 }
  0x1b   :  { %280 = vmatpush1.bf16.msra.mxu0 %v230_v37  ;;  %311 = vmatprep.mubr.bf16.mxu0 %v3290_v12 }
  0x1c   :  { %3186 = vmatpush3.bf16.msra.mxu1 %v236_v39  ;;  %3187 = vmatprep.mubr.msk.bf16.mxu1 %vm3293_vm3, %v3292_v31 }
  0x1d   :  { %1123 = vrot.lane.b32.xlu0 %v3428_v40, %s3291_s16  ;;  %1125 = vrot.lane.b32.xlu1 %v3431_v41, %s3291_s16 }
  0x21   :  { %1121 = vrot.lane.b32.xlu0 %v3411_v35, %s3291_s16  ;;  %1127 = vrot.lane.b32.xlu1 %v3447_v43, %s3291_s16 }
  0x22   :  { %3047 = vmatmul.mubr.msk.bf16.vlgmr.msra.gmra.mrb[8].mxu0 %vm49_vm2, %v15_v38  ;;  %3188 = vmatmul.mubr.msk.bf16.vlgmr.msra.gmra.mrb[8].mxu1 %vm49_vm2, %v15_v38  ;;  %v950_v38 = vand.u32 %v3450_v44, %v3339_v17 }
  0x23   :  { %455 = vmatprep.mubr.bf16.mxu0 %v3290_v12  ;;  %496 = vmatprep.mubr.bf16.mxu1 %v3290_v12 }
  0x25   :  { %1129 = vrot.lane.b32.xlu0 %v3463_v47, %s3291_s16  ;;  %1312 = vrot.lane.b32.xlu1 %v3458_v45, %s3291_s16 }
  0x29   :  { %1314 = vrot.lane.b32.xlu0 %v3474_v48, %s3291_s16  ;;  %1310 = vrot.lane.b32.xlu1 %v3450_v44, %s3291_s16 }
  0x2d   :  { %1316 = vrot.lane.b32.xlu0 %v3482_v49, %s3291_s16  ;;  %1318 = vrot.lane.b32.xlu1 %v3487_v50, %s3291_s16 }
  0x31   :  { %1501 = vrot.lane.b32.xlu0 %v3345_v18, %s3294_s6  ;;  %1503 = vrot.lane.b32.xlu1 %v3330_v14, %s3294_s6 }
  0x35   :  { %1499 = vrot.lane.b32.xlu0 %v3327_v13, %s3294_s6  ;;  %1505 = vrot.lane.b32.xlu1 %v3351_v19, %s3294_s6 }
  0x39   :  { %1507 = vrot.lane.b32.xlu0 %v3378_v27, %s3294_s6  ;;  %1691 = vrot.lane.b32.xlu1 %v3355_v20, %s3294_s6 }
  0x3d   :  { %1693 = vrot.lane.b32.xlu0 %v3337_v16, %s3294_s6  ;;  %1689 = vrot.lane.b32.xlu1 %v3333_v15, %s3294_s6 }
  0x41   :  { %1695 = vrot.lane.b32.xlu0 %v3359_v21, %s3294_s6  ;;  %1697 = vrot.lane.b32.xlu1 %v3383_v28, %s3294_s6 }
  0x45   :  { %1880 = vrot.lane.b32.xlu0 %v3345_v18, %s3295_s1  ;;  %1882 = vrot.lane.b32.xlu1 %v3330_v14, %s3295_s1 }
  0x49   :  { %1878 = vrot.lane.b32.xlu0 %v3327_v13, %s3295_s1  ;;  %1884 = vrot.lane.b32.xlu1 %v3351_v19, %s3295_s1 }
  0x4d   :  { %1886 = vrot.lane.b32.xlu0 %v3378_v27, %s3295_s1  ;;  %2070 = vrot.lane.b32.xlu1 %v3355_v20, %s3295_s1 }
  0x51   :  { %2072 = vrot.lane.b32.xlu0 %v3337_v16, %s3295_s1  ;;  %2068 = vrot.lane.b32.xlu1 %v3333_v15, %s3295_s1  ;;  %v777_v16 = vand.u32 %v3428_v40, %v3339_v17 }
  0x55   :  { %2074 = vrot.lane.b32.xlu0 %v3359_v21, %s3295_s1  ;;  %2076 = vrot.lane.b32.xlu1 %v3383_v28, %s3295_s1  ;;  %v3054_v21 = vld [vmem:[%s4010_s0 + $0xc] sm:$0xf]  ;;  %v780_v28 = vand.u32 %v3431_v41, %v3339_v17 }
  0x59   :  { %2259 = vrot.lane.b32.xlu0 %v3428_v40, %s3294_s6  ;;  %2261 = vrot.lane.b32.xlu1 %v3431_v41, %s3294_s6 }
  0x5d   :  { %2257 = vrot.lane.b32.xlu0 %v3411_v35, %s3294_s6  ;;  %2263 = vrot.lane.b32.xlu1 %v3447_v43, %s3294_s6 }
  0x61   :  { %2265 = vrot.lane.b32.xlu0 %v3463_v47, %s3294_s6  ;;  %2448 = vrot.lane.b32.xlu1 %v3458_v45, %s3294_s6 }
  0x65   :  { %2450 = vrot.lane.b32.xlu0 %v3474_v48, %s3294_s6  ;;  %2446 = vrot.lane.b32.xlu1 %v3450_v44, %s3294_s6 }
  0x69   :  { %2452 = vrot.lane.b32.xlu0 %v3482_v49, %s3294_s6  ;;  %2454 = vrot.lane.b32.xlu1 %v3487_v50, %s3294_s6 }
  0x6d   :  { %2637 = vrot.lane.b32.xlu0 %v3428_v40, %s3295_s1  ;;  %2639 = vrot.lane.b32.xlu1 %v3431_v41, %s3295_s1 }
  0x71   :  { %2635 = vrot.lane.b32.xlu0 %v3411_v35, %s3295_s1  ;;  %2641 = vrot.lane.b32.xlu1 %v3447_v43, %s3295_s1  ;;  %v959_v35 = vand.u32 %v3482_v49, %v3339_v17 }
  0x75   :  { %2643 = vrot.lane.b32.xlu0 %v3463_v47, %s3295_s1  ;;  %2826 = vrot.lane.b32.xlu1 %v3458_v45, %s3295_s1  ;;  %v3068_v47 = vld [vmem:[%s4010_s0 + $0x14] sm:$0xf] }
  0x79   :  { %2828 = vrot.lane.b32.xlu0 %v3474_v48, %s3295_s1  ;;  %2824 = vrot.lane.b32.xlu1 %v3450_v44, %s3295_s1  ;;  %v962_v48 = vand.u32 %v3487_v50, %v3339_v17 }
  0x7b   :  { %v391_v51 = vpop.permute.xlu1 %390  ;;  %v395_v52 = vpop.permute.xlu0 %394 }
  0x7d   :  { %2830 = vrot.lane.b32.xlu0 %v3482_v49, %s3295_s1  ;;  %2832 = vrot.lane.b32.xlu1 %v3487_v50, %s3295_s1 }
  0x7f   :  { %v393_v53 = vpop.permute.xlu0 %392  ;;  %v397_v54 = vpop.permute.xlu1 %396 }
  0x80   :  { %v401_v55 = vsel %vm400_vm4, %v391_v51, %v393_v53  ;;  %v402_v56 = vsel %vm400_vm4, %v393_v53, %v395_v52  ;;  %v403_v59 = vsel %vm400_vm4, %v395_v52, %v397_v54 }
  0x81   :  { %v409_v57 = vand.u32 %v401_v55, %v3339_v17  ;;  %v412_v58 = vand.u32 %v402_v56, %v3339_v17  ;;  %v415_v1 = vand.u32 %v403_v59, %v3339_v17 }
  0x83   :  { %v399_v60 = vpop.permute.xlu0 %398  ;;  %v583_v61 = vpop.permute.xlu1 %582  ;;  %423 = vmatprep.subr.bf16.mxu0 %v412_v58 }
  0x84   :  { %v404_v62 = vsel %vm400_vm4, %v397_v54, %v399_v60  ;;  %424 = vmatpush1.bf16.msra.mxu0 %v409_v57  ;;  %v421_v2 = vand.u32 %v399_v60, %v3339_v17 }
  0x85   :  { %v418_v0 = vand.u32 %v404_v62, %v3339_v17  ;;  %3191 = vmatprep.subr.bf16.mxu0 %v3292_v31 }
  0x87   :  { %v585_v3 = vpop.permute.xlu0 %584  ;;  %v581_v4 = vpop.permute.xlu1 %580  ;;  %3051 = vmatmul.mubr.msk.bf16.vlgmr.msra.gmra.mrb[12].mxu0 %vm49_vm2, %v3049_v63  ;;  %464 = vmatprep.subr.bf16.mxu1 %v418_v0 }
  0x88   :  { %v591_v5 = vsel %vm400_vm4, %v583_v61, %v585_v3  ;;  %v590_v6 = vsel %vm400_vm4, %v581_v4, %v583_v61  ;;  %465 = vmatpush1.bf16.msra.mxu1 %v415_v1  ;;  %3192 = vmatpush3.bf16.msra.mxu0 %v421_v2 }
  0x89   :  { %v601_v7 = vand.u32 %v591_v5, %v3339_v17  ;;  %v598_v8 = vand.u32 %v590_v6, %v3339_v17  ;;  %3193 = vmatprep.mubr.msk.bf16.mxu0 %vm3293_vm3, %v3292_v31 }
  0x8b   :  { %v587_v9 = vpop.permute.xlu0 %586  ;;  %v589_v10 = vpop.permute.xlu1 %588  ;;  %3052 = vmatmul.mubr.msk.bf16.vlgmr.msra.gmra.mrb[12].mxu1 %vm49_vm2, %v3049_v63  ;;  %612 = vmatprep.subr.bf16.mxu1 %v601_v7 }
  0x8c   :  { %v592_v11 = vsel %vm400_vm4, %v585_v3, %v587_v9  ;;  %v593_v13 = vsel %vm400_vm4, %v587_v9, %v589_v10  ;;  %613 = vmatpush1.bf16.msra.mxu1 %v598_v8  ;;  %644 = vmatprep.mubr.bf16.mxu1 %v3290_v12  ;;  %v610_v20 = vand.u32 %v589_v10, %v3339_v17 }
  0x8d   :  { %v604_v14 = vand.u32 %v592_v11, %v3339_v17  ;;  %v607_v15 = vand.u32 %v593_v13, %v3339_v17  ;;  %3197 = vmatprep.subr.bf16.mxu1 %v3292_v31 }
  0x8f   :  { %3194 = vmatmul.mubr.msk.bf16.vlgmr.msra.gmra.mrb[16].mxu0 %vm49_vm2, %v3049_v63  ;;  %653 = vmatprep.subr.bf16.mxu0 %v607_v15  ;;  %v1124_v18 = vpop.permute.xlu0 %1123  ;;  %v3603_v19 = vpop.permute.xlu1 %1125  ;;  %v3075_v63 = vld [vmem:[%s4010_s0 + $0x18] sm:$0xf]  ;;  %v3082_v15 = vld [vmem:[%s4010_s0 + $0x1c] sm:$0xf] }
  0x90   :  { %654 = vmatpush1.bf16.msra.mxu0 %v604_v14  ;;  %685 = vmatprep.mubr.bf16.mxu0 %v3290_v12  ;;  %v1132_v39 = vsel %vm400_vm4, %v1124_v18, %v3603_v19 }
  0x91   :  { %788 = vmatprep.subr.bf16.mxu0 %v777_v16  ;;  %v1142_v43 = vand.u32 %v1132_v39, %v3339_v17 }
  0x93   :  { %3058 = vmatmul.mubr.msk.bf16.vlgmr.msra.gmra.mrb[16].mxu1 %vm49_vm2, %v3054_v21  ;;  %v1122_v23 = vpop.permute.xlu0 %1121  ;;  %v1128_v24 = vpop.permute.xlu1 %1127 }
  0x94   :  { %3198 = vmatpush3.bf16.msra.mxu1 %v610_v20  ;;  %3199 = vmatprep.mubr.msk.bf16.mxu1 %vm3293_vm3, %v3292_v31  ;;  %v1131_v49 = vsel %vm400_vm4, %v1122_v23, %v1124_v18  ;;  %v1133_v50 = vsel %vm400_vm4, %v3603_v19, %v1128_v24 }
  0x95   :  { %829 = vmatprep.subr.bf16.mxu1 %v783_v22  ;;  %v1139_v54 = vand.u32 %v1131_v49, %v3339_v17  ;;  %v1145_v58 = vand.u32 %v1133_v50, %v3339_v17 }
  0x97   :  { %3059 = vmatmul.mubr.msk.bf16.vlgmr.msra.gmra.mrb[20].mxu0 %vm49_vm2, %v3054_v21  ;;  %v3618_v26 = vpop.permute.xlu0 %1129  ;;  %v3620_v27 = vpop.permute.xlu1 %1312 }
  0x98   :  { %789 = vmatpush1.bf16.msra.mxu0 %v774_v25  ;;  %820 = vmatprep.mubr.bf16.mxu0 %v3290_v12  ;;  %v1134_v44 = vsel %vm400_vm4, %v1128_v24, %v3618_v26  ;;  %v1151_v62 = vand.u32 %v3618_v26, %v3339_v17 }
  0x99   :  { %3203 = vmatprep.subr.bf16.mxu0 %v3292_v31  ;;  %v1148_v51 = vand.u32 %v1134_v44, %v3339_v17 }
  0x9b   :  { %3200 = vmatmul.mubr.msk.bf16.vlgmr.msra.gmra.mrb[20].mxu1 %vm49_vm2, %v3054_v21  ;;  %v3629_v30 = vpop.permute.xlu0 %1314  ;;  %v1311_v32 = vpop.permute.xlu1 %1310 }
  0x9c   :  { %830 = vmatpush1.bf16.msra.mxu1 %v780_v28  ;;  %861 = vmatprep.mubr.bf16.mxu1 %v3290_v12  ;;  %v1321_v55 = vsel %vm400_vm4, %v3620_v27, %v3629_v30  ;;  %v1320_v0 = vsel %vm400_vm4, %v1311_v32, %v3620_v27 }
  0x9d   :  { %964 = vmatprep.subr.bf16.mxu1 %v953_v29  ;;  %v1331_v59 = vand.u32 %v1321_v55, %v3339_v17  ;;  %v1328_v3 = vand.u32 %v1320_v0, %v3339_v17 }
  0x9f   :  { %3065 = vmatmul.mubr.msk.bf16.vlgmr.msra.gmra.mrb[24].mxu0 %vm49_vm2, %v3061_v33  ;;  %v1317_v36 = vpop.permute.xlu0 %1316  ;;  %v3640_v37 = vpop.permute.xlu1 %1318 }
  0xa0   :  { %3204 = vmatpush3.bf16.msra.mxu0 %v786_v34  ;;  %3205 = vmatprep.mubr.msk.bf16.mxu0 %vm3293_vm3, %v3292_v31  ;;  %v1323_v60 = vsel %vm400_vm4, %v1317_v36, %v3640_v37  ;;  %v1322_v5 = vsel %vm400_vm4, %v3629_v30, %v1317_v36  ;;  %v1340_v14 = vand.u32 %v3640_v37, %v3339_v17  ;;  %v3089_v30 = vld [vmem:[%s4010_s0 + $0x20] sm:$0xf] }
  0xa1   :  { %1005 = vmatprep.subr.bf16.mxu0 %v959_v35  ;;  %v1337_v1 = vand.u32 %v1323_v60, %v3339_v17  ;;  %v1334_v8 = vand.u32 %v1322_v5, %v3339_v17 }
  0xa3   :  { %3066 = vmatmul.mubr.msk.bf16.vlgmr.msra.gmra.mrb[24].mxu1 %vm49_vm2, %v3061_v33  ;;  %v3649_v40 = vpop.permute.xlu0 %1501  ;;  %v3651_v41 = vpop.permute.xlu1 %1503 }
  0xa4   :  { %965 = vmatpush1.bf16.msra.mxu1 %v950_v38  ;;  %996 = vmatprep.mubr.bf16.mxu1 %v3290_v12  ;;  %v1511_v7 = vsel %vm1509_vm5, %v3649_v40, %v3651_v41 }
  0xa5   :  { %3209 = vmatprep.subr.bf16.mxu1 %v3292_v31  ;;  %v1521_v9 = vand.u32 %v1511_v7, %v3339_v17 }
  0xa7   :  { %3206 = vmatmul.mubr.msk.bf16.vlgmr.msra.gmra.mrb[28].mxu0 %vm49_vm2, %v3061_v33  ;;  %v1500_v45 = vpop.permute.xlu0 %1499  ;;  %v3661_v46 = vpop.permute.xlu1 %1505 }
  0xa8   :  { %1006 = vmatpush1.bf16.msra.mxu0 %v956_v42  ;;  %1037 = vmatprep.mubr.bf16.mxu0 %v3290_v12  ;;  %v1510_v16 = vsel %vm1509_vm5, %v1500_v45, %v3649_v40  ;;  %v1512_v21 = vsel %vm1509_vm5, %v3651_v41, %v3661_v46  ;;  %v3094_v45 = vld [vmem:[%s4010_s0 + $0x24] sm:$0xf] }
  0xa9   :  { %1153 = vmatprep.subr.bf16.mxu0 %v1142_v43  ;;  %v1518_v19 = vand.u32 %v1510_v16, %v3339_v17  ;;  %v1524_v24 = vand.u32 %v1512_v21, %v3339_v17 }
  0xab   :  { %3072 = vmatmul.mubr.msk.bf16.vlgmr.msra.gmra.mrb[28].mxu1 %vm49_vm2, %v3068_v47  ;;  %v3672_v52 = vpop.permute.xlu0 %1507  ;;  %v3674_v53 = vpop.permute.xlu1 %1691 }
  0xac   :  { %3210 = vmatpush3.bf16.msra.mxu1 %v962_v48  ;;  %3211 = vmatprep.mubr.msk.bf16.mxu1 %vm3293_vm3, %v3292_v31  ;;  %v1513_v10 = vsel %vm1509_vm5, %v3661_v46, %v3672_v52  ;;  %v1530_v29 = vand.u32 %v3672_v52, %v3339_v17 }
  0xad   :  { %1194 = vmatprep.subr.bf16.mxu1 %v1148_v51  ;;  %v1527_v18 = vand.u32 %v1513_v10, %v3339_v17 }
  0xaf   :  { %3073 = vmatmul.mubr.msk.bf16.vlgmr.msra.gmra.mrb[32].mxu0 %vm49_vm2, %v3068_v47  ;;  %v3685_v56 = vpop.permute.xlu0 %1693  ;;  %v3687_v57 = vpop.permute.xlu1 %1689 }
  0xb0   :  { %1154 = vmatpush1.bf16.msra.mxu0 %v1139_v54  ;;  %1185 = vmatprep.mubr.bf16.mxu0 %v3290_v12  ;;  %v1700_v23 = vsel %vm1509_vm5, %v3674_v53, %v3685_v56  ;;  %v1699_v32 = vsel %vm1509_vm5, %v3687_v57, %v3674_v53 }
  0xb1   :  { %3215 = vmatprep.subr.bf16.mxu0 %v3292_v31  ;;  %v1710_v26 = vand.u32 %v1700_v23, %v3339_v17  ;;  %v1707_v35 = vand.u32 %v1699_v32, %v3339_v17 }
  0xb3   :  { %3212 = vmatmul.mubr.msk.bf16.vlgmr.msra.gmra.mrb[32].mxu1 %vm49_vm2, %v3068_v47  ;;  %v3696_v61 = vpop.permute.xlu0 %1695  ;;  %v3707_v2 = vpop.permute.xlu1 %1697 }
  0xb4   :  { %1195 = vmatpush1.bf16.msra.mxu1 %v1145_v58  ;;  %1226 = vmatprep.mubr.bf16.mxu1 %v3290_v12  ;;  %v1702_v27 = vsel %vm1509_vm5, %v3696_v61, %v3707_v2  ;;  %v1701_v36 = vsel %vm1509_vm5, %v3685_v56, %v3696_v61  ;;  %v1719_v44 = vand.u32 %v3707_v2, %v3339_v17 }
  0xb5   :  { %1342 = vmatprep.subr.bf16.mxu1 %v1331_v59  ;;  %v1716_v33 = vand.u32 %v1702_v27, %v3339_v17  ;;  %v1713_v39 = vand.u32 %v1701_v36, %v3339_v17  ;;  %v3101_v59 = vld [vmem:[%s4010_s0 + $0x28] sm:$0xf] }
  0xb7   :  { %3079 = vmatmul.mubr.msk.bf16.vlgmr.msra.gmra.mrb[36].mxu0 %vm49_vm2, %v3075_v63  ;;  %v3713_v4 = vpop.permute.xlu0 %1880  ;;  %v3717_v6 = vpop.permute.xlu1 %1882 }
  0xb8   :  { %3216 = vmatpush3.bf16.msra.mxu0 %v1151_v62  ;;  %3217 = vmatprep.mubr.msk.bf16.mxu0 %vm3293_vm3, %v3292_v31  ;;  %v1890_v38 = vsel %vm1888_vm6, %v3713_v4, %v3717_v6 }
  0xb9   :  { %1383 = vmatprep.subr.bf16.mxu0 %v1337_v1  ;;  %v1900_v41 = vand.u32 %v1890_v38, %v3339_v17 }
  0xbb   :  { %3080 = vmatmul.mubr.msk.bf16.vlgmr.msra.gmra.mrb[36].mxu1 %vm49_vm2, %v3075_v63  ;;  %v1879_v11 = vpop.permute.xlu0 %1878  ;;  %v3731_v13 = vpop.permute.xlu1 %1884 }
  0xbc   :  { %1343 = vmatpush1.bf16.msra.mxu1 %v1328_v3  ;;  %1374 = vmatprep.mubr.bf16.mxu1 %v3290_v12  ;;  %v1889_v46 = vsel %vm1888_vm6, %v1879_v11, %v3713_v4  ;;  %v1891_v52 = vsel %vm1888_vm6, %v3717_v6, %v3731_v13 }
  0xbd   :  { %3221 = vmatprep.subr.bf16.mxu1 %v3292_v31  ;;  %v1897_v51 = vand.u32 %v1889_v46, %v3339_v17  ;;  %v1903_v54 = vand.u32 %v1891_v52, %v3339_v17  ;;  %v2983_v52 = vld [vmem:[%s4011_s2] sm:$0xff] }
  0xbe   :  { %2986 = vperm.xlu0 %3283, %v2983_v52  }
  0xbf   :  { %3218 = vmatmul.mubr.msk.bf16.vlgmr.msra.gmra.mrb[40].mxu0 %vm49_vm2, %v3075_v63  ;;  %v3746_v20 = vpop.permute.xlu0 %1886  ;;  %v3751_v22 = vpop.permute.xlu1 %2070 }
  0xc0   :  { %1384 = vmatpush1.bf16.msra.mxu0 %v1334_v8  ;;  %1415 = vmatprep.mubr.bf16.mxu0 %v3290_v12  ;;  %v1892_v43 = vsel %vm1888_vm6, %v3731_v13, %v3746_v20  ;;  %v1909_v58 = vand.u32 %v3746_v20, %v3339_v17 }
  0xc1   :  { %1532 = vmatprep.subr.bf16.mxu0 %v1521_v9  ;;  %v1906_v47 = vand.u32 %v1892_v43, %v3339_v17 }
  0xc3   :  { %3086 = vmatmul.mubr.msk.bf16.vlgmr.msra.gmra.mrb[40].mxu1 %vm49_vm2, %v3082_v15  ;;  %v3759_v25 = vpop.permute.xlu0 %2072  ;;  %v2069_v28 = vpop.permute.xlu1 %2068 }
  0xc4   :  { %3222 = vmatpush3.bf16.msra.mxu1 %v1340_v14  ;;  %3223 = vmatprep.mubr.msk.bf16.mxu1 %vm3293_vm3, %v3292_v31  ;;  %v2079_v53 = vsel %vm1888_vm6, %v3751_v22, %v3759_v25  ;;  %v2078_v61 = vsel %vm1888_vm6, %v2069_v28, %v3751_v22 }
  0xc5   :  { %1573 = vmatprep.subr.bf16.mxu1 %v1527_v18  ;;  %v2089_v55 = vand.u32 %v2079_v53, %v3339_v17  ;;  %v2086_v4 = vand.u32 %v2078_v61, %v3339_v17 }
  0xc7   :  { %3087 = vmatmul.mubr.msk.bf16.vlgmr.msra.gmra.mrb[44].mxu0 %vm49_vm2, %v3082_v15  ;;  %v3777_v34 = vpop.permute.xlu0 %2074  ;;  %v3786_v37 = vpop.permute.xlu1 %2076 }
  0xc8   :  { %1533 = vmatpush1.bf16.msra.mxu0 %v1518_v19  ;;  %1564 = vmatprep.mubr.bf16.mxu0 %v3290_v12  ;;  %v2081_v57 = vsel %vm1888_vm6, %v3777_v34, %v3786_v37  ;;  %v2080_v7 = vsel %vm1888_vm6, %v3759_v25, %v3777_v34  ;;  %v3106_v25 = vld [vmem:[%s4010_s0 + $0x2c] sm:$0xf] }
  0xc9   :  { %3227 = vmatprep.subr.bf16.mxu0 %v3292_v31  ;;  %v2095_v62 = vand.u32 %v2081_v57, %v3339_v17  ;;  %v2092_v11 = vand.u32 %v2080_v7, %v3339_v17 }
  0xcb   :  { %3224 = vmatmul.mubr.msk.bf16.vlgmr.msra.gmra.mrb[44].mxu1 %vm49_vm2, %v3082_v15  ;;  %v3794_v40 = vpop.permute.xlu0 %2259  ;;  %v3798_v42 = vpop.permute.xlu1 %2261 }
  0xcc   :  { %1574 = vmatpush1.bf16.msra.mxu1 %v1524_v24  ;;  %1605 = vmatprep.mubr.bf16.mxu1 %v3290_v12  ;;  %v2268_v10 = vsel %vm1509_vm5, %v3794_v40, %v3798_v42  ;;  %v2098_v24 = vand.u32 %v3786_v37, %v3339_v17 }
  0xcd   :  { %1721 = vmatprep.subr.bf16.mxu1 %v1710_v26  ;;  %v2278_v14 = vand.u32 %v2268_v10, %v3339_v17 }
  0xcf   :  { %3091 = vmatmul.mubr.msk.bf16.vlgmr.msra.gmra.mrb[48].mxu0 %vm49_vm2, %v3089_v30  ;;  %v3813_v48 = vpop.permute.xlu0 %2257  ;;  %v3816_v49 = vpop.permute.xlu1 %2263 }
  0xd0   :  { %3228 = vmatpush3.bf16.msra.mxu0 %v1530_v29  ;;  %3229 = vmatprep.mubr.msk.bf16.mxu0 %vm3293_vm3, %v3292_v31  ;;  %v2267_v28 = vsel %vm1509_vm5, %v3813_v48, %v3794_v40  ;;  %v2269_v36 = vsel %vm1509_vm5, %v3798_v42, %v3816_v49 }
  0xd1   :  { %1762 = vmatprep.subr.bf16.mxu0 %v1716_v33  ;;  %v2275_v33 = vand.u32 %v2267_v28, %v3339_v17  ;;  %v2281_v42 = vand.u32 %v2269_v36, %v3339_v17 }
  0xd3   :  { %3092 = vmatmul.mubr.msk.bf16.vlgmr.msra.gmra.mrb[48].mxu1 %vm49_vm2, %v3089_v30  ;;  %v3830_v50 = vpop.permute.xlu0 %2265  ;;  %v3834_v56 = vpop.permute.xlu1 %2448 }
  0xd4   :  { %1722 = vmatpush1.bf16.msra.mxu1 %v1707_v35  ;;  %1753 = vmatprep.mubr.bf16.mxu1 %v3290_v12  ;;  %v2270_v18 = vsel %vm1509_vm5, %v3816_v49, %v3830_v50 }
  0xd5   :  { %3233 = vmatprep.subr.bf16.mxu1 %v3292_v31  ;;  %v2284_v29 = vand.u32 %v2270_v18, %v3339_v17 }
  0xd7   :  { %3230 = vmatmul.mubr.msk.bf16.vlgmr.msra.gmra.mrb[52].mxu0 %vm49_vm2, %v3089_v30  ;;  %v3846_v60 = vpop.permute.xlu0 %2450  ;;  %v3852_v3 = vpop.permute.xlu1 %2446 }
  0xd8   :  { %1763 = vmatpush1.bf16.msra.mxu0 %v1713_v39  ;;  %1794 = vmatprep.mubr.bf16.mxu0 %v3290_v12  ;;  %v2457_v39 = vsel %vm1509_vm5, %v3834_v56, %v3846_v60  ;;  %v2456_v57 = vsel %vm1509_vm5, %v3852_v3, %v3834_v56 }
  0xd9   :  { %1911 = vmatprep.subr.bf16.mxu0 %v1900_v41 }
  0xdb   :  { %3098 = vmatmul.mubr.msk.bf16.vlgmr.msra.gmra.mrb[52].mxu1 %vm49_vm2, %v3094_v45  ;;  %v3866_v13 = vpop.permute.xlu0 %2452  ;;  %v3876_v22 = vpop.permute.xlu1 %2454 }
  0xdc   :  { %3234 = vmatpush3.bf16.msra.mxu1 %v1719_v44  ;;  %3235 = vmatprep.mubr.msk.bf16.mxu1 %vm3293_vm3, %v3292_v31  ;;  %v2459_v53 = vsel %vm1509_vm5, %v3866_v13, %v3876_v22 }
  0xdd   :  { %1952 = vmatprep.subr.bf16.mxu1 %v1906_v47 }
  0xdf   :  { %3099 = vmatmul.mubr.msk.bf16.vlgmr.msra.gmra.mrb[56].mxu0 %vm49_vm2, %v3094_v45  ;;  %v2638_v34 = vpop.permute.xlu0 %2637  ;;  %v3894_v35 = vpop.permute.xlu1 %2639 }
  0xe0   :  { %1912 = vmatpush1.bf16.msra.mxu0 %v1897_v51  ;;  %1943 = vmatprep.mubr.bf16.mxu0 %v3290_v12  ;;  %v2467_v51 = vand.u32 %v2457_v39, %v3339_v17  ;;  %v2646_v56 = vsel %vm1888_vm6, %v2638_v34, %v3894_v35 }
  0xe1   :  { %3239 = vmatprep.subr.bf16.mxu0 %v3292_v31 }
  0xe3   :  { %3236 = vmatmul.mubr.msk.bf16.vlgmr.msra.gmra.mrb[56].mxu1 %vm49_vm2, %v3094_v45  ;;  %v2642_v61 = vpop.permute.xlu1 %2641 }
  0xe4   :  { %1953 = vmatpush1.bf16.msra.mxu1 %v1903_v54  ;;  %1984 = vmatprep.mubr.bf16.mxu1 %v3290_v12  ;;  %v2287_v54 = vand.u32 %v3830_v50, %v3339_v17  ;;  %v2464_v50 = vand.u32 %v2456_v57, %v3339_v17  ;;  %v2647_v10 = vsel %vm1888_vm6, %v3894_v35, %v2642_v61 }
  0xe5   :  { %2100 = vmatprep.subr.bf16.mxu1 %v2089_v55  ;;  %v106_v63 = vpop.f32.mrb[0].mxu0  ;;  %v147_v0 = vpop.f32.mrb[0].mxu1  ;;  %v3113_v55 = vld [vmem:[%s4010_s0 + $0x30] sm:$0xf] }
  0xe6   :  { %v108_v1 = vpop.f32.mrb[1].mxu0  ;;  %v149_v2 = vpop.f32.mrb[1].mxu1 }
  0xe7   :  { %3103 = vmatmul.mubr.msk.bf16.vlgmr.msra.gmra.mrb[60].mxu0 %vm49_vm2, %v3101_v59  ;;  %v110_v5 = vpop.f32.mrb[2].mxu0  ;;  %v151_v6 = vpop.f32.mrb[2].mxu1 }
  0xe8   :  { %3240 = vmatpush3.bf16.msra.mxu0 %v1909_v58  ;;  %3241 = vmatprep.mubr.msk.bf16.mxu0 %vm3293_vm3, %v3292_v31  ;;  %v111_v8 = vpop.f32.mrb[3].mxu0  ;;  %v152_v9 = vpop.f32.mrb[3].mxu1  ;;  %v2473_v58 = vand.u32 %v2459_v53, %v3339_v17 }
  0xe9   :  { %2141 = vmatprep.subr.bf16.mxu0 %v2095_v62  ;;  %v2458_v62 = vsel %vm1509_vm5, %v3846_v60, %v3866_v13  ;;  %v2476_v60 = vand.u32 %v3876_v22, %v3339_v17 }
  0xeb   :  { %3104 = vmatmul.mubr.msk.bf16.vlgmr.msra.gmra.mrb[60].mxu1 %vm49_vm2, %v3101_v59 }
  0xec   :  { %2101 = vmatpush1.bf16.msra.mxu1 %v2086_v4  ;;  %2132 = vmatprep.mubr.bf16.mxu1 %v3290_v12  ;;  %v3120_v4 = vld [vmem:[%s4010_s0 + $0x34] sm:$0xf] }
  0xed   :  { %3245 = vmatprep.subr.bf16.mxu1 %v3292_v31  ;;  %v188_v15 = vpop.f32.mrb[4].mxu0  ;;  %v272_v16 = vpop.f32.mrb[4].mxu1 }
  0xee   :  { %v3183_v19 = vpop.f32.mrb[5].mxu0  ;;  %v3873_v20 = vadd.f32 %v272_v16, %v106_v63  ;;  %v274_v21 = vpop.f32.mrb[5].mxu1 }
  0xef   :  { %3242 = vmatmul.mubr.msk.bf16.vlgmr.msra.gmra.mrb[64].mxu0 %vm49_vm2, %v3101_v59  ;;  %v3878_v23 = vadd.f32 %v274_v21, %v108_v1  ;;  %v191_v26 = vpop.f32.mrb[6].mxu0  ;;  %v276_v27 = vpop.f32.mrb[6].mxu1  ;;  %v2470_v1 = vand.u32 %v2458_v62, %v3339_v17  ;;  %v3127_v21 = vld [vmem:[%s4010_s0 + $0x38] sm:$0xf] }
  0xf0   :  { %2142 = vmatpush1.bf16.msra.mxu0 %v2092_v11  ;;  %2173 = vmatprep.mubr.bf16.mxu0 %v3290_v12  ;;  %v3184_v30 = vpop.f32.mrb[7].mxu0  ;;  %v277_v32 = vpop.f32.mrb[7].mxu1 }
  0xf1   :  { %2289 = vmatprep.subr.bf16.mxu0 %v2278_v14  ;;  %v2636_v59 = vpop.permute.xlu0 %2635 }
  0xf2   :  { %v2645_v5 = vsel %vm1888_vm6, %v2636_v59, %v2638_v34 }
  0xf3   :  { %3110 = vmatmul.mubr.msk.bf16.vlgmr.msra.gmra.mrb[64].mxu1 %vm49_vm2, %v3106_v25  ;;  %v2653_v9 = vand.u32 %v2645_v5, %v3339_v17 }
  0xf4   :  { %3246 = vmatpush3.bf16.msra.mxu1 %v2098_v24  ;;  %3247 = vmatprep.mubr.msk.bf16.mxu1 %vm3293_vm3, %v3292_v31 }
  0xf5   :  { %2330 = vmatprep.subr.bf16.mxu1 %v2284_v29  ;;  %v313_v37 = vpop.f32.mrb[8].mxu0  ;;  %v354_v38 = vpop.f32.mrb[8].mxu1  ;;  %v3134_v29 = vld [vmem:[%s4010_s0 + $0x3c] sm:$0xf] }
  0xf6   :  { %v3902_v40 = vadd.f32 %v313_v37, %v147_v0  ;;  %v315_v41 = vpop.f32.mrb[9].mxu0  ;;  %v3904_v43 = vadd.f32 %v354_v38, %v188_v15  ;;  %v3189_v44 = vpop.f32.mrb[9].mxu1  ;;  %v2659_v15 = vand.u32 %v2647_v10, %v3339_v17 }
  0xf7   :  { %3111 = vmatmul.mubr.msk.bf16.vlgmr.msra.gmra.mrb[68].mxu0 %vm49_vm2, %v3106_v25  ;;  %v3907_v45 = vadd.f32 %v315_v41, %v149_v2  ;;  %v317_v46 = vpop.f32.mrb[10].mxu0  ;;  %v357_v47 = vpop.f32.mrb[10].mxu1  ;;  %v2656_v2 = vand.u32 %v2646_v56, %v3339_v17 }
  0xf8   :  { %2290 = vmatpush1.bf16.msra.mxu0 %v2275_v33  ;;  %2321 = vmatprep.mubr.bf16.mxu0 %v3290_v12  ;;  %v318_v48 = vpop.f32.mrb[11].mxu0  ;;  %v3190_v49 = vpop.f32.mrb[11].mxu1 }
  0xf9   :  { %3251 = vmatprep.subr.bf16.mxu0 %v3292_v31  ;;  %v2644_v63 = vpop.permute.xlu0 %2643  ;;  %v2827_v0 = vpop.permute.xlu1 %2826 }
  0xfa   :  { %v2648_v3 = vsel %vm1888_vm6, %v2642_v61, %v2644_v63  ;;  %v2665_v19 = vand.u32 %v2644_v63, %v3339_v17 }
  0xfb   :  { %3248 = vmatmul.mubr.msk.bf16.vlgmr.msra.gmra.mrb[68].mxu1 %vm49_vm2, %v3106_v25  ;;  %v2662_v6 = vand.u32 %v2648_v3, %v3339_v17 }
  0xfc   :  { %2331 = vmatpush1.bf16.msra.mxu1 %v2281_v42  ;;  %2362 = vmatprep.mubr.bf16.mxu1 %v3290_v12 }
  0xfd   :  { %2478 = vmatprep.subr.bf16.mxu1 %v2467_v51  ;;  %v2829_v7 = vpop.permute.xlu0 %2828  ;;  %v2825_v8 = vpop.permute.xlu1 %2824 }
  0xfe   :  { %v2835_v11 = vsel %vm1888_vm6, %v2827_v0, %v2829_v7  ;;  %v2834_v22 = vsel %vm1888_vm6, %v2825_v8, %v2827_v0 }
  0xff   :  { %3117 = vmatmul.mubr.msk.bf16.vlgmr.msra.gmra.mrb[72].mxu0 %vm49_vm2, %v3113_v55  ;;  %v2845_v16 = vand.u32 %v2835_v11, %v3339_v17  ;;  %v2842_v25 = vand.u32 %v2834_v22, %v3339_v17 }
 0x100   :  { %3252 = vmatpush3.bf16.msra.mxu0 %v2287_v54  ;;  %3253 = vmatprep.mubr.msk.bf16.mxu0 %vm3293_vm3, %v3292_v31 }
 0x101   :  { %2519 = vmatprep.subr.bf16.mxu0 %v2473_v58  ;;  %v2831_v13 = vpop.permute.xlu0 %2830  ;;  %v2833_v14 = vpop.permute.xlu1 %2832 }
 0x102   :  { %v2837_v18 = vsel %vm1888_vm6, %v2831_v13, %v2833_v14  ;;  %v2836_v26 = vsel %vm1888_vm6, %v2829_v7, %v2831_v13  ;;  %v2854_v28 = vand.u32 %v2833_v14, %v3339_v17 }
 0x103   :  { %3118 = vmatmul.mubr.msk.bf16.vlgmr.msra.gmra.mrb[72].mxu1 %vm49_vm2, %v3113_v55  ;;  %v2851_v24 = vand.u32 %v2837_v18, %v3339_v17  ;;  %v2848_v27 = vand.u32 %v2836_v26, %v3339_v17 }
 0x104   :  { %2479 = vmatpush1.bf16.msra.mxu1 %v2464_v50  ;;  %2510 = vmatprep.mubr.bf16.mxu1 %v3290_v12 }
 0x105   :  { %3257 = vmatprep.subr.bf16.mxu1 %v3292_v31 }
 0x107   :  { %3254 = vmatmul.mubr.msk.bf16.vlgmr.msra.gmra.mrb[76].mxu0 %vm49_vm2, %v3113_v55 }
 0x108   :  { %2520 = vmatpush1.bf16.msra.mxu0 %v2470_v1  ;;  %2551 = vmatprep.mubr.bf16.mxu0 %v3290_v12 }
 0x109   :  { %2667 = vmatprep.subr.bf16.mxu0 %v2656_v2 }
 0x10b   :  { %3124 = vmatmul.mubr.msk.bf16.vlgmr.msra.gmra.mrb[76].mxu1 %vm49_vm2, %v3120_v4 }
 0x10c   :  { %3258 = vmatpush3.bf16.msra.mxu1 %v2476_v60  ;;  %3259 = vmatprep.mubr.msk.bf16.mxu1 %vm3293_vm3, %v3292_v31 }
 0x10d   :  { %2708 = vmatprep.subr.bf16.mxu1 %v2662_v6 }
 0x10f   :  { %3125 = vmatmul.mubr.msk.bf16.vlgmr.msra.gmra.mrb[80].mxu0 %vm49_vm2, %v3120_v4 }
 0x110   :  { %2668 = vmatpush1.bf16.msra.mxu0 %v2653_v9  ;;  %2699 = vmatprep.mubr.bf16.mxu0 %v3290_v12 }
 0x111   :  { %3263 = vmatprep.subr.bf16.mxu0 %v3292_v31 }
 0x113   :  { %3260 = vmatmul.mubr.msk.bf16.vlgmr.msra.gmra.mrb[80].mxu1 %vm49_vm2, %v3120_v4 }
 0x114   :  { %2709 = vmatpush1.bf16.msra.mxu1 %v2659_v15  ;;  %2740 = vmatprep.mubr.bf16.mxu1 %v3290_v12 }
 0x115   :  { %2856 = vmatprep.subr.bf16.mxu1 %v2845_v16 }
 0x117   :  { %3131 = vmatmul.mubr.msk.bf16.vlgmr.msra.gmra.mrb[84].mxu0 %vm49_vm2, %v3127_v21 }
 0x118   :  { %3264 = vmatpush3.bf16.msra.mxu0 %v2665_v19  ;;  %3265 = vmatprep.mubr.msk.bf16.mxu0 %vm3293_vm3, %v3292_v31 }
 0x119   :  { %2897 = vmatprep.subr.bf16.mxu0 %v2851_v24 }
 0x11b   :  { %3132 = vmatmul.mubr.msk.bf16.vlgmr.msra.gmra.mrb[84].mxu1 %vm49_vm2, %v3127_v21 }
 0x11c   :  { %2857 = vmatpush1.bf16.msra.mxu1 %v2842_v25  ;;  %2888 = vmatprep.mubr.bf16.mxu1 %v3290_v12 }
 0x11d   :  { %3269 = vmatprep.subr.bf16.mxu1 %v3292_v31 }
 0x11f   :  { %3266 = vmatmul.mubr.msk.bf16.vlgmr.msra.gmra.mrb[88].mxu0 %vm49_vm2, %v3127_v21 }
 0x120   :  { %2898 = vmatpush1.bf16.msra.mxu0 %v2848_v27  ;;  %2929 = vmatprep.mubr.bf16.mxu0 %v3290_v12 }
 0x123   :  { %3138 = vmatmul.mubr.msk.bf16.vlgmr.msra.gmra.mrb[88].mxu1 %vm49_vm2, %v3134_v29 }
 0x124   :  { %3270 = vmatpush3.bf16.msra.mxu1 %v2854_v28  ;;  %3271 = vmatprep.mubr.msk.bf16.mxu1 %vm3293_vm3, %v3292_v31 }
 0x127   :  { %3139 = vmatmul.mubr.msk.bf16.vlgmr.msra.gmra.mrb[92].mxu0 %vm49_vm2, %v3134_v29 }
 0x12b   :  { %3272 = vmatmul.mubr.msk.bf16.vlgmr.msra.gmra.mrb[92].mxu1 %vm49_vm2, %v3134_v29 }
 0x15a   :  { %v457_v30 = vpop.f32.mrb[12].mxu0 }
 0x15b   :  { %v545_v17 = vadd.f32 %v457_v30, %v3873_v20  ;;  %v459_v32 = vpop.f32.mrb[13].mxu0 }
 0x15c   :  { %v546_v33 = vadd.f32 %v459_v32, %v3878_v23  ;;  %v461_v34 = vpop.f32.mrb[14].mxu0 }
 0x15d   :  { %v462_v35 = vpop.f32.mrb[15].mxu0 }
 0x15e   :  { %v498_v36 = vpop.f32.mrb[12].mxu1 }
 0x15f   :  { %v547_v12 = vadd.f32 %v498_v36, %v3902_v40  ;;  %v500_v37 = vpop.f32.mrb[13].mxu1 }
 0x160   :  { %v548_v38 = vadd.f32 %v500_v37, %v3907_v45  ;;  %v502_v39 = vpop.f32.mrb[14].mxu1 }
 0x161   :  { %v503_v31 = vpop.f32.mrb[15].mxu1 }
 0x162   :  { %v539_v41 = vpop.f32.mrb[16].mxu0 }
 0x163   :  { %v549_v44 = vadd.f32 %v539_v41, %v3904_v43  ;;  %v3195_v46 = vpop.f32.mrb[17].mxu0 }
 0x164   :  { %v542_v47 = vpop.f32.mrb[18].mxu0 }
 0x165   :  { %v3196_v42 = vpop.f32.mrb[19].mxu0 }
 0x166   :  { %v646_v20 = vpop.f32.mrb[16].mxu1 }
 0x167   :  { %v734_v48 = vadd.f32 %v646_v20, %v545_v17  ;;  %v648_v49 = vpop.f32.mrb[17].mxu1 }
 0x168   :  { %v735_v23 = vadd.f32 %v648_v49, %v546_v33  ;;  %v650_v51 = vpop.f32.mrb[18].mxu1 }
 0x169   :  { %v651_v52 = vpop.f32.mrb[19].mxu1 }
 0x16a   :  { %v687_v53 = vpop.f32.mrb[20].mxu0 }
 0x16b   :  { %v736_v54 = vadd.f32 %v687_v53, %v547_v12  ;;  %v689_v40 = vpop.f32.mrb[21].mxu0 }
 0x16c   :  { %v737_v55 = vadd.f32 %v689_v40, %v548_v38  ;;  %v691_v57 = vpop.f32.mrb[22].mxu0 }
 0x16d   :  { %v692_v45 = vpop.f32.mrb[23].mxu0 }
 0x16e   :  { %v728_v58 = vpop.f32.mrb[20].mxu1 }
 0x16f   :  { %v738_v59 = vadd.f32 %v728_v58, %v549_v44  ;;  %v3201_v61 = vpop.f32.mrb[21].mxu1 }
 0x170   :  { %v731_v50 = vpop.f32.mrb[22].mxu1 }
 0x171   :  { %v3202_v43 = vpop.f32.mrb[23].mxu1 }
 0x172   :  { %v822_v62 = vpop.f32.mrb[24].mxu0 }
 0x173   :  { %v910_v56 = vadd.f32 %v822_v62, %v734_v48  ;;  %v824_v63 = vpop.f32.mrb[25].mxu0 }
 0x174   :  { %v911_v0 = vadd.f32 %v824_v63, %v735_v23  ;;  %v826_v1 = vpop.f32.mrb[26].mxu0 }
 0x175   :  { %v827_v2 = vpop.f32.mrb[27].mxu0 }
 0x176   :  { %v863_v3 = vpop.f32.mrb[24].mxu1 }
 0x177   :  { %v912_v60 = vadd.f32 %v863_v3, %v736_v54  ;;  %v865_v4 = vpop.f32.mrb[25].mxu1 }
 0x178   :  { %v913_v5 = vadd.f32 %v865_v4, %v737_v55  ;;  %v867_v6 = vpop.f32.mrb[26].mxu1 }
 0x179   :  { %v868_v7 = vpop.f32.mrb[27].mxu1 }
 0x17a   :  { %v904_v8 = vpop.f32.mrb[28].mxu0 }
 0x17b   :  { %v914_v9 = vadd.f32 %v904_v8, %v738_v59  ;;  %v3207_v10 = vpop.f32.mrb[29].mxu0 }
 0x17c   :  { %v907_v11 = vpop.f32.mrb[30].mxu0 }
 0x17d   :  { %v3208_v13 = vpop.f32.mrb[31].mxu0 }
 0x17e   :  { %v998_v14 = vpop.f32.mrb[28].mxu1 }
 0x17f   :  { %v1086_v15 = vadd.f32 %v998_v14, %v910_v56  ;;  %v1000_v16 = vpop.f32.mrb[29].mxu1 }
 0x180   :  { %v1087_v18 = vadd.f32 %v1000_v16, %v911_v0  ;;  %v1002_v19 = vpop.f32.mrb[30].mxu1 }
 0x181   :  { %v1003_v21 = vpop.f32.mrb[31].mxu1 }
 0x182   :  { %v1039_v22 = vpop.f32.mrb[32].mxu0 }
 0x183   :  { %v1088_v24 = vadd.f32 %v1039_v22, %v912_v60  ;;  %v1041_v25 = vpop.f32.mrb[33].mxu0 }
 0x184   :  { %v1089_v26 = vadd.f32 %v1041_v25, %v913_v5  ;;  %v1043_v27 = vpop.f32.mrb[34].mxu0 }
 0x185   :  { %v1044_v28 = vpop.f32.mrb[35].mxu0 }
 0x186   :  { %v1080_v29 = vpop.f32.mrb[32].mxu1 }
 0x187   :  { %v1090_v30 = vadd.f32 %v1080_v29, %v914_v9  ;;  %v3213_v17 = vpop.f32.mrb[33].mxu1 }
 0x188   :  { %v1083_v32 = vpop.f32.mrb[34].mxu1 }
 0x189   :  { %v3214_v33 = vpop.f32.mrb[35].mxu1 }
 0x18a   :  { %v1187_v34 = vpop.f32.mrb[36].mxu0 }
 0x18b   :  { %v1275_v35 = vadd.f32 %v1187_v34, %v1086_v15  ;;  %v1189_v36 = vpop.f32.mrb[37].mxu0 }
 0x18c   :  { %v1276_v12 = vadd.f32 %v1189_v36, %v1087_v18  ;;  %v1191_v37 = vpop.f32.mrb[38].mxu0 }
 0x18d   :  { %v1192_v38 = vpop.f32.mrb[39].mxu0 }
 0x18e   :  { %v1228_v39 = vpop.f32.mrb[36].mxu1 }
 0x18f   :  { %v1277_v31 = vadd.f32 %v1228_v39, %v1088_v24  ;;  %v1230_v41 = vpop.f32.mrb[37].mxu1 }
 0x190   :  { %v1278_v44 = vadd.f32 %v1230_v41, %v1089_v26  ;;  %v1232_v46 = vpop.f32.mrb[38].mxu1 }
 0x191   :  { %v1233_v47 = vpop.f32.mrb[39].mxu1 }
 0x192   :  { %v1269_v42 = vpop.f32.mrb[40].mxu0 }
 0x193   :  { %v1279_v20 = vadd.f32 %v1269_v42, %v1090_v30  ;;  %v3219_v48 = vpop.f32.mrb[41].mxu0 }
 0x194   :  { %v1272_v49 = vpop.f32.mrb[42].mxu0 }
 0x195   :  { %v3220_v23 = vpop.f32.mrb[43].mxu0 }
 0x196   :  { %v1376_v51 = vpop.f32.mrb[40].mxu1 }
 0x197   :  { %v1464_v52 = vadd.f32 %v1376_v51, %v1275_v35  ;;  %v1378_v53 = vpop.f32.mrb[41].mxu1 }
 0x198   :  { %v1465_v54 = vadd.f32 %v1378_v53, %v1276_v12  ;;  %v1380_v40 = vpop.f32.mrb[42].mxu1 }
 0x199   :  { %v1381_v55 = vpop.f32.mrb[43].mxu1 }
 0x19a   :  { %v1417_v57 = vpop.f32.mrb[44].mxu0 }
 0x19b   :  { %v1466_v45 = vadd.f32 %v1417_v57, %v1277_v31  ;;  %v1419_v58 = vpop.f32.mrb[45].mxu0 }
 0x19c   :  { %v1467_v59 = vadd.f32 %v1419_v58, %v1278_v44  ;;  %v1421_v61 = vpop.f32.mrb[46].mxu0 }
 0x19d   :  { %v1422_v50 = vpop.f32.mrb[47].mxu0 }
 0x19e   :  { %v1458_v43 = vpop.f32.mrb[44].mxu1 }
 0x19f   :  { %v1468_v62 = vadd.f32 %v1458_v43, %v1279_v20  ;;  %v3225_v56 = vpop.f32.mrb[45].mxu1 }
 0x1a0   :  { %v1461_v63 = vpop.f32.mrb[46].mxu1 }
 0x1a1   :  { %v3226_v0 = vpop.f32.mrb[47].mxu1 }
 0x1a2   :  { %v1566_v1 = vpop.f32.mrb[48].mxu0 }
 0x1a3   :  { %v1654_v2 = vadd.f32 %v1566_v1, %v1464_v52  ;;  %v1568_v3 = vpop.f32.mrb[49].mxu0 }
 0x1a4   :  { %v1655_v60 = vadd.f32 %v1568_v3, %v1465_v54  ;;  %v1570_v4 = vpop.f32.mrb[50].mxu0 }
 0x1a5   :  { %v1571_v5 = vpop.f32.mrb[51].mxu0 }
 0x1a6   :  { %v1607_v6 = vpop.f32.mrb[48].mxu1 }
 0x1a7   :  { %v1656_v7 = vadd.f32 %v1607_v6, %v1466_v45  ;;  %v1609_v8 = vpop.f32.mrb[49].mxu1 }
 0x1a8   :  { %v1657_v9 = vadd.f32 %v1609_v8, %v1467_v59  ;;  %v1611_v10 = vpop.f32.mrb[50].mxu1 }
 0x1a9   :  { %v1612_v11 = vpop.f32.mrb[51].mxu1 }
 0x1aa   :  { %v1648_v13 = vpop.f32.mrb[52].mxu0 }
 0x1ab   :  { %v1658_v14 = vadd.f32 %v1648_v13, %v1468_v62  ;;  %v3231_v15 = vpop.f32.mrb[53].mxu0 }
 0x1ac   :  { %v1651_v16 = vpop.f32.mrb[54].mxu0 }
 0x1ad   :  { %v3232_v18 = vpop.f32.mrb[55].mxu0 }
 0x1ae   :  { %v1755_v19 = vpop.f32.mrb[52].mxu1 }
 0x1af   :  { %v1843_v21 = vadd.f32 %v1755_v19, %v1654_v2  ;;  %v1757_v22 = vpop.f32.mrb[53].mxu1 }
 0x1b0   :  { %v1844_v24 = vadd.f32 %v1757_v22, %v1655_v60  ;;  %v1759_v25 = vpop.f32.mrb[54].mxu1 }
 0x1b1   :  { %v1760_v26 = vpop.f32.mrb[55].mxu1 }
 0x1b2   :  { %v1796_v27 = vpop.f32.mrb[56].mxu0 }
 0x1b3   :  { %v1845_v28 = vadd.f32 %v1796_v27, %v1656_v7  ;;  %v1798_v29 = vpop.f32.mrb[57].mxu0 }
 0x1b4   :  { %v1846_v30 = vadd.f32 %v1798_v29, %v1657_v9  ;;  %v1800_v17 = vpop.f32.mrb[58].mxu0 }
 0x1b5   :  { %v1801_v32 = vpop.f32.mrb[59].mxu0 }
 0x1b6   :  { %v1837_v33 = vpop.f32.mrb[56].mxu1 }
 0x1b7   :  { %v1847_v34 = vadd.f32 %v1837_v33, %v1658_v14  ;;  %v3237_v35 = vpop.f32.mrb[57].mxu1 }
 0x1b8   :  { %v1840_v36 = vpop.f32.mrb[58].mxu1 }
 0x1b9   :  { %v3238_v12 = vpop.f32.mrb[59].mxu1 }
 0x1ba   :  { %v1945_v37 = vpop.f32.mrb[60].mxu0 }
 0x1bb   :  { %v2033_v38 = vadd.f32 %v1945_v37, %v1843_v21  ;;  %v1947_v39 = vpop.f32.mrb[61].mxu0 }
 0x1bc   :  { %v2034_v31 = vadd.f32 %v1947_v39, %v1844_v24  ;;  %v1949_v41 = vpop.f32.mrb[62].mxu0 }
 0x1bd   :  { %v1950_v44 = vpop.f32.mrb[63].mxu0 }
 0x1be   :  { %v1986_v46 = vpop.f32.mrb[60].mxu1 }
 0x1bf   :  { %v2035_v47 = vadd.f32 %v1986_v46, %v1845_v28  ;;  %v1988_v42 = vpop.f32.mrb[61].mxu1 }
 0x1c0   :  { %v2036_v20 = vadd.f32 %v1988_v42, %v1846_v30  ;;  %v1990_v48 = vpop.f32.mrb[62].mxu1 }
 0x1c1   :  { %v1991_v49 = vpop.f32.mrb[63].mxu1 }
 0x1c2   :  { %v2027_v23 = vpop.f32.mrb[64].mxu0 }
 0x1c3   :  { %v2037_v51 = vadd.f32 %v2027_v23, %v1847_v34  ;;  %v3243_v52 = vpop.f32.mrb[65].mxu0 }
 0x1c4   :  { %v2030_v53 = vpop.f32.mrb[66].mxu0 }
 0x1c5   :  { %v3244_v54 = vpop.f32.mrb[67].mxu0 }
 0x1c6   :  { %v2134_v40 = vpop.f32.mrb[64].mxu1 }
 0x1c7   :  { %v2222_v55 = vadd.f32 %v2134_v40, %v2033_v38  ;;  %v2136_v57 = vpop.f32.mrb[65].mxu1 }
 0x1c8   :  { %v2223_v45 = vadd.f32 %v2136_v57, %v2034_v31  ;;  %v2138_v58 = vpop.f32.mrb[66].mxu1 }
 0x1c9   :  { %v2139_v59 = vpop.f32.mrb[67].mxu1 }
 0x1ca   :  { %v2175_v61 = vpop.f32.mrb[68].mxu0  ;;  %v2987_v59 = vpop.permute.xlu0 %2986 }
 0x1cb   :  { %v2224_v50 = vadd.f32 %v2175_v61, %v2035_v47  ;;  %v2177_v43 = vpop.f32.mrb[69].mxu0 }
 0x1cc   :  { %v2225_v62 = vadd.f32 %v2177_v43, %v2036_v20  ;;  %v2179_v56 = vpop.f32.mrb[70].mxu0 }
 0x1cd   :  { %v2180_v63 = vpop.f32.mrb[71].mxu0 }
 0x1ce   :  { %v2216_v0 = vpop.f32.mrb[68].mxu1 }
 0x1cf   :  { %v2226_v1 = vadd.f32 %v2216_v0, %v2037_v51  ;;  %v3249_v2 = vpop.f32.mrb[69].mxu1 }
 0x1d0   :  { %v2219_v3 = vpop.f32.mrb[70].mxu1 }
 0x1d1   :  { %v3250_v60 = vpop.f32.mrb[71].mxu1 }
 0x1d2   :  { %v2323_v4 = vpop.f32.mrb[72].mxu0 }
 0x1d3   :  { %v2411_v5 = vadd.f32 %v2323_v4, %v2222_v55  ;;  %v2325_v6 = vpop.f32.mrb[73].mxu0 }
 0x1d4   :  { %v2412_v7 = vadd.f32 %v2325_v6, %v2223_v45  ;;  %v2327_v8 = vpop.f32.mrb[74].mxu0 }
 0x1d5   :  { %v2328_v9 = vpop.f32.mrb[75].mxu0 }
 0x1d6   :  { %v2364_v10 = vpop.f32.mrb[72].mxu1 }
 0x1d7   :  { %v2413_v11 = vadd.f32 %v2364_v10, %v2224_v50  ;;  %v2366_v13 = vpop.f32.mrb[73].mxu1 }
 0x1d8   :  { %v2414_v14 = vadd.f32 %v2366_v13, %v2225_v62  ;;  %v2368_v15 = vpop.f32.mrb[74].mxu1 }
 0x1d9   :  { %v2369_v16 = vpop.f32.mrb[75].mxu1 }
 0x1da   :  { %v2405_v18 = vpop.f32.mrb[76].mxu0 }
 0x1db   :  { %v2415_v19 = vadd.f32 %v2405_v18, %v2226_v1  ;;  %v3255_v21 = vpop.f32.mrb[77].mxu0 }
 0x1dc   :  { %v2408_v22 = vpop.f32.mrb[78].mxu0 }
 0x1dd   :  { %v3256_v24 = vpop.f32.mrb[79].mxu0 }
 0x1de   :  { %v2512_v25 = vpop.f32.mrb[76].mxu1 }
 0x1df   :  { %v2600_v26 = vadd.f32 %v2512_v25, %v2411_v5  ;;  %v2514_v27 = vpop.f32.mrb[77].mxu1 }
 0x1e0   :  { %v2601_v28 = vadd.f32 %v2514_v27, %v2412_v7  ;;  %v2516_v29 = vpop.f32.mrb[78].mxu1 }
 0x1e1   :  { %v2517_v30 = vpop.f32.mrb[79].mxu1 }
 0x1e2   :  { %v2553_v17 = vpop.f32.mrb[80].mxu0 }
 0x1e3   :  { %v2602_v32 = vadd.f32 %v2553_v17, %v2413_v11  ;;  %v2555_v33 = vpop.f32.mrb[81].mxu0 }
 0x1e4   :  { %v2603_v34 = vadd.f32 %v2555_v33, %v2414_v14  ;;  %v2557_v35 = vpop.f32.mrb[82].mxu0 }
 0x1e5   :  { %v2558_v36 = vpop.f32.mrb[83].mxu0 }
 0x1e6   :  { %v2594_v12 = vpop.f32.mrb[80].mxu1 }
 0x1e7   :  { %v2604_v37 = vadd.f32 %v2594_v12, %v2415_v19  ;;  %v3261_v38 = vpop.f32.mrb[81].mxu1 }
 0x1e8   :  { %v2597_v39 = vpop.f32.mrb[82].mxu1 }
 0x1e9   :  { %v3262_v31 = vpop.f32.mrb[83].mxu1 }
 0x1ea   :  { %v2701_v41 = vpop.f32.mrb[84].mxu0 }
 0x1eb   :  { %v2789_v44 = vadd.f32 %v2701_v41, %v2600_v26  ;;  %v2703_v46 = vpop.f32.mrb[85].mxu0 }
 0x1ec   :  { %v2790_v47 = vadd.f32 %v2703_v46, %v2601_v28  ;;  %v2705_v42 = vpop.f32.mrb[86].mxu0 }
 0x1ed   :  { %v2706_v20 = vpop.f32.mrb[87].mxu0 }
 0x1ee   :  { %v2742_v48 = vpop.f32.mrb[84].mxu1 }
 0x1ef   :  { %v2791_v49 = vadd.f32 %v2742_v48, %v2602_v32  ;;  %v2744_v23 = vpop.f32.mrb[85].mxu1 }
 0x1f0   :  { %v2792_v51 = vadd.f32 %v2744_v23, %v2603_v34  ;;  %v2746_v52 = vpop.f32.mrb[86].mxu1 }
 0x1f1   :  { %v2747_v53 = vpop.f32.mrb[87].mxu1 }
 0x1f2   :  { %v2783_v54 = vpop.f32.mrb[88].mxu0 }
 0x1f3   :  { %v2793_v40 = vadd.f32 %v2783_v54, %v2604_v37  ;;  %v3267_v55 = vpop.f32.mrb[89].mxu0 }
 0x1f4   :  { %v2786_v57 = vpop.f32.mrb[90].mxu0 }
 0x1f5   :  { %v3268_v45 = vpop.f32.mrb[91].mxu0 }
 0x1f6   :  { %v2890_v58 = vpop.f32.mrb[88].mxu1 }
 0x1f7   :  { %v2978_v61 = vadd.f32 %v2890_v58, %v2789_v44  ;;  %v2892_v50 = vpop.f32.mrb[89].mxu1 }
 0x1f8   :  { %v2979_v43 = vadd.f32 %v2892_v50, %v2790_v47  ;;  %v2894_v62 = vpop.f32.mrb[90].mxu1 }
 0x1f9   :  { %v2989_v56 = vadd.f32 %v2987_v59, %v2978_v61  ;;  %v2895_v63 = vpop.f32.mrb[91].mxu1 }
 0x1fa   :  { %v2990_v0 = vadd.f32 %v2987_v59, %v2979_v43  ;;  %v2931_v1 = vpop.f32.mrb[92].mxu0 }
 0x1fb   :  { %vm2994_vm7 = vcmp.gt.f32.partialorder %v2989_v56, 0.0  ;;  %v2999_v2 = vmul.f32 0.2, %v2989_v56  ;;  %v2980_v3 = vadd.f32 %v2931_v1, %v2791_v49  ;;  %v2933_v60 = vpop.f32.mrb[93].mxu0 }
 0x1fc   :  { %vm2995_vm8 = vcmp.gt.f32.partialorder %v2990_v0, 0.0  ;;  %v3000_v4 = vmul.f32 0.2, %v2990_v0  ;;  %v2981_v5 = vadd.f32 %v2933_v60, %v2792_v51  ;;  %v2935_v6 = vpop.f32.mrb[94].mxu0 }
 0x1fd   :  { %v3004_v7 = vsel %vm2994_vm7, %v2989_v56, %v2999_v2  ;;  %v2991_v8 = vadd.f32 %v2987_v59, %v2980_v3  ;;  %v2936_v9 = vpop.f32.mrb[95].mxu0 }
 0x1fe   :  { %v3005_v10 = vsel %vm2995_vm8, %v2990_v0, %v3000_v4  ;;  %v2992_v11 = vadd.f32 %v2987_v59, %v2981_v5  ;;  %v2972_v13 = vpop.f32.mrb[92].mxu1 }
 0x1ff   :  { %v3144_v14 = vpack.c.bf16 %v3005_v10, %v3004_v7  ;;  %vm2996_vm9 = vcmp.gt.f32.partialorder %v2991_v8, 0.0  ;;  %v3001_v15 = vmul.f32 0.2, %v2991_v8  ;;  %v2982_v16 = vadd.f32 %v2972_v13, %v2793_v40  ;;  %v3273_v18 = vpop.f32.mrb[93].mxu1 }
 0x200   :  { %vm2997_vm10 = vcmp.gt.f32.partialorder %v2992_v11, 0.0  ;;  %v3002_v19 = vmul.f32 0.2, %v2992_v11  ;;  %v2975_v21 = vpop.f32.mrb[94].mxu1 }
 0x201   :  { %v3006_v22 = vsel %vm2996_vm9, %v2991_v8, %v3001_v15  ;;  %3030 = vst [vmem:[%s4012_s3] sm:$0xff] %v3144_v14  ;;  %v2993_v24 = vadd.f32 %v2987_v59, %v2982_v16  ;;  %v3274_v25 = vpop.f32.mrb[95].mxu1 }
 0x202   :  { %v3007_v26 = vsel %vm2997_vm10, %v2992_v11, %v3002_v19 }
 0x203   :  { %v3145_v27 = vpack.c.bf16 %v3007_v26, %v3006_v22  ;;  %vm2998_vm11 = vcmp.gt.f32.partialorder %v2993_v24, 0.0  ;;  %v3003_v28 = vmul.f32 0.2, %v2993_v24 }
 0x205   :  { %3031 = vst [vmem:[%s4012_s3 + $0x8] sm:$0xff] %v3145_v27  ;;  %v3008_v29 = vsel %vm2998_vm11, %v2993_v24, %v3003_v28 }
 0x206   :  { %v3146_v30 = vpack.c.bf16 %v3008_v29, %v3008_v29 }
 0x208   :  { %3033 = vst.msk [vmem:[%s4012_s3 + $0x10] sm:$0xf] %vm3032_vm12, %v3146_v30 }

// kernel: _lambda_.6
= control target key start
LH: loop header
LB: loop body
LE: loop exit
PB: predicated region body
PF: predicated region fallthrough
CT: control target
= control target key end

     0   :  { %vm43_vm0 = vcmask 1043456   ;;  %v1436_v2 = vmov 0   ;;  %s1437_s22 = smov 119   ;;  %vm39_vm1 = vcmask 64512   ;;  %s1438_s25 = smov 127   ;;  %vm586_vm2 = vcmask 973824   ;;  %s1654_s1 = inlined_call_operand.vmem [shape: bf16[4,8,162], index: 1, kind: input, shape index: {}]   ;;  %s1655_s0 = inlined_call_operand.vmem [shape: bf16[16,16,8], index: 0, kind: input, shape index: {}]   ;;  %s1656_s4 = inlined_call_operand.vmem [shape: f32[1,152], index: 4, kind: input, shape index: {}]   ;;  %s1657_s2 = inlined_call_operand.vmem [shape: f32[16,1], index: 2, kind: input, shape index: {}]   ;;  %s1658_s3 = inlined_call_operand.vmem [shape: f32[16,1], index: 3, kind: input, shape index: {}]   ;;  %s1659_s5 = inlined_call_operand.vmem [shape: bf16[16,152], index: 5, kind: output, shape index: {}]  }
   0x1   :  { %v1251_v0 = vld [vmem:[%s1654_s1 + $0x8] sm:$0xff]  ;;  %v23_v1 = vld [vmem:[%s1654_s1] sm:$0xff]  ;;  %82 = vmatprep.mubr.bf16.mxu1 %v1436_v2  ;;  %629 = vmatprep.mubr.bf16.mxu0 %v1436_v2  ;;  %s1439_s26 = smov 118   ;;  %v1274_v11 = vld [vmem:[%s1654_s1 + $0x10] sm:$0xff]  ;;  %vm167_vm3 = vcmask 1039360   ;;  %vm725_vm4 = vcmask 965632  }
   0x2   :  { %v1253_v3 = vcombine.low %v1251_v0, %v1251_v0  ;;  %v1258_v4 = vcombine.low %v23_v1, %v23_v1  ;;  %1406 = vset.pattern.permute.xlu1 %v1436_v2  ;;  %v1254_v5 = vcombine.high %v1251_v0, %v1251_v0  ;;  %1407 = vset.pattern.permute.xlu0 %v1436_v2  ;;  %v1416_v8 = vld [vmem:[%s1655_s0 + $0x8] sm:$0xff]   ;;  %v1417_v10 = vld [vmem:[%s1655_s0] sm:$0xff]   ;;  %v1282_v14 = vld [vmem:[%s1654_s1 + $0x18] sm:$0xff]  ;;  %vm1144_vm5 = vcmask 195584  }
   0x3   :  { %v1259_v6 = vcombine.high %v23_v1, %v23_v1  ;;  %v1277_v12 = vcombine.high %v1274_v11, %v1274_v11  ;;  %v1276_v13 = vcombine.low %v1274_v11, %v1274_v11  ;;  %v1506_v15 = vcombine.high %v1282_v14, %v1282_v14  ;;  %v1418_v24 = vld [vmem:[%s1655_s0 + $0x40] sm:$0xff]   ;;  %v1419_v30 = vld [vmem:[%s1655_s0 + $0x10] sm:$0xff]   ;;  %v1420_v38 = vld [vmem:[%s1655_s0 + $0x48] sm:$0xff]  }
   0x4   :  { %652 = vrot.lane.b32.xlu1 %v1253_v3, %s1437_s22  ;;  %582 = vrot.lane.b32.xlu0 %v1258_v4, %s1437_s22  ;;  %v45_v7 = vsel %vm43_vm0, %v1253_v3, 0  ;;  %v107_v9 = vsel %vm43_vm0, %v1258_v4, 0  ;;  %v1508_v16 = vcombine.low %v1282_v14, %v1282_v14  ;;  %v1421_v41 = vld [vmem:[%s1655_s0 + $0x18] sm:$0xff]   ;;  %v1422_v46 = vld [vmem:[%s1655_s0 + $0x50] sm:$0xff]   ;;  %vm1241_vm6 = vcmask 195588  }
   0x5   :  { %1255 = vmatprep.subr.msk.bf16.mxu1 %vm43_vm0, %v1254_v5  ;;  %v313_v42 = vsel %vm43_vm0, %v1276_v13, 0  ;;  %v1423_v50 = vld [vmem:[%s1655_s0 + $0x20] sm:$0xff]   ;;  %v1424_v55 = vld [vmem:[%s1655_s0 + $0x58] sm:$0xff]   ;;  %v1425_v60 = vld [vmem:[%s1655_s0 + $0x28] sm:$0xff]  }
   0x6   :  { %51 = vmatpush1.bf16.msra.mxu1 %v45_v7  ;;  %v384_v51 = vsel %vm43_vm0, %v1508_v16, 0  ;;  %v1426_v1 = vld [vmem:[%s1655_s0 + $0x60] sm:$0xff]   ;;  %vm1242_vm9 = vmor %vm1241_vm6, %vm43_vm0 }
   0x7   :  { %1260 = vmatprep.subr.msk.bf16.mxu1 %vm43_vm0, %v1259_v6 }
   0x8   :  { %654 = vrot.lane.b32.xlu1 %v1254_v5, %s1437_s22  ;;  %584 = vrot.lane.b32.xlu0 %v1259_v6, %s1437_s22 }
   0x9   :  { %1256 = vmatmul.mubr.msk.bf16.vlgmr.msra.gmra.mrb[0].mxu1 %vm39_vm1, %v1416_v8 }
   0xa   :  { %113 = vmatpush1.bf16.msra.mxu1 %v107_v9  ;;  %144 = vmatprep.mubr.bf16.mxu1 %v1436_v2  ;;  %v1428_v9 = vld [vmem:[%s1655_s0 + $0x68] sm:$0xff]  }
   0xc   :  { %165 = vrot.lane.b32.xlu1 %v1259_v6, %s1438_s25  ;;  %163 = vrot.lane.b32.xlu0 %v1258_v4, %s1438_s25 }
  0x10   :  { %723 = vrot.lane.b32.xlu1 %v1259_v6, %s1439_s26  ;;  %721 = vrot.lane.b32.xlu0 %v1258_v4, %s1439_s26  ;;  %v1427_v6 = vld [vmem:[%s1655_s0 + $0x30] sm:$0xff]  }
  0x14   :  { %235 = vrot.lane.b32.xlu1 %v1254_v5, %s1438_s25  ;;  %233 = vrot.lane.b32.xlu0 %v1253_v3, %s1438_s25 }
  0x15   :  { %1261 = vmatmul.mubr.msk.bf16.vlgmr.msra.gmra.mrb[0].mxu1 %vm39_vm1, %v1417_v10 }
  0x16   :  { %210 = vmatprep.mubr.bf16.mxu1 %v1436_v2 }
  0x18   :  { %793 = vrot.lane.b32.xlu1 %v1254_v5, %s1439_s26  ;;  %791 = vrot.lane.b32.xlu0 %v1253_v3, %s1439_s26 }
  0x1c   :  { %862 = vrot.lane.b32.xlu1 %v1277_v12, %s1437_s22  ;;  %860 = vrot.lane.b32.xlu0 %v1276_v13, %s1437_s22 }
  0x20   :  { %931 = vrot.lane.b32.xlu1 %v1506_v15, %s1437_s22  ;;  %929 = vrot.lane.b32.xlu0 %v1508_v16, %s1437_s22 }
  0x24   :  { %446 = vrot.lane.b32.xlu1 %v1277_v12, %s1438_s25  ;;  %444 = vrot.lane.b32.xlu0 %v1276_v13, %s1438_s25 }
  0x28   :  { %1000 = vrot.lane.b32.xlu1 %v1277_v12, %s1439_s26  ;;  %998 = vrot.lane.b32.xlu0 %v1276_v13, %s1439_s26 }
  0x2c   :  { %515 = vrot.lane.b32.xlu1 %v1506_v15, %s1438_s25  ;;  %513 = vrot.lane.b32.xlu0 %v1508_v16, %s1438_s25 }
  0x30   :  { %1069 = vrot.lane.b32.xlu1 %v1506_v15, %s1439_s26  ;;  %1067 = vrot.lane.b32.xlu0 %v1508_v16, %s1439_s26 }
  0x76   :  { %v653_v17 = vpop.permute.xlu1 %652  ;;  %v583_v18 = vpop.permute.xlu0 %582 }
  0x7a   :  { %v655_v19 = vpop.permute.xlu1 %654  ;;  %v585_v20 = vpop.permute.xlu0 %584 }
  0x7b   :  { %v656_v21 = vsel %vm586_vm2, %v653_v17, %v655_v19  ;;  %1301 = vmatprep.subr.msk.bf16.mxu0 %vm43_vm0, %v585_v20  ;;  %v587_v22 = vsel %vm586_vm2, %v583_v18, %v585_v20  ;;  %v1431_v17 = vld [vmem:[%s1655_s0 + $0x78] sm:$0xff]  }
  0x7c   :  { %v592_v23 = vsel %vm43_vm0, %v587_v22, 0  ;;  %v661_v25 = vsel %vm43_vm0, %v656_v21, 0  ;;  %v1130_v22 = vlaneseq }
  0x7d   :  { %598 = vmatpush1.bf16.msra.mxu0 %v592_v23 }
  0x7e   :  { %v166_v26 = vpop.permute.xlu1 %165  ;;  %v164_v27 = vpop.permute.xlu0 %163  ;;  %1306 = vmatprep.subr.msk.bf16.mxu0 %vm43_vm0, %v655_v19  ;;  %v1131_v23 = vshrl.u32 %v1130_v22, 7 }
  0x7f   :  { %v168_v28 = vsel %vm167_vm3, %v164_v27, %v166_v26  ;;  %1265 = vmatprep.subr.msk.bf16.mxu1 %vm43_vm0, %v166_v26 }
  0x80   :  { %v173_v29 = vsel %vm43_vm0, %v168_v28, 0  ;;  %1302 = vmatmul.mubr.msk.bf16.vlgmr.msra.gmra.mrb[0].mxu0 %vm39_vm1, %v1418_v24  ;;  %v1136_v24 = vsub.s32 1, %v1131_v23  ;;  %v1132_v26 = vsub.s32 0, %v1131_v23 }
  0x81   :  { %179 = vmatpush1.bf16.msra.mxu1 %v173_v29  ;;  %667 = vmatpush1.bf16.msra.mxu0 %v661_v25  ;;  %v1128_v25 = vld [vmem:[%s1656_s4] sm:$0x3] }
  0x82   :  { %v724_v31 = vpop.permute.xlu1 %723  ;;  %v722_v32 = vpop.permute.xlu0 %721  ;;  %698 = vmatprep.mubr.bf16.mxu0 %v1436_v2  ;;  %v1133_v29 = vrot.slane %v1128_v25, %v1132_v26 }
  0x83   :  { %1311 = vmatprep.subr.msk.bf16.mxu0 %vm43_vm0, %v724_v31  ;;  %v726_v35 = vsel %vm725_vm4, %v722_v32, %v724_v31 }
  0x84   :  { %1266 = vmatmul.mubr.msk.bf16.vlgmr.msra.gmra.mrb[0].mxu1 %vm39_vm1, %v1419_v30  ;;  %v731_v39 = vsel %vm43_vm0, %v726_v35, 0 }
  0x85   :  { %279 = vmatprep.mubr.bf16.mxu1 %v1436_v2 }
  0x86   :  { %v236_v33 = vpop.permute.xlu1 %235  ;;  %v234_v34 = vpop.permute.xlu0 %233 }
  0x87   :  { %v237_v36 = vsel %vm167_vm3, %v234_v34, %v236_v33  ;;  %1270 = vmatprep.subr.msk.bf16.mxu1 %vm43_vm0, %v236_v33 }
  0x88   :  { %v242_v37 = vsel %vm43_vm0, %v237_v36, 0 }
  0x89   :  { %248 = vmatpush1.bf16.msra.mxu1 %v242_v37 }
  0x8a   :  { %1278 = vmatprep.subr.msk.bf16.mxu1 %vm43_vm0, %v1277_v12  ;;  %v794_v40 = vpop.permute.xlu1 %793  ;;  %v792_v44 = vpop.permute.xlu0 %791  ;;  %v1429_v12 = vld [vmem:[%s1655_s0 + $0x38] sm:$0xff]  }
  0x8b   :  { %v795_v45 = vsel %vm725_vm4, %v792_v44, %v794_v40  ;;  %v1185_v44 = vld [vmem:[%s1657_s2] sm:$0xff] }
  0x8c   :  { %1307 = vmatmul.mubr.msk.bf16.vlgmr.msra.gmra.mrb[0].mxu0 %vm39_vm1, %v1420_v38  ;;  %v800_v49 = vsel %vm43_vm0, %v795_v45, 0  ;;  %v1201_v45 = vld [vmem:[%s1658_s3] sm:$0xff] }
  0x8d   :  { %737 = vmatpush1.bf16.msra.mxu0 %v731_v39  ;;  %768 = vmatprep.mubr.bf16.mxu0 %v1436_v2 }
  0x8e   :  { %1316 = vmatprep.subr.msk.bf16.mxu0 %vm43_vm0, %v794_v40  ;;  %v863_v43 = vpop.permute.xlu1 %862  ;;  %v861_v47 = vpop.permute.xlu0 %860 }
  0x8f   :  { %v864_v54 = vsel %vm586_vm2, %v861_v47, %v863_v43 }
  0x90   :  { %1271 = vmatmul.mubr.msk.bf16.vlgmr.msra.gmra.mrb[0].mxu1 %vm39_vm1, %v1421_v41  ;;  %v869_v58 = vsel %vm43_vm0, %v864_v54, 0 }
  0x91   :  { %319 = vmatpush1.bf16.msra.mxu1 %v313_v42  ;;  %350 = vmatprep.mubr.bf16.mxu1 %v1436_v2 }
  0x92   :  { %1286 = vmatprep.subr.msk.bf16.mxu1 %vm43_vm0, %v1506_v15  ;;  %v932_v48 = vpop.permute.xlu1 %931  ;;  %v930_v52 = vpop.permute.xlu0 %929  ;;  %v1430_v15 = vld [vmem:[%s1655_s0 + $0x70] sm:$0xff]  }
  0x93   :  { %v933_v0 = vsel %vm586_vm2, %v930_v52, %v932_v48 }
  0x94   :  { %v938_v4 = vsel %vm43_vm0, %v933_v0, 0 }
  0x96   :  { %v447_v53 = vpop.permute.xlu1 %446  ;;  %v445_v56 = vpop.permute.xlu0 %444 }
  0x97   :  { %v448_v59 = vsel %vm167_vm3, %v445_v56, %v447_v53 }
  0x98   :  { %1312 = vmatmul.mubr.msk.bf16.vlgmr.msra.gmra.mrb[0].mxu0 %vm39_vm1, %v1422_v46  ;;  %v453_v61 = vsel %vm43_vm0, %v448_v59, 0  ;;  %v1202_v46 = vld [vmem:[%s1658_s3 + $0x8] sm:$0xff] }
  0x99   :  { %806 = vmatpush1.bf16.msra.mxu0 %v800_v49  ;;  %837 = vmatprep.mubr.bf16.mxu0 %v1436_v2 }
  0x9a   :  { %1321 = vmatprep.subr.msk.bf16.mxu0 %vm43_vm0, %v863_v43  ;;  %v1001_v57 = vpop.permute.xlu1 %1000  ;;  %v999_v62 = vpop.permute.xlu0 %998 }
  0x9b   :  { %v1002_v8 = vsel %vm725_vm4, %v999_v62, %v1001_v57 }
  0x9c   :  { %1279 = vmatmul.mubr.msk.bf16.vlgmr.msra.gmra.mrb[0].mxu1 %vm39_vm1, %v1423_v50  ;;  %v1007_v10 = vsel %vm43_vm0, %v1002_v8, 0 }
  0x9d   :  { %390 = vmatpush1.bf16.msra.mxu1 %v384_v51  ;;  %421 = vmatprep.mubr.bf16.mxu1 %v1436_v2 }
  0x9e   :  { %1291 = vmatprep.subr.msk.bf16.mxu1 %vm43_vm0, %v447_v53  ;;  %v516_v63 = vpop.permute.xlu1 %515  ;;  %v514_v3 = vpop.permute.xlu0 %513 }
  0x9f   :  { %v517_v5 = vsel %vm167_vm3, %v514_v3, %v516_v63 }
  0xa0   :  { %v522_v7 = vsel %vm43_vm0, %v517_v5, 0 }
  0xa2   :  { %v1070_v11 = vpop.permute.xlu1 %1069  ;;  %v1068_v13 = vpop.permute.xlu0 %1067 }
  0xa3   :  { %v1071_v14 = vsel %vm725_vm4, %v1068_v13, %v1070_v11 }
  0xa4   :  { %1317 = vmatmul.mubr.msk.bf16.vlgmr.msra.gmra.mrb[0].mxu0 %vm39_vm1, %v1424_v55  ;;  %v1076_v16 = vsel %vm43_vm0, %v1071_v14, 0 }
  0xa5   :  { %875 = vmatpush1.bf16.msra.mxu0 %v869_v58  ;;  %906 = vmatprep.mubr.bf16.mxu0 %v1436_v2 }
  0xa6   :  { %1326 = vmatprep.subr.msk.bf16.mxu0 %vm43_vm0, %v932_v48 }
  0xa8   :  { %1287 = vmatmul.mubr.msk.bf16.vlgmr.msra.gmra.mrb[0].mxu1 %vm39_vm1, %v1425_v60 }
  0xa9   :  { %459 = vmatpush1.bf16.msra.mxu1 %v453_v61  ;;  %490 = vmatprep.mubr.bf16.mxu1 %v1436_v2 }
  0xaa   :  { %1296 = vmatprep.subr.msk.bf16.mxu1 %vm43_vm0, %v516_v63 }
  0xb0   :  { %1322 = vmatmul.mubr.msk.bf16.vlgmr.msra.gmra.mrb[0].mxu0 %vm39_vm1, %v1426_v1 }
  0xb1   :  { %944 = vmatpush1.bf16.msra.mxu0 %v938_v4  ;;  %975 = vmatprep.mubr.bf16.mxu0 %v1436_v2  ;;  %v1186_v4 = vld [vmem:[%s1657_s2 + $0x8] sm:$0xff] }
  0xb2   :  { %1331 = vmatprep.subr.msk.bf16.mxu0 %vm43_vm0, %v1001_v57 }
  0xb4   :  { %1292 = vmatmul.mubr.msk.bf16.vlgmr.msra.gmra.mrb[0].mxu1 %vm39_vm1, %v1427_v6 }
  0xb5   :  { %528 = vmatpush1.bf16.msra.mxu1 %v522_v7  ;;  %559 = vmatprep.mubr.bf16.mxu1 %v1436_v2 }
  0xbc   :  { %1327 = vmatmul.mubr.msk.bf16.vlgmr.msra.gmra.mrb[0].mxu0 %vm39_vm1, %v1428_v9 }
  0xbd   :  { %1013 = vmatpush1.bf16.msra.mxu0 %v1007_v10  ;;  %1044 = vmatprep.mubr.bf16.mxu0 %v1436_v2 }
  0xbe   :  { %1336 = vmatprep.subr.msk.bf16.mxu0 %vm43_vm0, %v1070_v11 }
  0xc0   :  { %1297 = vmatmul.mubr.msk.bf16.vlgmr.msra.gmra.mrb[0].mxu1 %vm39_vm1, %v1429_v12 }
  0xc8   :  { %1332 = vmatmul.mubr.msk.bf16.vlgmr.msra.gmra.mrb[0].mxu0 %vm39_vm1, %v1430_v15 }
  0xc9   :  { %1082 = vmatpush1.bf16.msra.mxu0 %v1076_v16  ;;  %1113 = vmatprep.mubr.bf16.mxu0 %v1436_v2  ;;  %v1137_v2 = vrot.slane %v1128_v25, %v1136_v24 }
  0xd4   :  { %1337 = vmatmul.mubr.msk.bf16.vlgmr.msra.gmra.mrb[0].mxu0 %vm39_vm1, %v1431_v17 }
 0x193   :  { %v561_v18 = vpop.f32.mrb[0].mxu1 }
 0x194   :  { %v563_v19 = vpop.f32.mrb[1].mxu1 }
 0x195   :  { %v565_v20 = vpop.f32.mrb[2].mxu1 }
 0x196   :  { %v567_v21 = vpop.f32.mrb[3].mxu1 }
 0x1a7   :  { %v1115_v27 = vpop.f32.mrb[0].mxu0 }
 0x1a8   :  { %v1342_v28 = vadd.f32 %v1115_v27, %v561_v18  ;;  %v1117_v30 = vpop.f32.mrb[1].mxu0 }
 0x1a9   :  { %v1343_v31 = vadd.f32 %v1117_v30, %v563_v19  ;;  %v1119_v32 = vpop.f32.mrb[2].mxu0 }
 0x1aa   :  { %v1344_v33 = vadd.f32 %v1119_v32, %v565_v20  ;;  %v1121_v34 = vpop.f32.mrb[3].mxu0  ;;  %v1140_v37 = vmul.f32 %v1342_v28, %v1133_v29 }
 0x1ab   :  { %v1141_v35 = vmul.f32 %v1343_v31, %v1137_v2  ;;  %v1345_v36 = vadd.f32 %v1121_v34, %v567_v21 }
 0x1ac   :  { %v1142_v40 = vmul.f32 %v1344_v33, %v1133_v29 }
 0x1ad   :  { %v1143_v38 = vmul.f32 %v1345_v36, %v1137_v2  ;;  %v1145_v39 = vsel %vm1144_vm5, %v1141_v35, 0.0 }
 0x1ae   :  { %v1146_v41 = vadd.f32 %v1145_v39, %v1140_v37 }
 0x1af   :  { %v1149_v42 = vsel %vm1144_vm5, %v1143_v38, 0.0 }
 0x1b0   :  { %1147 = vadd.xlane.f32.xlu0 %v1146_v41  ;;  %v1150_v43 = vadd.f32 %v1149_v42, %v1142_v40 }
 0x1b2   :  { %1151 = vadd.xlane.f32.xlu1 %v1150_v43 }
 0x1c3   :  { %1189 = vperm.xlu1 %1406, %v1185_v44  }
 0x1c7   :  { %1205 = vperm.xlu1 %1406, %v1201_v45  }
 0x1cb   :  { %1210 = vperm.xlu1 %1406, %v1202_v46  }
 0x23d   :  { %v1148_v47 = vpop.xlane.xlu0 %1147 }
 0x23e   :  { %v1153_v48 = vmul.f32 0.0078125, %v1148_v47 }
 0x23f   :  { %v1152_v49 = vpop.xlane.xlu1 %1151 }
 0x240   :  { %v1155_v50 = vsub.f32 %v1342_v28, %v1153_v48  ;;  %v1156_v51 = vsub.f32 %v1343_v31, %v1153_v48  ;;  %v1154_v52 = vmul.f32 0.0078125, %v1152_v49 }
 0x242   :  { %v1159_v53 = vmul.f32 %v1155_v50, %v1155_v50  ;;  %v1160_v54 = vmul.f32 %v1156_v51, %v1156_v51  ;;  %v1157_v55 = vsub.f32 %v1344_v33, %v1154_v52  ;;  %v1158_v56 = vsub.f32 %v1345_v36, %v1154_v52 }
 0x243   :  { %v1190_v11 = vpop.permute.xlu1 %1189 }
 0x244   :  { %v1161_v57 = vmul.f32 %v1157_v55, %v1157_v55  ;;  %v1162_v58 = vmul.f32 %v1158_v56, %v1158_v56  ;;  %v1163_v59 = vmul.f32 %v1159_v53, %v1133_v29  ;;  %v1164_v60 = vmul.f32 %v1160_v54, %v1137_v2 }
 0x246   :  { %v1167_v61 = vsel %vm1144_vm5, %v1164_v60, 0.0  ;;  %v1166_v62 = vmul.f32 %v1162_v58, %v1137_v2  ;;  %v1165_v0 = vmul.f32 %v1161_v57, %v1133_v29 }
 0x247   :  { %v1168_v63 = vadd.f32 %v1167_v61, %v1163_v59  ;;  %v1206_v17 = vpop.permute.xlu1 %1205 }
 0x248   :  { %v1171_v1 = vsel %vm1144_vm5, %v1166_v62, 0.0 }
 0x249   :  { %1169 = vadd.xlane.f32.xlu0 %v1168_v63  ;;  %v1172_v3 = vadd.f32 %v1171_v1, %v1165_v0 }
 0x24b   :  { %v1211_v29 = vpop.permute.xlu1 %1210 }
 0x24d   :  { %1173 = vadd.xlane.f32.xlu0 %v1172_v3 }
 0x263   :  { %1194 = vperm.xlu0 %1407, %v1186_v4  }
 0x2d6   :  { %v1170_v5 = vpop.xlane.xlu0 %1169 }
 0x2d7   :  { %v1175_v6 = vmul.f32 0.0078125, %v1170_v5 }
 0x2d9   :  { %v1177_v7 = vadd.f32 1e-05, %v1175_v6 }
 0x2da   :  { %v1174_v8 = vpop.xlane.xlu0 %1173 }
 0x2db   :  { %1432 = vrsqrt.f32 %v1177_v7  ;;  %v1176_v9 = vmul.f32 0.0078125, %v1174_v8 }
 0x2dd   :  { %v1178_v10 = vadd.f32 1e-05, %v1176_v9 }
 0x2df   :  { %1434 = vrsqrt.f32 %v1178_v10 }
 0x2e2   :  { %v1195_v23 = vpop.permute.xlu0 %1194 }
 0x2e5   :  { %v1433_v12 = vpop.eup %1432 }
 0x2e6   :  { %v1181_v13 = vmul.f32 %v1433_v12, %v1155_v50  ;;  %v1182_v14 = vmul.f32 %v1433_v12, %v1156_v51 }
 0x2e8   :  { %v1197_v15 = vmul.f32 %v1190_v11, %v1181_v13  ;;  %v1198_v16 = vmul.f32 %v1190_v11, %v1182_v14 }
 0x2e9   :  { %v1435_v18 = vpop.eup %1434 }
 0x2ea   :  { %v1213_v19 = vadd.f32 %v1206_v17, %v1197_v15  ;;  %v1214_v20 = vadd.f32 %v1206_v17, %v1198_v16  ;;  %v1183_v21 = vmul.f32 %v1435_v18, %v1157_v55  ;;  %v1184_v22 = vmul.f32 %v1435_v18, %v1158_v56 }
 0x2ec   :  { %vm1217_vm7 = vcmp.gt.f32.partialorder %v1213_v19, 0.0  ;;  %vm1218_vm8 = vcmp.gt.f32.partialorder %v1214_v20, 0.0  ;;  %v1221_v24 = vmul.f32 0.2, %v1213_v19  ;;  %v1222_v25 = vmul.f32 0.2, %v1214_v20 }
 0x2ed   :  { %v1199_v26 = vmul.f32 %v1195_v23, %v1183_v21  ;;  %v1200_v27 = vmul.f32 %v1195_v23, %v1184_v22 }
 0x2ee   :  { %v1225_v2 = vsel %vm1217_vm7, %v1213_v19, %v1221_v24  ;;  %v1226_v28 = vsel %vm1218_vm8, %v1214_v20, %v1222_v25 }
 0x2ef   :  { %v1340_v30 = vpack.c.bf16 %v1226_v28, %v1225_v2  ;;  %v1215_v31 = vadd.f32 %v1211_v29, %v1199_v26  ;;  %v1216_v32 = vadd.f32 %v1211_v29, %v1200_v27 }
 0x2f1   :  { %1243 = vst.msk [vmem:[%s1659_s5] sm:$0xff] %vm1242_vm9, %v1340_v30  ;;  %vm1219_vm10 = vcmp.gt.f32.partialorder %v1215_v31, 0.0  ;;  %vm1220_vm11 = vcmp.gt.f32.partialorder %v1216_v32, 0.0  ;;  %v1223_v33 = vmul.f32 0.2, %v1215_v31 }
 0x2f2   :  { %v1224_v34 = vmul.f32 0.2, %v1216_v32 }
 0x2f3   :  { %v1227_v35 = vsel %vm1219_vm10, %v1215_v31, %v1223_v33 }
 0x2f4   :  { %v1228_v36 = vsel %vm1220_vm11, %v1216_v32, %v1224_v34 }
 0x2f5   :  { %v1341_v37 = vpack.c.bf16 %v1228_v36, %v1227_v35 }
 0x2f7   :  { %1244 = vst.msk [vmem:[%s1659_s5 + $0x8] sm:$0xff] %vm1242_vm9, %v1341_v37 }

// kernel: _lambda_.7
= control target key start
LH: loop header
LB: loop body
LE: loop exit
PB: predicated region body
PF: predicated region fallthrough
CT: control target
= control target key end

     0   :  { %s1826_s22 = smov 127   ;;  %s1827_s23 = smov 123   ;;  %vm51_vm0 = vcmask 130048   ;;  %v1829_v48 = vmov 0   ;;  %vm1279_vm1 = vcmask 359424   ;;  %vm1420_vm4 = vcmask 355328   ;;  %s2065_s1 = inlined_call_operand.vmem [shape: bf16[4,16,50], index: 1, kind: input, shape index: {}]   ;;  %s2066_s0 = inlined_call_operand.vmem [shape: bf16[16,32,16], index: 0, kind: input, shape index: {}]   ;;  %s2067_s4 = inlined_call_operand.vmem [shape: f32[1,44], index: 4, kind: input, shape index: {}]   ;;  %s2068_s2 = inlined_call_operand.vmem [shape: f32[32,1], index: 2, kind: input, shape index: {}]   ;;  %s2069_s3 = inlined_call_operand.vmem [shape: f32[32,1], index: 3, kind: input, shape index: {}]   ;;  %s2070_s5 = inlined_call_operand.vmem [shape: bf16[32,44], index: 5, kind: output, shape index: {}]  }
   0x1   :  { %v1782_v0 = vld [vmem:[%s2065_s1] sm:$0xff]   ;;  %v1783_v1 = vld [vmem:[%s2065_s1 + $0x8] sm:$0xff]   ;;  %v1786_v2 = vld [vmem:[%s2066_s0 + $0x10] sm:$0xff]   ;;  %s1828_s26 = smov 122   ;;  %1780 = vset.pattern.permute.xlu1 %v1829_v48  ;;  %1781 = vset.pattern.permute.xlu0 %v1829_v48 }
   0x2   :  { %193 = vrot.lane.b32.xlu1 %v1782_v0, %s1826_s22  ;;  %667 = vrot.lane.b32.xlu0 %v1782_v0, %s1827_s23  ;;  %v1787_v3 = vld [vmem:[%s2066_s0 + $0x18] sm:$0xff]   ;;  %v1788_v4 = vld [vmem:[%s2066_s0] sm:$0xff]  }
   0x3   :  { %1620 = vmatprep.subr.bf16.mxu1 %v1783_v1  ;;  %1622 = vmatprep.mubr.msk.bf16.mxu1 %vm51_vm0, %v1786_v2  ;;  %v1784_v5 = vld [vmem:[%s2065_s1 + $0x10] sm:$0xff]   ;;  %v1785_v6 = vld [vmem:[%s2065_s1 + $0x18] sm:$0xff]   ;;  %v1791_v7 = vld [vmem:[%s2066_s0 + $0x80] sm:$0xff]  }
   0x4   :  { %1621 = vmatpush3.bf16.msra.mxu1 %v1783_v1  ;;  %1670 = vmatprep.mubr.msk.bf16.mxu0 %vm51_vm0, %v1791_v7  ;;  %v1789_v8 = vld [vmem:[%s2066_s0 + $0x8] sm:$0xff]   ;;  %v1790_v9 = vld [vmem:[%s2066_s0 + $0x20] sm:$0xff]   ;;  %v1794_v14 = vld [vmem:[%s2066_s0 + $0x30] sm:$0xff]  }
   0x5   :  { %1626 = vmatprep.subr.bf16.mxu1 %v1782_v0  ;;  %v1792_v12 = vld [vmem:[%s2066_s0 + $0x28] sm:$0xff]   ;;  %v1795_v15 = vld [vmem:[%s2066_s0 + $0x90] sm:$0xff]   ;;  %v1796_v19 = vld [vmem:[%s2066_s0 + $0x38] sm:$0xff]  }
   0x6   :  { %744 = vrot.lane.b32.xlu0 %v1783_v1, %s1827_s23  ;;  %821 = vrot.lane.b32.xlu1 %v1782_v0, %s1828_s26  ;;  %v1793_v13 = vld [vmem:[%s2066_s0 + $0x88] sm:$0xff]   ;;  %v1797_v20 = vld [vmem:[%s2066_s0 + $0x98] sm:$0xff]  }
   0x7   :  { %1623 = vmatmul.mubr.msk.bf16.vlgmr.msra.gmra.mrb[0].mxu1 %vm51_vm0, %v1787_v3  ;;  %v1798_v21 = vld [vmem:[%s2066_s0 + $0x40] sm:$0xff]   ;;  %v1800_v25 = vld [vmem:[%s2066_s0 + $0x48] sm:$0xff]   ;;  %v1802_v27 = vld [vmem:[%s2066_s0 + $0x50] sm:$0xff]  }
   0x8   :  { %1627 = vmatpush3.bf16.msra.mxu1 %v1782_v0  ;;  %1628 = vmatprep.mubr.msk.bf16.mxu1 %vm51_vm0, %v1788_v4  ;;  %v1799_v22 = vld [vmem:[%s2066_s0 + $0xa0] sm:$0xff]   ;;  %v1801_v26 = vld [vmem:[%s2066_s0 + $0xa8] sm:$0xff]   ;;  %v1803_v28 = vld [vmem:[%s2066_s0 + $0xb0] sm:$0xff]  }
   0x9   :  { %v1804_v30 = vld [vmem:[%s2066_s0 + $0x58] sm:$0xff]   ;;  %v1806_v32 = vld [vmem:[%s2066_s0 + $0x60] sm:$0xff]   ;;  %v1808_v36 = vld [vmem:[%s2066_s0 + $0x68] sm:$0xff]  }
   0xa   :  { %270 = vrot.lane.b32.xlu0 %v1783_v1, %s1826_s22  ;;  %898 = vrot.lane.b32.xlu1 %v1783_v1, %s1828_s26  ;;  %v1805_v31 = vld [vmem:[%s2066_s0 + $0xb8] sm:$0xff]   ;;  %v1807_v33 = vld [vmem:[%s2066_s0 + $0xc0] sm:$0xff]  }
   0xb   :  { %v1809_v37 = vld [vmem:[%s2066_s0 + $0xc8] sm:$0xff]   ;;  %v1810_v38 = vld [vmem:[%s2066_s0 + $0x70] sm:$0xff]   ;;  %v1812_v41 = vld [vmem:[%s2066_s0 + $0x78] sm:$0xff]  }
   0xc   :  { %v1811_v39 = vld [vmem:[%s2066_s0 + $0xd0] sm:$0xff]   ;;  %v1813_v42 = vld [vmem:[%s2066_s0 + $0xd8] sm:$0xff]   ;;  %v1814_v43 = vld [vmem:[%s2066_s0 + $0xe0] sm:$0xff]  }
   0xd   :  { %v1815_v45 = vld [vmem:[%s2066_s0 + $0xe8] sm:$0xff]   ;;  %v1816_v46 = vld [vmem:[%s2066_s0 + $0xf0] sm:$0xff]   ;;  %v1817_v47 = vld [vmem:[%s2066_s0 + $0xf8] sm:$0xff]  }
   0xe   :  { %975 = vrot.lane.b32.xlu0 %v1784_v5, %s1827_s23  ;;  %1052 = vrot.lane.b32.xlu1 %v1785_v6, %s1827_s23  ;;  %v1563_v54 = vld [vmem:[%s2067_s4] ss:$0 sm:$0xff] }
  0x12   :  { %513 = vrot.lane.b32.xlu0 %v1784_v5, %s1826_s22  ;;  %1129 = vrot.lane.b32.xlu1 %v1784_v5, %s1828_s26 }
  0x13   :  { %1629 = vmatmul.mubr.msk.bf16.vlgmr.msra.gmra.mrb[0].mxu1 %vm51_vm0, %v1789_v8 }
  0x14   :  { %1634 = vmatprep.mubr.msk.bf16.mxu1 %vm51_vm0, %v1790_v9 }
  0x16   :  { %590 = vrot.lane.b32.xlu0 %v1785_v6, %s1826_s22  ;;  %1206 = vrot.lane.b32.xlu1 %v1785_v6, %s1828_s26 }
  0x74   :  { %v194_v10 = vpop.permute.xlu1 %193  ;;  %v668_v11 = vpop.permute.xlu0 %667 }
  0x75   :  { %1632 = vmatprep.subr.bf16.mxu1 %v194_v10  ;;  %1668 = vmatprep.subr.bf16.mxu0 %v668_v11 }
  0x76   :  { %1633 = vmatpush3.bf16.msra.mxu1 %v194_v10  ;;  %1669 = vmatpush3.bf16.msra.mxu0 %v668_v11 }
  0x78   :  { %v745_v16 = vpop.permute.xlu0 %744  ;;  %v822_v17 = vpop.permute.xlu1 %821 }
  0x79   :  { %1635 = vmatmul.mubr.msk.bf16.vlgmr.msra.gmra.mrb[0].mxu1 %vm51_vm0, %v1792_v12  ;;  %1671 = vmatmul.mubr.msk.bf16.vlgmr.msra.gmra.mrb[0].mxu0 %vm51_vm0, %v1793_v13 }
  0x7a   :  { %1674 = vmatprep.subr.bf16.mxu0 %v745_v16  ;;  %1640 = vmatprep.mubr.msk.bf16.mxu1 %vm51_vm0, %v1794_v14 }
  0x7b   :  { %1675 = vmatpush3.bf16.msra.mxu0 %v745_v16  ;;  %1676 = vmatprep.mubr.msk.bf16.mxu0 %vm51_vm0, %v1795_v15 }
  0x7c   :  { %v271_v18 = vpop.permute.xlu0 %270  ;;  %1680 = vmatprep.subr.bf16.mxu0 %v822_v17  ;;  %v899_v23 = vpop.permute.xlu1 %898 }
  0x7d   :  { %1638 = vmatprep.subr.bf16.mxu1 %v271_v18 }
  0x7e   :  { %1639 = vmatpush3.bf16.msra.mxu1 %v271_v18 }
  0x7f   :  { %1644 = vmatprep.subr.bf16.mxu1 %v1784_v5 }
  0x80   :  { %v976_v24 = vpop.permute.xlu0 %975  ;;  %v1053_v34 = vpop.permute.xlu1 %1052 }
  0x84   :  { %v514_v29 = vpop.permute.xlu0 %513  ;;  %v1130_v40 = vpop.permute.xlu1 %1129 }
  0x85   :  { %1641 = vmatmul.mubr.msk.bf16.vlgmr.msra.gmra.mrb[0].mxu1 %vm51_vm0, %v1796_v19  ;;  %1677 = vmatmul.mubr.msk.bf16.vlgmr.msra.gmra.mrb[0].mxu0 %vm51_vm0, %v1797_v20 }
  0x86   :  { %1681 = vmatpush3.bf16.msra.mxu0 %v822_v17  ;;  %1645 = vmatpush3.bf16.msra.mxu1 %v1784_v5 }
  0x87   :  { %1646 = vmatprep.mubr.msk.bf16.mxu1 %vm51_vm0, %v1798_v21  ;;  %1682 = vmatprep.mubr.msk.bf16.mxu0 %vm51_vm0, %v1799_v22 }
  0x88   :  { %1686 = vmatprep.subr.bf16.mxu0 %v899_v23  ;;  %1650 = vmatprep.subr.bf16.mxu1 %v1785_v6  ;;  %v591_v35 = vpop.permute.xlu0 %590  ;;  %v1207_v44 = vpop.permute.xlu1 %1206 }
  0x91   :  { %1647 = vmatmul.mubr.msk.bf16.vlgmr.msra.gmra.mrb[0].mxu1 %vm51_vm0, %v1800_v25  ;;  %1683 = vmatmul.mubr.msk.bf16.vlgmr.msra.gmra.mrb[0].mxu0 %vm51_vm0, %v1801_v26 }
  0x92   :  { %1687 = vmatpush3.bf16.msra.mxu0 %v899_v23  ;;  %1651 = vmatpush3.bf16.msra.mxu1 %v1785_v6  ;;  %v1336_v6 = vld [vmem:[%s2068_s2] sm:$0xff] }
  0x93   :  { %1652 = vmatprep.mubr.msk.bf16.mxu1 %vm51_vm0, %v1802_v27  ;;  %1688 = vmatprep.mubr.msk.bf16.mxu0 %vm51_vm0, %v1803_v28 }
  0x94   :  { %1692 = vmatprep.subr.bf16.mxu0 %v976_v24  ;;  %1656 = vmatprep.subr.bf16.mxu1 %v514_v29 }
  0x9d   :  { %1653 = vmatmul.mubr.msk.bf16.vlgmr.msra.gmra.mrb[0].mxu1 %vm51_vm0, %v1804_v30  ;;  %1689 = vmatmul.mubr.msk.bf16.vlgmr.msra.gmra.mrb[0].mxu0 %vm51_vm0, %v1805_v31  ;;  %v1338_v31 = vld [vmem:[%s2068_s2 + $0x10] sm:$0xff] }
  0x9e   :  { %1693 = vmatpush3.bf16.msra.mxu0 %v976_v24  ;;  %1657 = vmatpush3.bf16.msra.mxu1 %v514_v29 }
  0x9f   :  { %1658 = vmatprep.mubr.msk.bf16.mxu1 %vm51_vm0, %v1806_v32  ;;  %1694 = vmatprep.mubr.msk.bf16.mxu0 %vm51_vm0, %v1807_v33  ;;  %v1339_v32 = vld [vmem:[%s2068_s2 + $0x18] sm:$0xff]  ;;  %v1364_v33 = vld [vmem:[%s2069_s3] sm:$0xff] }
  0xa0   :  { %1698 = vmatprep.subr.bf16.mxu0 %v1053_v34  ;;  %1662 = vmatprep.subr.bf16.mxu1 %v591_v35 }
  0xa9   :  { %1659 = vmatmul.mubr.msk.bf16.vlgmr.msra.gmra.mrb[0].mxu1 %vm51_vm0, %v1808_v36  ;;  %1695 = vmatmul.mubr.msk.bf16.vlgmr.msra.gmra.mrb[0].mxu0 %vm51_vm0, %v1809_v37  ;;  %v1366_v36 = vld [vmem:[%s2069_s3 + $0x10] sm:$0xff]  ;;  %v1367_v37 = vld [vmem:[%s2069_s3 + $0x18] sm:$0xff] }
  0xaa   :  { %1699 = vmatpush3.bf16.msra.mxu0 %v1053_v34  ;;  %1663 = vmatpush3.bf16.msra.mxu1 %v591_v35  ;;  %v1365_v34 = vld [vmem:[%s2069_s3 + $0x8] sm:$0xff] }
  0xab   :  { %1664 = vmatprep.mubr.msk.bf16.mxu1 %vm51_vm0, %v1810_v38  ;;  %1700 = vmatprep.mubr.msk.bf16.mxu0 %vm51_vm0, %v1811_v39  ;;  %v1337_v35 = vld [vmem:[%s2068_s2 + $0x8] sm:$0xff] }
  0xac   :  { %1704 = vmatprep.subr.bf16.mxu0 %v1130_v40 }
  0xb5   :  { %1665 = vmatmul.mubr.msk.bf16.vlgmr.msra.gmra.mrb[0].mxu1 %vm51_vm0, %v1812_v41  ;;  %1701 = vmatmul.mubr.msk.bf16.vlgmr.msra.gmra.mrb[0].mxu0 %vm51_vm0, %v1813_v42 }
  0xb6   :  { %1705 = vmatpush3.bf16.msra.mxu0 %v1130_v40  ;;  %1706 = vmatprep.mubr.msk.bf16.mxu0 %vm51_vm0, %v1814_v43 }
  0xb7   :  { %1710 = vmatprep.subr.bf16.mxu0 %v1207_v44 }
  0xc1   :  { %1707 = vmatmul.mubr.msk.bf16.vlgmr.msra.gmra.mrb[0].mxu0 %vm51_vm0, %v1815_v45 }
  0xc2   :  { %1711 = vmatpush3.bf16.msra.mxu0 %v1207_v44  ;;  %1712 = vmatprep.mubr.msk.bf16.mxu0 %vm51_vm0, %v1816_v46 }
  0xcd   :  { %1713 = vmatmul.mubr.msk.bf16.vlgmr.msra.gmra.mrb[0].mxu0 %vm51_vm0, %v1817_v47 }
 0x188   :  { %v1666_v49 = vpop.f32.mrb[0].mxu1 }
 0x189   :  { %v633_v50 = vpop.f32.mrb[1].mxu1 }
 0x18a   :  { %v1667_v51 = vpop.f32.mrb[2].mxu1 }
 0x18b   :  { %v636_v52 = vpop.f32.mrb[3].mxu1 }
 0x1a0   :  { %v1714_v53 = vpop.f32.mrb[0].mxu0 }
 0x1a1   :  { %v1716_v55 = vadd.f32 %v1714_v53, %v1666_v49  ;;  %v1249_v56 = vpop.f32.mrb[1].mxu0 }
 0x1a2   :  { %v1717_v57 = vadd.f32 %v1249_v56, %v633_v50  ;;  %v1715_v58 = vpop.f32.mrb[2].mxu0 }
 0x1a3   :  { %v1718_v59 = vadd.f32 %v1715_v58, %v1667_v51  ;;  %v1252_v60 = vpop.f32.mrb[3].mxu0  ;;  %v1277_v61 = vmul.f32 %v1716_v55, %v1563_v54 }
 0x1a4   :  { %v1719_v62 = vadd.f32 %v1252_v60, %v636_v52  ;;  %v1275_v0 = vmul.f32 %v1717_v57, %v1563_v54 }
 0x1a5   :  { %v1286_v63 = vsel %vm1279_vm1, %v1277_v61, 0.0  ;;  %v1278_v4 = vmul.f32 %v1718_v59, %v1563_v54 }
 0x1a6   :  { %1287 = vadd.xlane.f32.xlu0 %v1286_v63  ;;  %v1276_v1 = vmul.f32 %v1719_v62, %v1563_v54  ;;  %v1280_v3 = vsel %vm1279_vm1, %v1275_v0, 0.0 }
 0x1a7   :  { %v1289_v5 = vsel %vm1279_vm1, %v1278_v4, 0.0 }
 0x1a8   :  { %v1283_v2 = vsel %vm1279_vm1, %v1276_v1, 0.0 }
 0x1a9   :  { %1284 = vadd.xlane.f32.xlu1 %v1283_v2 }
 0x1aa   :  { %1281 = vadd.xlane.f32.xlu0 %v1280_v3 }
 0x1ae   :  { %1290 = vadd.xlane.f32.xlu0 %v1289_v5 }
 0x1ba   :  { %1342 = vperm.xlu1 %1780, %v1336_v6  }
 0x233   :  { %v1288_v7 = vpop.xlane.xlu0 %1287 }
 0x234   :  { %v1294_v8 = vmul.f32 0.03125, %v1288_v7 }
 0x236   :  { %v2014_v9 = vsub.f32 %v1716_v55, %v1294_v8  ;;  %v1285_v10 = vpop.xlane.xlu1 %1284 }
 0x237   :  { %v1282_v11 = vpop.xlane.xlu0 %1281  ;;  %v1293_v12 = vmul.f32 0.03125, %v1285_v10 }
 0x238   :  { %v1292_v13 = vmul.f32 0.03125, %v1282_v11  ;;  %v1302_v14 = vmul.f32 %v2014_v9, %v2014_v9 }
 0x239   :  { %v2018_v18 = vsub.f32 %v1719_v62, %v1293_v12 }
 0x23a   :  { %v1296_v15 = vsub.f32 %v1717_v57, %v1292_v13  ;;  %v1306_v16 = vmul.f32 %v1563_v54, %v1302_v14  ;;  %v1343_v38 = vpop.permute.xlu1 %1342 }
 0x23b   :  { %v1291_v17 = vpop.xlane.xlu0 %1290  ;;  %v1301_v26 = vmul.f32 %v2018_v18, %v2018_v18 }
 0x23c   :  { %v1295_v19 = vmul.f32 0.03125, %v1291_v17  ;;  %v1314_v20 = vsel %vm1279_vm1, %v1306_v16, 0.0  ;;  %v1300_v21 = vmul.f32 %v1296_v15, %v1296_v15 }
 0x23d   :  { %1315 = vadd.xlane.f32.xlu1 %v1314_v20  ;;  %v1305_v29 = vmul.f32 %v1563_v54, %v1301_v26 }
 0x23e   :  { %v1299_v22 = vsub.f32 %v1718_v59, %v1295_v19  ;;  %v1304_v23 = vmul.f32 %v1563_v54, %v1300_v21 }
 0x23f   :  { %v1311_v30 = vsel %vm1279_vm1, %v1305_v29, 0.0 }
 0x240   :  { %v1308_v24 = vsel %vm1279_vm1, %v1304_v23, 0.0  ;;  %v1303_v25 = vmul.f32 %v1299_v22, %v1299_v22 }
 0x241   :  { %1309 = vadd.xlane.f32.xlu1 %v1308_v24 }
 0x242   :  { %v1307_v27 = vmul.f32 %v1563_v54, %v1303_v25 }
 0x244   :  { %v1317_v28 = vsel %vm1279_vm1, %v1307_v27, 0.0 }
 0x245   :  { %1318 = vadd.xlane.f32.xlu0 %v1317_v28 }
 0x249   :  { %1312 = vadd.xlane.f32.xlu0 %v1311_v30 }
 0x252   :  { %1352 = vperm.xlu1 %1780, %v1338_v31  }
 0x256   :  { %1357 = vperm.xlu1 %1780, %v1339_v32  }
 0x25a   :  { %1370 = vperm.xlu1 %1780, %v1364_v33  }
 0x25e   :  { %1375 = vperm.xlu1 %1780, %v1365_v34  }
 0x25f   :  { %1347 = vperm.xlu0 %1781, %v1337_v35  }
 0x262   :  { %1380 = vperm.xlu1 %1780, %v1366_v36  }
 0x266   :  { %1385 = vperm.xlu1 %1780, %v1367_v37  }
 0x2ca   :  { %v1316_v39 = vpop.xlane.xlu1 %1315 }
 0x2cb   :  { %v1322_v40 = vmul.f32 0.03125, %v1316_v39 }
 0x2cd   :  { %v1326_v41 = vadd.f32 1e-05, %v1322_v40 }
 0x2ce   :  { %v1310_v42 = vpop.xlane.xlu1 %1309 }
 0x2cf   :  { %v1320_v43 = vmul.f32 0.03125, %v1310_v42  ;;  %1818 = vrsqrt.f32 %v1326_v41 }
 0x2d1   :  { %v1324_v44 = vadd.f32 1e-05, %v1320_v43 }
 0x2d2   :  { %v1319_v45 = vpop.xlane.xlu0 %1318  ;;  %v1353_v46 = vpop.permute.xlu1 %1352 }
 0x2d3   :  { %1820 = vrsqrt.f32 %v1324_v44  ;;  %v1323_v47 = vmul.f32 0.03125, %v1319_v45 }
 0x2d5   :  { %v1327_v48 = vadd.f32 1e-05, %v1323_v47 }
 0x2d6   :  { %v1313_v49 = vpop.xlane.xlu0 %1312  ;;  %v1358_v50 = vpop.permute.xlu1 %1357 }
 0x2d7   :  { %1822 = vrsqrt.f32 %v1327_v48  ;;  %v1321_v51 = vmul.f32 0.03125, %v1313_v49 }
 0x2d9   :  { %v1325_v52 = vadd.f32 1e-05, %v1321_v51  ;;  %v1819_v53 = vpop.eup %1818 }
 0x2da   :  { %v1371_v54 = vpop.permute.xlu1 %1370  ;;  %v1334_v56 = vmul.f32 %v1819_v53, %v2014_v9 }
 0x2db   :  { %1824 = vrsqrt.f32 %v1325_v52 }
 0x2dc   :  { %v1362_v61 = vmul.f32 %v1353_v46, %v1334_v56 }
 0x2dd   :  { %v1821_v55 = vpop.eup %1820 }
 0x2de   :  { %v1332_v57 = vmul.f32 %v1821_v55, %v1296_v15  ;;  %v1376_v58 = vpop.permute.xlu1 %1375  ;;  %v1348_v6 = vpop.permute.xlu0 %1347 }
 0x2e0   :  { %v1360_v59 = vmul.f32 %v1343_v38, %v1332_v57 }
 0x2e1   :  { %v1823_v60 = vpop.eup %1822 }
 0x2e2   :  { %v1335_v62 = vmul.f32 %v1823_v60, %v1299_v22  ;;  %v1388_v63 = vadd.f32 %v1371_v54, %v1360_v59  ;;  %v1381_v0 = vpop.permute.xlu1 %1380 }
 0x2e3   :  { %v1390_v1 = vadd.f32 %v1381_v0, %v1362_v61 }
 0x2e4   :  { %v1363_v2 = vmul.f32 %v1358_v50, %v1335_v62  ;;  %vm1392_vm2 = vcmp.gt.f32.partialorder %v1388_v63, 0.0  ;;  %v1396_v3 = vmul.f32 0.2, %v1388_v63 }
 0x2e5   :  { %v1825_v4 = vpop.eup %1824  ;;  %vm1394_vm3 = vcmp.gt.f32.partialorder %v1390_v1, 0.0  ;;  %v1398_v5 = vmul.f32 0.2, %v1390_v1 }
 0x2e6   :  { %v1400_v7 = vsel %vm1392_vm2, %v1388_v63, %v1396_v3  ;;  %v1386_v8 = vpop.permute.xlu1 %1385  ;;  %v1333_v9 = vmul.f32 %v1825_v4, %v2018_v18 }
 0x2e7   :  { %v1568_v10 = vpack.c.bf16 %v1400_v7, %v1400_v7  ;;  %v1402_v11 = vsel %vm1394_vm3, %v1390_v1, %v1398_v5  ;;  %v1391_v12 = vadd.f32 %v1386_v8, %v1363_v2 }
 0x2e8   :  { %v1570_v13 = vpack.c.bf16 %v1402_v11, %v1402_v11  ;;  %v1361_v14 = vmul.f32 %v1348_v6, %v1333_v9 }
 0x2e9   :  { %1421 = vst.msk [vmem:[%s2070_s5] sm:$0xf] %vm1420_vm4, %v1568_v10  ;;  %vm1395_vm5 = vcmp.gt.f32.partialorder %v1391_v12, 0.0  ;;  %v1399_v15 = vmul.f32 0.2, %v1391_v12 }
 0x2ea   :  { %1423 = vst.msk [vmem:[%s2070_s5 + $0x8] sm:$0xf] %vm1420_vm4, %v1570_v13  ;;  %v1389_v16 = vadd.f32 %v1376_v58, %v1361_v14 }
 0x2eb   :  { %v1403_v17 = vsel %vm1395_vm5, %v1391_v12, %v1399_v15 }
 0x2ec   :  { %v1571_v18 = vpack.c.bf16 %v1403_v17, %v1403_v17  ;;  %vm1393_vm6 = vcmp.gt.f32.partialorder %v1389_v16, 0.0  ;;  %v1397_v19 = vmul.f32 0.2, %v1389_v16 }
 0x2ee   :  { %1424 = vst.msk [vmem:[%s2070_s5 + $0xc] sm:$0xf] %vm1420_vm4, %v1571_v18  ;;  %v1401_v20 = vsel %vm1393_vm6, %v1389_v16, %v1397_v19 }
 0x2ef   :  { %v1569_v21 = vpack.c.bf16 %v1401_v20, %v1401_v20 }
 0x2f1   :  { %1422 = vst.msk [vmem:[%s2070_s5 + $0x4] sm:$0xf] %vm1420_vm4, %v1569_v21 }

// kernel: _lambda_.8
= control target key start
LH: loop header
LB: loop body
LE: loop exit
PB: predicated region body
PF: predicated region fallthrough
CT: control target
= control target key end

     0   :  { %s2650_s18 = smov 0   ;;  %s2652_s19 = smov 0   ;;  %s2925_s0 = inlined_call_operand.vmem [shape: bf16[16,64,32], index: 0, kind: input, shape index: {}]   ;;  %s2926_s1 = inlined_call_operand.vmem [shape: bf16[1,32,72], index: 1, kind: input, shape index: {}]   ;;  %s2927_s2 = inlined_call_operand.vmem [shape: f32[64,1], index: 2, kind: input, shape index: {}]   ;;  %s2928_s3 = inlined_call_operand.vmem [shape: f32[64,1], index: 3, kind: input, shape index: {}]   ;;  %s2929_s4 = inlined_call_operand.vmem [shape: f32[1,51], index: 4, kind: input, shape index: {}]   ;;  %s2930_s5 = inlined_call_operand.vmem [shape: bf16[64,51], index: 5, kind: output, shape index: {}]  }
   0x1   :  { %s2654_s20 = smov 0  }
   0x2 LB: > { %s2091_s21 = sadd.s32 4294967295, %s2602_s20   ;;  %s2667_s22 = sadd.s32 1, %s2602_s20   ;;  %s2602_s20 = sphi %s2654_s20, %s2933_s20   ;;  %s2598_s19 = sphi %s2652_s19, %s2932_s19   ;;  %s2594_s18 = sphi %s2650_s18, %s2931_s18  }
   0x3   : > { %s19_s23 = ssub.s32 %s2602_s20, %s2667_s22  ;;  %s22_s24 = sadd.s32 1, %s2598_s19 }
   0x4   : > { %p20_p0 = scmp.eq.s32.totalorder %s19_s23, 0  ;;  %p29_p1 = scmp.ne.s32.totalorder %s2598_s19, %s2594_s18 }
   0x5   : > { %p30_p2 = scmp.eq.s32.totalorder %s2602_s20, 0  ;;  %p2094_p4 = scmp.ge.s32.totalorder %s2602_s20, 2 }
   0x6   : > { %s2676_s25 = scalar_select %p20_p0, %s2598_s19, %s22_s24  }
   0x7   : > { %p31_p3 = por %p30_p2, %p29_p1  ;;  %181 = sbr.rel (%p2094_p4) target bundleno = 34 (0x22), region = 24 }
   0xe   : > { %184 = sbr.rel (!%p31_p3) target bundleno = 34 (0x22), region = 28  ;;  %s186_s26 = sand.u32 (%p31_p3), 1, %s2598_s19  }
   0xf   : > { %s2239_s27 = sshll.u32 (%p31_p3), %s2602_s20, 4  ;;  %s2095_s28 = sshll.u32 (%p31_p3), %s186_s26, 8 }
  0x10   : > { %s2684_s6 = scalar_lea.vmem (%p31_p3), %s2925_s0, %s2239_s27  ;;  %s2689_s7 = scalar_lea.vmem (%p31_p3), [#allocation2], %s2095_s28 }
  0x11   : > { %v207_v0 = vld [vmem:[%s2684_s6] sm:$0xff] (%p31_p3)   ;;  %v211_v1 = vld [vmem:[%s2684_s6 + $0x8] sm:$0xff] (%p31_p3)  }
  0x12   : > { %v215_v2 = vld [vmem:[%s2684_s6 + $0x20] sm:$0xff] (%p31_p3)   ;;  %208 = vst [vmem:[%s2689_s7] sm:$0xff] (%p31_p3), %v207_v0   ;;  %212 = vst [vmem:[%s2689_s7 + $0x8] sm:$0xff] (%p31_p3), %v211_v1   ;;  %v219_v3 = vld [vmem:[%s2684_s6 + $0x28] sm:$0xff] (%p31_p3)  }
  0x13   : > { %216 = vst [vmem:[%s2689_s7 + $0x10] sm:$0xff] (%p31_p3), %v215_v2   ;;  %v223_v4 = vld [vmem:[%s2684_s6 + $0x40] sm:$0xff] (%p31_p3)   ;;  %v227_v5 = vld [vmem:[%s2684_s6 + $0x48] sm:$0xff] (%p31_p3)   ;;  %220 = vst [vmem:[%s2689_s7 + $0x18] sm:$0xff] (%p31_p3), %v219_v3  }
  0x14   : > { %224 = vst [vmem:[%s2689_s7 + $0x20] sm:$0xff] (%p31_p3), %v223_v4   ;;  %228 = vst [vmem:[%s2689_s7 + $0x28] sm:$0xff] (%p31_p3), %v227_v5   ;;  %v231_v6 = vld [vmem:[%s2684_s6 + $0x60] sm:$0xff] (%p31_p3)   ;;  %v235_v7 = vld [vmem:[%s2684_s6 + $0x68] sm:$0xff] (%p31_p3)  }
  0x15   : > { %v239_v8 = vld [vmem:[%s2684_s6 + $0x80] sm:$0xff]   ;;  %232 = vst [vmem:[%s2689_s7 + $0x30] sm:$0xff] %v231_v6   ;;  %236 = vst [vmem:[%s2689_s7 + $0x38] sm:$0xff] %v235_v7   ;;  %v243_v9 = vld [vmem:[%s2684_s6 + $0x88] sm:$0xff]  }
  0x16   : > { %240 = vst [vmem:[%s2689_s7 + $0x40] sm:$0xff] %v239_v8   ;;  %v247_v10 = vld [vmem:[%s2684_s6 + $0xa0] sm:$0xff]   ;;  %v251_v11 = vld [vmem:[%s2684_s6 + $0xa8] sm:$0xff]   ;;  %244 = vst [vmem:[%s2689_s7 + $0x48] sm:$0xff] %v243_v9  }
  0x17   : > { %248 = vst [vmem:[%s2689_s7 + $0x50] sm:$0xff] %v247_v10   ;;  %252 = vst [vmem:[%s2689_s7 + $0x58] sm:$0xff] %v251_v11   ;;  %v255_v12 = vld [vmem:[%s2684_s6 + $0xc0] sm:$0xff]   ;;  %v259_v13 = vld [vmem:[%s2684_s6 + $0xc8] sm:$0xff]  }
  0x18   : > { %v263_v14 = vld [vmem:[%s2684_s6 + $0xe0] sm:$0xff]   ;;  %256 = vst [vmem:[%s2689_s7 + $0x60] sm:$0xff] %v255_v12   ;;  %260 = vst [vmem:[%s2689_s7 + $0x68] sm:$0xff] %v259_v13   ;;  %v267_v15 = vld [vmem:[%s2684_s6 + $0xe8] sm:$0xff]  }
  0x19   : > { %264 = vst [vmem:[%s2689_s7 + $0x70] sm:$0xff] %v263_v14   ;;  %v271_v16 = vld [vmem:[%s2684_s6 + $0x100] sm:$0xff]   ;;  %v275_v17 = vld [vmem:[%s2684_s6 + $0x108] sm:$0xff]   ;;  %268 = vst [vmem:[%s2689_s7 + $0x78] sm:$0xff] %v267_v15  }
  0x1a   : > { %272 = vst [vmem:[%s2689_s7 + $0x80] sm:$0xff] %v271_v16   ;;  %276 = vst [vmem:[%s2689_s7 + $0x88] sm:$0xff] %v275_v17   ;;  %v279_v18 = vld [vmem:[%s2684_s6 + $0x120] sm:$0xff]   ;;  %v283_v19 = vld [vmem:[%s2684_s6 + $0x128] sm:$0xff]  }
  0x1b   : > { %v287_v20 = vld [vmem:[%s2684_s6 + $0x140] sm:$0xff]   ;;  %280 = vst [vmem:[%s2689_s7 + $0x90] sm:$0xff] %v279_v18   ;;  %284 = vst [vmem:[%s2689_s7 + $0x98] sm:$0xff] %v283_v19   ;;  %v291_v21 = vld [vmem:[%s2684_s6 + $0x148] sm:$0xff]  }
  0x1c   : > { %288 = vst [vmem:[%s2689_s7 + $0xa0] sm:$0xff] %v287_v20   ;;  %v295_v22 = vld [vmem:[%s2684_s6 + $0x160] sm:$0xff]   ;;  %v299_v23 = vld [vmem:[%s2684_s6 + $0x168] sm:$0xff]   ;;  %292 = vst [vmem:[%s2689_s7 + $0xa8] sm:$0xff] %v291_v21  }
  0x1d   : > { %296 = vst [vmem:[%s2689_s7 + $0xb0] sm:$0xff] %v295_v22   ;;  %300 = vst [vmem:[%s2689_s7 + $0xb8] sm:$0xff] %v299_v23   ;;  %v303_v24 = vld [vmem:[%s2684_s6 + $0x180] sm:$0xff]   ;;  %v307_v25 = vld [vmem:[%s2684_s6 + $0x188] sm:$0xff]  }
  0x1e   : > { %v311_v26 = vld [vmem:[%s2684_s6 + $0x1a0] sm:$0xff]   ;;  %304 = vst [vmem:[%s2689_s7 + $0xc0] sm:$0xff] %v303_v24   ;;  %308 = vst [vmem:[%s2689_s7 + $0xc8] sm:$0xff] %v307_v25   ;;  %v315_v27 = vld [vmem:[%s2684_s6 + $0x1a8] sm:$0xff]  }
  0x1f   : > { %312 = vst [vmem:[%s2689_s7 + $0xd0] sm:$0xff] %v311_v26   ;;  %v319_v28 = vld [vmem:[%s2684_s6 + $0x1c0] sm:$0xff]   ;;  %v323_v29 = vld [vmem:[%s2684_s6 + $0x1c8] sm:$0xff]   ;;  %316 = vst [vmem:[%s2689_s7 + $0xd8] sm:$0xff] %v315_v27  }
  0x20   : > { %320 = vst [vmem:[%s2689_s7 + $0xe0] sm:$0xff] %v319_v28   ;;  %324 = vst [vmem:[%s2689_s7 + $0xe8] sm:$0xff] %v323_v29   ;;  %v327_v30 = vld [vmem:[%s2684_s6 + $0x1e0] sm:$0xff]   ;;  %v331_v31 = vld [vmem:[%s2684_s6 + $0x1e8] sm:$0xff]  }
  0x21   : > { %328 = vst [vmem:[%s2689_s7 + $0xf0] sm:$0xff] %v327_v30   ;;  %332 = vst [vmem:[%s2689_s7 + $0xf8] sm:$0xff] %v331_v31  }
  0x22 PF: > { %p2098_p5 = scmp.ge.s32.totalorder %s2602_s20, 1  ;;  %p502_p6 = scmp.lt.s32.totalorder %s2602_s20, 3 }
  0x24   : > { %p503_p7 = pnand %p2098_p5, %p502_p6 }
  0x25   : > { %v2757_v32 = vld [vmem:[%s2926_s1] sm:$0xff] (!%p503_p7)   ;;  %v2762_v33 = vld [vmem:[%s2926_s1 + $0x8] sm:$0xff] (!%p503_p7)   ;;  %s2604_s12 = smov (!%p503_p7), 127   ;;  %s2605_s13 = smov (!%p503_p7), 116   ;;  %vm605_vm0 = vcmask (!%p503_p7), 261120   ;;  %vm1859_vm1 = vcmask (!%p503_p7), 416768  }
  0x26   : > { %506 = sbr.rel (%p503_p7) target bundleno = 798 (0x31e), region = 77  ;;  %599 = vrot.lane.b32.xlu0 (!%p503_p7), %v2757_v32, %s2604_s12  ;;  %601 = vrot.lane.b32.xlu1 (!%p503_p7), %v2762_v33, %s2604_s12  ;;  %s509_s14 = sand.u32 (!%p503_p7), 1, %s2594_s18   ;;  %vm2000_vm3 = vcmask (!%p503_p7), 412672  }
  0x27   : > { %s2099_s15 = sshll.u32 (!%p503_p7), %s509_s14, 8  ;;  %s2606_s16 = smov (!%p503_p7), 115  }
  0x28   : > { %s2771_s17 = scalar_lea.vmem (!%p503_p7), [#allocation2], %s2099_s15  ;;  %s2607_s23 = smov (!%p503_p7), 126  }
  0x29   : > { %v2540_v34 = vld [vmem:[%s2771_s17 + $0x10] sm:$0xff] (!%p503_p7)   ;;  %v2542_v35 = vld [vmem:[%s2771_s17 + $0x80] sm:$0xff] (!%p503_p7)   ;;  %s2608_s24 = smov (!%p503_p7), 114   ;;  %s2609_s18 = smov (!%p503_p7), 125   ;;  %v2541_v40 = vld [vmem:[%s2771_s17 + $0x18] sm:$0xff] (!%p503_p7)  }
  0x2a   : > { %1223 = vrot.lane.b32.xlu0 (!%p503_p7), %v2757_v32, %s2605_s13  ;;  %1225 = vrot.lane.b32.xlu1 (!%p503_p7), %v2762_v33, %s2605_s13  ;;  %s2610_s26 = smov (!%p503_p7), 113   ;;  %s2611_s27 = smov (!%p503_p7), 122   ;;  %v2544_v42 = vld [vmem:[%s2771_s17] sm:$0xff] (!%p503_p7)   ;;  %v2543_v43 = vld [vmem:[%s2771_s17 + $0x88] sm:$0xff] (!%p503_p7)  }
  0x2b   : > { %2312 = vmatprep.mubr.msk.bf16.mxu1 (!%p503_p7), %vm605_vm0, %v2540_v34  ;;  %2376 = vmatprep.mubr.msk.bf16.mxu0 (!%p503_p7), %vm605_vm0, %v2542_v35  ;;  %s2612_s28 = smov (!%p503_p7), 110   ;;  %s2613_s29 = smov (!%p503_p7), 121   ;;  %v2546_v46 = vld [vmem:[%s2771_s17 + $0x90] sm:$0xff] (!%p503_p7)   ;;  %v2545_v48 = vld [vmem:[%s2771_s17 + $0x8] sm:$0xff] (!%p503_p7)   ;;  %v2548_v49 = vld [vmem:[%s2771_s17 + $0x20] sm:$0xff] (!%p503_p7)  }
  0x2c   : > { %s2614_s30 = smov (!%p503_p7), 109   ;;  %s2615_s6 = smov (!%p503_p7), 120   ;;  %v2547_v51 = vld [vmem:[%s2771_s17 + $0x98] sm:$0xff] (!%p503_p7)   ;;  %v2550_v54 = vld [vmem:[%s2771_s17 + $0xa0] sm:$0xff] (!%p503_p7)   ;;  %v2549_v56 = vld [vmem:[%s2771_s17 + $0x28] sm:$0xff] (!%p503_p7)  }
  0x2d   : > { %s2616_s7 = smov 108   ;;  %s2617_s8 = smov 119   ;;  %v2552_v57 = vld [vmem:[%s2771_s17 + $0x30] sm:$0xff]   ;;  %v2551_v59 = vld [vmem:[%s2771_s17 + $0xa8] sm:$0xff]   ;;  %v2553_v0 = vld [vmem:[%s2771_s17 + $0x38] sm:$0xff]  }
  0x2e   : > { %1303 = vrot.lane.b32.xlu0 %v2757_v32, %s2606_s16  ;;  %1305 = vrot.lane.b32.xlu1 %v2762_v33, %s2606_s16  ;;  %s2618_s9 = smov 107   ;;  %v2554_v62 = vld [vmem:[%s2771_s17 + $0xb0] sm:$0xff]   ;;  %v2556_v1 = vld [vmem:[%s2771_s17 + $0x40] sm:$0xff]   ;;  %s2100_s12 = sshll.u32 %s2091_s21, 2 }
  0x2f   : > { %v2555_v3 = vld [vmem:[%s2771_s17 + $0xb8] sm:$0xff]   ;;  %v2558_v6 = vld [vmem:[%s2771_s17 + $0xc0] sm:$0xff]   ;;  %v2557_v8 = vld [vmem:[%s2771_s17 + $0x48] sm:$0xff]   ;;  %p548_p8 = scmp.lt.s32.totalorder %s2100_s12, 7 }
  0x30   : > { %v2560_v9 = vld [vmem:[%s2771_s17 + $0x50] sm:$0xff]   ;;  %v2559_v11 = vld [vmem:[%s2771_s17 + $0xc8] sm:$0xff]   ;;  %v2561_v16 = vld [vmem:[%s2771_s17 + $0x58] sm:$0xff]  }
  0x31   : > { %v2562_v14 = vld [vmem:[%s2771_s17 + $0xd0] sm:$0xff]   ;;  %v2564_v17 = vld [vmem:[%s2771_s17 + $0x60] sm:$0xff]   ;;  %v2563_v19 = vld [vmem:[%s2771_s17 + $0xd8] sm:$0xff]   ;;  %s2935_s12 = smov (!%p548_p8, %s2100_s12), 7 }
  0x32   : > { %743 = vrot.lane.b32.xlu0 %v2757_v32, %s2607_s23  ;;  %1383 = vrot.lane.b32.xlu1 %v2757_v32, %s2608_s24  ;;  %v2566_v22 = vld [vmem:[%s2771_s17 + $0xe0] sm:$0xff]   ;;  %v2565_v24 = vld [vmem:[%s2771_s17 + $0x68] sm:$0xff]   ;;  %s2101_s13 = sshll.u32 %s2935_s12, 3 }
  0x33   : > { %v2568_v25 = vld [vmem:[%s2771_s17 + $0x70] sm:$0xff]   ;;  %v2567_v27 = vld [vmem:[%s2771_s17 + $0xe8] sm:$0xff]   ;;  %v2569_v30 = vld [vmem:[%s2771_s17 + $0x78] sm:$0xff]   ;;  %s2882_s21 = scalar_lea.vmem %s2927_s2, %s2101_s13 }
  0x34   : > { %v2570_v28 = vld [vmem:[%s2771_s17 + $0xf0] sm:$0xff]   ;;  %v2571_v31 = vld [vmem:[%s2771_s17 + $0xf8] sm:$0xff]   ;;  %s557_s17 = scalar_lea.vmem %s2928_s3, %s2101_s13 }
  0x36   : > { %745 = vrot.lane.b32.xlu0 %v2762_v33, %s2607_s23  ;;  %1385 = vrot.lane.b32.xlu1 %v2762_v33, %s2608_s24  ;;  %s2105_s23 = sshll.u32 %s2935_s12, 2 }
  0x3a   : > { %823 = vrot.lane.b32.xlu0 %v2757_v32, %s2609_s18  ;;  %1463 = vrot.lane.b32.xlu1 %v2757_v32, %s2610_s26 }
  0x3e   : > { %825 = vrot.lane.b32.xlu0 %v2762_v33, %s2609_s18  ;;  %1465 = vrot.lane.b32.xlu1 %v2762_v33, %s2610_s26  ;;  %s563_s26 = scalar_lea.vmem %s2930_s5, %s2105_s23 }
  0x42   : > { %903 = vrot.lane.b32.xlu0 %v2757_v32, %s2611_s27  ;;  %1543 = vrot.lane.b32.xlu1 %v2757_v32, %s2612_s28 }
  0x46   : > { %905 = vrot.lane.b32.xlu0 %v2762_v33, %s2611_s27  ;;  %1545 = vrot.lane.b32.xlu1 %v2762_v33, %s2612_s28 }
  0x4a   : > { %983 = vrot.lane.b32.xlu0 %v2757_v32, %s2613_s29  ;;  %1623 = vrot.lane.b32.xlu1 %v2757_v32, %s2614_s30 }
  0x4e   : > { %985 = vrot.lane.b32.xlu0 %v2762_v33, %s2613_s29  ;;  %1625 = vrot.lane.b32.xlu1 %v2762_v33, %s2614_s30 }
  0x52   : > { %1063 = vrot.lane.b32.xlu0 %v2757_v32, %s2615_s6  ;;  %1703 = vrot.lane.b32.xlu1 %v2757_v32, %s2616_s7 }
  0x56   : > { %1065 = vrot.lane.b32.xlu0 %v2762_v33, %s2615_s6  ;;  %1705 = vrot.lane.b32.xlu1 %v2762_v33, %s2616_s7 }
  0x5a   : > { %1143 = vrot.lane.b32.xlu0 %v2757_v32, %s2617_s8  ;;  %1783 = vrot.lane.b32.xlu1 %v2757_v32, %s2618_s9 }
  0x5e   : > { %1145 = vrot.lane.b32.xlu0 %v2762_v33, %s2617_s8  ;;  %1785 = vrot.lane.b32.xlu1 %v2762_v33, %s2618_s9 }
  0x98   : > { %v600_v36 = vpop.permute.xlu0 %599  ;;  %v602_v37 = vpop.permute.xlu1 %601 }
  0x99   : > { %2308 = vmatprep.subr.bf16.mxu1 %v600_v36 }
  0x9a   : > { %2309 = vmatpush3.bf16.msra.mxu1 %v600_v36 }
  0x9b   : > { %2310 = vmatprep.subr.bf16.mxu1 %v602_v37 }
  0x9c   : > { %v1224_v38 = vpop.permute.xlu0 %1223  ;;  %v1226_v39 = vpop.permute.xlu1 %1225 }
  0x9d   : > { %2372 = vmatprep.subr.bf16.mxu0 %v1224_v38 }
  0x9e   : > { %2311 = vmatpush3.bf16.msra.mxu1 %v602_v37  ;;  %2373 = vmatpush3.bf16.msra.mxu0 %v1224_v38  ;;  %v2232_v38 = vld [vmem:[%s2929_s4] ss:$0 sm:$0xff] }
  0x9f   : > { %2374 = vmatprep.subr.bf16.mxu0 %v1226_v39  ;;  %2316 = vmatprep.subr.bf16.mxu1 %v2757_v32 }
  0xa0   : > { %v1304_v41 = vpop.permute.xlu0 %1303  ;;  %v1306_v44 = vpop.permute.xlu1 %1305 }
  0xa1   : > { %2313 = vmatmul.mubr.msk.bf16.vlgmr.msra.gmra.mrb[0].mxu1 %vm605_vm0, %v2541_v40 }
  0xa2   : > { %2375 = vmatpush3.bf16.msra.mxu0 %v1226_v39  ;;  %2317 = vmatpush3.bf16.msra.mxu1 %v2757_v32  ;;  %v2619_v32 = vmov 0  }
  0xa3   : > { %2380 = vmatprep.subr.bf16.mxu0 %v1304_v41  ;;  %2318 = vmatprep.subr.bf16.mxu1 %v2762_v33 }
  0xa4   : > { %2320 = vmatprep.mubr.msk.bf16.mxu1 %vm605_vm0, %v2544_v42  ;;  %v744_v45 = vpop.permute.xlu0 %743  ;;  %v1384_v47 = vpop.permute.xlu1 %1383  ;;  %2536 = vset.pattern.permute.xlu1 %v2619_v32 }
  0xa5   : > { %2377 = vmatmul.mubr.msk.bf16.vlgmr.msra.gmra.mrb[0].mxu0 %vm605_vm0, %v2543_v43  ;;  %2537 = vset.pattern.permute.xlu0 %v2619_v32 }
  0xa6   : > { %2381 = vmatpush3.bf16.msra.mxu0 %v1304_v41  ;;  %2319 = vmatpush3.bf16.msra.mxu1 %v2762_v33 }
  0xa7   : > { %2382 = vmatprep.subr.bf16.mxu0 %v1306_v44  ;;  %2324 = vmatprep.subr.bf16.mxu1 %v744_v45 }
  0xa8   : > { %2384 = vmatprep.mubr.msk.bf16.mxu0 %vm605_vm0, %v2546_v46  ;;  %v746_v50 = vpop.permute.xlu0 %745  ;;  %v1386_v52 = vpop.permute.xlu1 %1385 }
  0xaa   : > { %2383 = vmatpush3.bf16.msra.mxu0 %v1306_v44 }
  0xab   : > { %2388 = vmatprep.subr.bf16.mxu0 %v1384_v47 }
  0xac   : > { %v824_v53 = vpop.permute.xlu0 %823  ;;  %v1464_v55 = vpop.permute.xlu1 %1463 }
  0xad   : > { %2321 = vmatmul.mubr.msk.bf16.vlgmr.msra.gmra.mrb[0].mxu1 %vm605_vm0, %v2545_v48 }
  0xae   : > { %2325 = vmatpush3.bf16.msra.mxu1 %v744_v45  ;;  %2328 = vmatprep.mubr.msk.bf16.mxu1 %vm605_vm0, %v2548_v49 }
  0xaf   : > { %2326 = vmatprep.subr.bf16.mxu1 %v746_v50 }
  0xb0   : > { %v826_v58 = vpop.permute.xlu0 %825  ;;  %v1466_v60 = vpop.permute.xlu1 %1465 }
  0xb1   : > { %2385 = vmatmul.mubr.msk.bf16.vlgmr.msra.gmra.mrb[0].mxu0 %vm605_vm0, %v2547_v51 }
  0xb2   : > { %2389 = vmatpush3.bf16.msra.mxu0 %v1384_v47  ;;  %2327 = vmatpush3.bf16.msra.mxu1 %v746_v50 }
  0xb3   : > { %2390 = vmatprep.subr.bf16.mxu0 %v1386_v52  ;;  %2332 = vmatprep.subr.bf16.mxu1 %v824_v53 }
  0xb4   : > { %2392 = vmatprep.mubr.msk.bf16.mxu0 %vm605_vm0, %v2550_v54  ;;  %v904_v61 = vpop.permute.xlu0 %903  ;;  %v1544_v63 = vpop.permute.xlu1 %1543  ;;  %v1916_v54 = vld [vmem:[%s2882_s21] sm:$0xff] }
  0xb6   : > { %2391 = vmatpush3.bf16.msra.mxu0 %v1386_v52 }
  0xb7   : > { %2396 = vmatprep.subr.bf16.mxu0 %v1464_v55 }
  0xb8   : > { %v906_v2 = vpop.permute.xlu0 %905  ;;  %v1546_v4 = vpop.permute.xlu1 %1545 }
  0xb9   : > { %2329 = vmatmul.mubr.msk.bf16.vlgmr.msra.gmra.mrb[0].mxu1 %vm605_vm0, %v2549_v56 }
  0xba   : > { %2333 = vmatpush3.bf16.msra.mxu1 %v824_v53  ;;  %2336 = vmatprep.mubr.msk.bf16.mxu1 %vm605_vm0, %v2552_v57 }
  0xbb   : > { %2334 = vmatprep.subr.bf16.mxu1 %v826_v58 }
  0xbc   : > { %v984_v5 = vpop.permute.xlu0 %983  ;;  %v1624_v7 = vpop.permute.xlu1 %1623 }
  0xbd   : > { %2393 = vmatmul.mubr.msk.bf16.vlgmr.msra.gmra.mrb[0].mxu0 %vm605_vm0, %v2551_v59 }
  0xbe   : > { %2397 = vmatpush3.bf16.msra.mxu0 %v1464_v55  ;;  %2335 = vmatpush3.bf16.msra.mxu1 %v826_v58 }
  0xbf   : > { %2398 = vmatprep.subr.bf16.mxu0 %v1466_v60  ;;  %2340 = vmatprep.subr.bf16.mxu1 %v904_v61 }
  0xc0   : > { %2400 = vmatprep.mubr.msk.bf16.mxu0 %vm605_vm0, %v2554_v62  ;;  %v986_v10 = vpop.permute.xlu0 %985  ;;  %v1626_v12 = vpop.permute.xlu1 %1625 }
  0xc2   : > { %2399 = vmatpush3.bf16.msra.mxu0 %v1466_v60 }
  0xc3   : > { %2404 = vmatprep.subr.bf16.mxu0 %v1544_v63 }
  0xc4   : > { %v1064_v13 = vpop.permute.xlu0 %1063  ;;  %v1704_v15 = vpop.permute.xlu1 %1703 }
  0xc5   : > { %2337 = vmatmul.mubr.msk.bf16.vlgmr.msra.gmra.mrb[0].mxu1 %vm605_vm0, %v2553_v0 }
  0xc6   : > { %2341 = vmatpush3.bf16.msra.mxu1 %v904_v61  ;;  %2344 = vmatprep.mubr.msk.bf16.mxu1 %vm605_vm0, %v2556_v1 }
  0xc7   : > { %2342 = vmatprep.subr.bf16.mxu1 %v906_v2 }
  0xc8   : > { %v1066_v18 = vpop.permute.xlu0 %1065  ;;  %v1706_v20 = vpop.permute.xlu1 %1705 }
  0xc9   : > { %2401 = vmatmul.mubr.msk.bf16.vlgmr.msra.gmra.mrb[0].mxu0 %vm605_vm0, %v2555_v3 }
  0xca   : > { %2405 = vmatpush3.bf16.msra.mxu0 %v1544_v63  ;;  %2343 = vmatpush3.bf16.msra.mxu1 %v906_v2 }
  0xcb   : > { %2406 = vmatprep.subr.bf16.mxu0 %v1546_v4  ;;  %2348 = vmatprep.subr.bf16.mxu1 %v984_v5 }
  0xcc   : > { %2408 = vmatprep.mubr.msk.bf16.mxu0 %vm605_vm0, %v2558_v6  ;;  %v1144_v21 = vpop.permute.xlu0 %1143  ;;  %v1784_v23 = vpop.permute.xlu1 %1783 }
  0xce   : > { %2407 = vmatpush3.bf16.msra.mxu0 %v1546_v4 }
  0xcf   : > { %2412 = vmatprep.subr.bf16.mxu0 %v1624_v7 }
  0xd0   : > { %v1146_v26 = vpop.permute.xlu0 %1145  ;;  %v1786_v29 = vpop.permute.xlu1 %1785 }
  0xd1   : > { %2345 = vmatmul.mubr.msk.bf16.vlgmr.msra.gmra.mrb[0].mxu1 %vm605_vm0, %v2557_v8 }
  0xd2   : > { %2349 = vmatpush3.bf16.msra.mxu1 %v984_v5  ;;  %2352 = vmatprep.mubr.msk.bf16.mxu1 %vm605_vm0, %v2560_v9 }
  0xd3   : > { %2350 = vmatprep.subr.bf16.mxu1 %v986_v10 }
  0xd5   : > { %2409 = vmatmul.mubr.msk.bf16.vlgmr.msra.gmra.mrb[0].mxu0 %vm605_vm0, %v2559_v11 }
  0xd6   : > { %2413 = vmatpush3.bf16.msra.mxu0 %v1624_v7  ;;  %2351 = vmatpush3.bf16.msra.mxu1 %v986_v10 }
  0xd7   : > { %2414 = vmatprep.subr.bf16.mxu0 %v1626_v12  ;;  %2356 = vmatprep.subr.bf16.mxu1 %v1064_v13 }
  0xd8   : > { %2416 = vmatprep.mubr.msk.bf16.mxu0 %vm605_vm0, %v2562_v14 }
  0xda   : > { %2415 = vmatpush3.bf16.msra.mxu0 %v1626_v12 }
  0xdb   : > { %2420 = vmatprep.subr.bf16.mxu0 %v1704_v15 }
  0xdd   : > { %2353 = vmatmul.mubr.msk.bf16.vlgmr.msra.gmra.mrb[0].mxu1 %vm605_vm0, %v2561_v16  ;;  %v1944_v16 = vld [vmem:[%s557_s17] sm:$0xff] }
  0xde   : > { %2357 = vmatpush3.bf16.msra.mxu1 %v1064_v13  ;;  %2360 = vmatprep.mubr.msk.bf16.mxu1 %vm605_vm0, %v2564_v17  ;;  %v1919_v17 = vld [vmem:[%s2882_s21 + $0x18] sm:$0xff] }
  0xdf   : > { %2358 = vmatprep.subr.bf16.mxu1 %v1066_v18 }
  0xe1   : > { %2417 = vmatmul.mubr.msk.bf16.vlgmr.msra.gmra.mrb[0].mxu0 %vm605_vm0, %v2563_v19  ;;  %v1917_v19 = vld [vmem:[%s2882_s21 + $0x8] sm:$0xff] }
  0xe2   : > { %2421 = vmatpush3.bf16.msra.mxu0 %v1704_v15  ;;  %2359 = vmatpush3.bf16.msra.mxu1 %v1066_v18  ;;  %v1918_v15 = vld [vmem:[%s2882_s21 + $0x10] sm:$0xff]  ;;  %v1945_v18 = vld [vmem:[%s557_s17 + $0x8] sm:$0xff] }
  0xe3   : > { %2422 = vmatprep.subr.bf16.mxu0 %v1706_v20  ;;  %2364 = vmatprep.subr.bf16.mxu1 %v1144_v21 }
  0xe4   : > { %2424 = vmatprep.mubr.msk.bf16.mxu0 %vm605_vm0, %v2566_v22 }
  0xe6   : > { %2423 = vmatpush3.bf16.msra.mxu0 %v1706_v20  ;;  %v1946_v20 = vld [vmem:[%s557_s17 + $0x10] sm:$0xff] }
  0xe7   : > { %2428 = vmatprep.subr.bf16.mxu0 %v1784_v23 }
  0xe9   : > { %2361 = vmatmul.mubr.msk.bf16.vlgmr.msra.gmra.mrb[0].mxu1 %vm605_vm0, %v2565_v24 }
  0xea   : > { %2365 = vmatpush3.bf16.msra.mxu1 %v1144_v21  ;;  %2368 = vmatprep.mubr.msk.bf16.mxu1 %vm605_vm0, %v2568_v25  ;;  %v1947_v21 = vld [vmem:[%s557_s17 + $0x18] sm:$0xff] }
  0xeb   : > { %2366 = vmatprep.subr.bf16.mxu1 %v1146_v26 }
  0xed   : > { %2425 = vmatmul.mubr.msk.bf16.vlgmr.msra.gmra.mrb[0].mxu0 %vm605_vm0, %v2567_v27 }
  0xee   : > { %2429 = vmatpush3.bf16.msra.mxu0 %v1784_v23  ;;  %2367 = vmatpush3.bf16.msra.mxu1 %v1146_v26 }
  0xef   : > { %2430 = vmatprep.subr.bf16.mxu0 %v1786_v29  ;;  %2432 = vmatprep.mubr.msk.bf16.mxu0 %vm605_vm0, %v2570_v28 }
  0xf2   : > { %2431 = vmatpush3.bf16.msra.mxu0 %v1786_v29 }
  0xf5   : > { %2369 = vmatmul.mubr.msk.bf16.vlgmr.msra.gmra.mrb[0].mxu1 %vm605_vm0, %v2569_v30 }
  0xf9   : > { %2433 = vmatmul.mubr.msk.bf16.vlgmr.msra.gmra.mrb[0].mxu0 %vm605_vm0, %v2571_v31 }
 0x1c8   : > { %v2370_v33 = vpop.f32.mrb[0].mxu1 }
 0x1c9   : > { %v1189_v34 = vpop.f32.mrb[1].mxu1 }
 0x1ca   : > { %v2371_v35 = vpop.f32.mrb[2].mxu1 }
 0x1cb   : > { %v1192_v36 = vpop.f32.mrb[3].mxu1 }
 0x1cc   : > { %v2434_v37 = vpop.f32.mrb[0].mxu0 }
 0x1cd   : > { %v2436_v39 = vadd.f32 %v2434_v37, %v2370_v33  ;;  %v1829_v40 = vpop.f32.mrb[1].mxu0 }
 0x1ce   : > { %v2437_v41 = vadd.f32 %v1829_v40, %v1189_v34  ;;  %v2435_v42 = vpop.f32.mrb[2].mxu0 }
 0x1cf   : > { %v2438_v43 = vadd.f32 %v2435_v42, %v2371_v35  ;;  %v1832_v44 = vpop.f32.mrb[3].mxu0  ;;  %v1857_v45 = vmul.f32 %v2436_v39, %v2232_v38 }
 0x1d0   : > { %v2439_v46 = vadd.f32 %v1832_v44, %v1192_v36  ;;  %v1855_v48 = vmul.f32 %v2437_v41, %v2232_v38 }
 0x1d1   : > { %v1866_v47 = vsel %vm1859_vm1, %v1857_v45, 0.0  ;;  %v1858_v52 = vmul.f32 %v2438_v43, %v2232_v38 }
 0x1d2   : > { %1867 = vadd.xlane.f32.xlu0 %v1866_v47  ;;  %v1856_v49 = vmul.f32 %v2439_v46, %v2232_v38  ;;  %v1860_v51 = vsel %vm1859_vm1, %v1855_v48, 0.0 }
 0x1d3   : > { %v1869_v53 = vsel %vm1859_vm1, %v1858_v52, 0.0 }
 0x1d4   : > { %v1863_v50 = vsel %vm1859_vm1, %v1856_v49, 0.0 }
 0x1d5   : > { %1864 = vadd.xlane.f32.xlu1 %v1863_v50 }
 0x1d6   : > { %1861 = vadd.xlane.f32.xlu0 %v1860_v51 }
 0x1da   : > { %1870 = vadd.xlane.f32.xlu0 %v1869_v53 }
 0x1e6   : > { %1922 = vperm.xlu1 %2536, %v1916_v54  }
 0x25f   : > { %v1868_v55 = vpop.xlane.xlu0 %1867 }
 0x260   : > { %v1874_v56 = vmul.f32 0.055555556, %v1868_v55 }
 0x262   : > { %v2885_v57 = vsub.f32 %v2436_v39, %v1874_v56  ;;  %v1865_v58 = vpop.xlane.xlu1 %1864 }
 0x263   : > { %v1862_v59 = vpop.xlane.xlu0 %1861  ;;  %v1873_v60 = vmul.f32 0.055555556, %v1865_v58 }
 0x264   : > { %v1872_v61 = vmul.f32 0.055555556, %v1862_v59  ;;  %v1882_v62 = vmul.f32 %v2885_v57, %v2885_v57 }
 0x265   : > { %v2889_v2 = vsub.f32 %v2439_v46, %v1873_v60 }
 0x266   : > { %v1876_v63 = vsub.f32 %v2437_v41, %v1872_v61  ;;  %v1886_v0 = vmul.f32 %v2232_v38, %v1882_v62  ;;  %v1923_v22 = vpop.permute.xlu1 %1922 }
 0x267   : > { %v1871_v1 = vpop.xlane.xlu0 %1870  ;;  %v1881_v10 = vmul.f32 %v2889_v2, %v2889_v2 }
 0x268   : > { %v1875_v3 = vmul.f32 0.055555556, %v1871_v1  ;;  %v1894_v4 = vsel %vm1859_vm1, %v1886_v0, 0.0  ;;  %v1880_v5 = vmul.f32 %v1876_v63, %v1876_v63 }
 0x269   : > { %1895 = vadd.xlane.f32.xlu1 %v1894_v4  ;;  %v1885_v13 = vmul.f32 %v2232_v38, %v1881_v10 }
 0x26a   : > { %v1879_v6 = vsub.f32 %v2438_v43, %v1875_v3  ;;  %v1884_v7 = vmul.f32 %v2232_v38, %v1880_v5 }
 0x26b   : > { %v1891_v14 = vsel %vm1859_vm1, %v1885_v13, 0.0 }
 0x26c   : > { %v1888_v8 = vsel %vm1859_vm1, %v1884_v7, 0.0  ;;  %v1883_v9 = vmul.f32 %v1879_v6, %v1879_v6 }
 0x26d   : > { %1889 = vadd.xlane.f32.xlu1 %v1888_v8 }
 0x26e   : > { %v1887_v11 = vmul.f32 %v2232_v38, %v1883_v9 }
 0x270   : > { %v1897_v12 = vsel %vm1859_vm1, %v1887_v11, 0.0 }
 0x271   : > { %1898 = vadd.xlane.f32.xlu0 %v1897_v12 }
 0x275   : > { %1892 = vadd.xlane.f32.xlu0 %v1891_v14 }
 0x27e   : > { %1932 = vperm.xlu1 %2536, %v1918_v15  }
 0x282   : > { %1950 = vperm.xlu1 %2536, %v1944_v16  }
 0x286   : > { %1937 = vperm.xlu1 %2536, %v1919_v17  }
 0x28a   : > { %1955 = vperm.xlu1 %2536, %v1945_v18  }
 0x28b   : > { %1927 = vperm.xlu0 %2537, %v1917_v19  }
 0x28e   : > { %1960 = vperm.xlu1 %2536, %v1946_v20  }
 0x292   : > { %1965 = vperm.xlu1 %2536, %v1947_v21  }
 0x2f6   : > { %v1896_v23 = vpop.xlane.xlu1 %1895 }
 0x2f7   : > { %v1902_v24 = vmul.f32 0.055555556, %v1896_v23 }
 0x2f9   : > { %v1906_v25 = vadd.f32 1e-05, %v1902_v24 }
 0x2fa   : > { %v1890_v26 = vpop.xlane.xlu1 %1889 }
 0x2fb   : > { %v1900_v27 = vmul.f32 0.055555556, %v1890_v26  ;;  %2572 = vrsqrt.f32 %v1906_v25 }
 0x2fd   : > { %v1904_v28 = vadd.f32 1e-05, %v1900_v27 }
 0x2fe   : > { %v1899_v29 = vpop.xlane.xlu0 %1898  ;;  %v1933_v30 = vpop.permute.xlu1 %1932 }
 0x2ff   : > { %2574 = vrsqrt.f32 %v1904_v28  ;;  %v1903_v31 = vmul.f32 0.055555556, %v1899_v29 }
 0x301   : > { %v1907_v32 = vadd.f32 1e-05, %v1903_v31 }
 0x302   : > { %v1893_v33 = vpop.xlane.xlu0 %1892  ;;  %v1951_v34 = vpop.permute.xlu1 %1950 }
 0x303   : > { %2576 = vrsqrt.f32 %v1907_v32  ;;  %v1901_v35 = vmul.f32 0.055555556, %v1893_v33 }
 0x305   : > { %v1905_v36 = vadd.f32 1e-05, %v1901_v35  ;;  %v2573_v38 = vpop.eup %2572 }
 0x306   : > { %v1938_v37 = vpop.permute.xlu1 %1937  ;;  %v1914_v42 = vmul.f32 %v2573_v38, %v2885_v57 }
 0x307   : > { %2578 = vrsqrt.f32 %v1905_v36 }
 0x308   : > { %v1942_v48 = vmul.f32 %v1933_v30, %v1914_v42 }
 0x309   : > { %v2575_v39 = vpop.eup %2574 }
 0x30a   : > { %v1912_v40 = vmul.f32 %v2575_v39, %v1876_v63  ;;  %v1956_v41 = vpop.permute.xlu1 %1955  ;;  %v1928_v53 = vpop.permute.xlu0 %1927 }
 0x30c   : > { %v1940_v43 = vmul.f32 %v1923_v22, %v1912_v40 }
 0x30d   : > { %v2577_v44 = vpop.eup %2576 }
 0x30e   : > { %v1968_v45 = vadd.f32 %v1951_v34, %v1940_v43  ;;  %v1915_v46 = vmul.f32 %v2577_v44, %v1879_v6  ;;  %v1961_v47 = vpop.permute.xlu1 %1960 }
 0x30f   : > { %v1970_v52 = vadd.f32 %v1961_v47, %v1942_v48 }
 0x310   : > { %vm1972_vm2 = vcmp.gt.f32.partialorder %v1968_v45, 0.0  ;;  %v1976_v49 = vmul.f32 0.2, %v1968_v45  ;;  %v1943_v50 = vmul.f32 %v1938_v37, %v1915_v46 }
 0x311   : > { %v2579_v51 = vpop.eup %2578  ;;  %v1978_v60 = vmul.f32 0.2, %v1970_v52  ;;  %vm1974_vm4 = vcmp.gt.f32.partialorder %v1970_v52, 0.0 }
 0x312   : > { %v1980_v54 = vsel %vm1972_vm2, %v1968_v45, %v1976_v49  ;;  %v1966_v55 = vpop.permute.xlu1 %1965  ;;  %v1913_v56 = vmul.f32 %v2579_v51, %v2889_v2 }
 0x313   : > { %v2240_v57 = vpack.c.bf16 %v1980_v54, %v1980_v54  ;;  %v1971_v58 = vadd.f32 %v1966_v55, %v1943_v50  ;;  %v1982_v0 = vsel %vm1974_vm4, %v1970_v52, %v1978_v60 }
 0x314   : > { %v1941_v59 = vmul.f32 %v1928_v53, %v1913_v56  ;;  %v2242_v5 = vpack.c.bf16 %v1982_v0, %v1982_v0 }
 0x315   : > { %2001 = vst.msk [vmem:[%s563_s26] sm:$0xf] %vm2000_vm3, %v2240_v57  ;;  %v1979_v61 = vmul.f32 0.2, %v1971_v58  ;;  %vm1975_vm5 = vcmp.gt.f32.partialorder %v1971_v58, 0.0 }
 0x316   : > { %v1969_v62 = vadd.f32 %v1956_v41, %v1941_v59  ;;  %2003 = vst.msk [vmem:[%s563_s26 + $0x8] sm:$0xf] %vm2000_vm3, %v2242_v5 }
 0x317   : > { %v1983_v1 = vsel %vm1975_vm5, %v1971_v58, %v1979_v61 }
 0x318   : > { %vm1973_vm6 = vcmp.gt.f32.partialorder %v1969_v62, 0.0  ;;  %v1977_v63 = vmul.f32 0.2, %v1969_v62  ;;  %v2243_v6 = vpack.c.bf16 %v1983_v1, %v1983_v1 }
 0x31a   : > { %v1981_v3 = vsel %vm1973_vm6, %v1969_v62, %v1977_v63  ;;  %2004 = vst.msk [vmem:[%s563_s26 + $0xc] sm:$0xf] %vm2000_vm3, %v2243_v6 }
 0x31b   : > { %v2241_v4 = vpack.c.bf16 %v1981_v3, %v1981_v3 }
 0x31d   : > { %2002 = vst.msk [vmem:[%s563_s26 + $0x4] sm:$0xf] %vm2000_vm3, %v2241_v4 }
 0x31e PF: > { %p12_p9 = scmp.ge.s32.totalorder %s2667_s22, 4   ;;  %s2931_s18 = smov %s2598_s19 }
 0x31f   : > { %s2932_s19 = smov %s2676_s25  ;;  %s2933_s20 = smov %s2667_s22 }
 0x320   :  { %14 = sbr.rel (!%p12_p9) target bundleno = 2 (0x2), region = 137 }

// kernel: _lambda_.9
= control target key start
LH: loop header
LB: loop body
LE: loop exit
PB: predicated region body
PF: predicated region fallthrough
CT: control target
= control target key end

     0   :  { %v1310_v1 = vmov 0.0   ;;  %s1311_s16 = smov 127   ;;  %vm1312_vm0 = vmmov 0   ;;  %s1313_s21 = smov 126   ;;  %vm60_vm1 = vcmask 523264   ;;  %v1327_v7 = vmov 0   ;;  %s1598_s1 = inlined_call_operand.vmem [shape: bf16[1,64,50], index: 1, kind: input, shape index: {}]   ;;  %s1599_s0 = inlined_call_operand.vmem [shape: bf16[16,1,64], index: 0, kind: input, shape index: {}]   ;;  %s1600_s2 = inlined_call_operand.<no memory space> [shape: f32[1,1], index: 2, kind: input, shape index: {}]   ;;  %s1601_s3 = inlined_call_operand.vmem [shape: f32[1,32], index: 3, kind: output, shape index: {}]  }
   0x1   :  { %v1351_v0 = vld [vmem:[%s1598_s1] sm:$0xff]   ;;  %1107 = vmatprep.subr.bf16.mxu1 %v1310_v1  ;;  %1095 = vmatprep.subr.bf16.mxu0 %v1310_v1  ;;  %v1358_v2 = vld [vmem:[%s1598_s1 + $0x8] sm:$0xff]   ;;  %v1364_v3 = vld [vmem:[%s1598_s1 + $0x10] sm:$0xff]   ;;  %s1315_s24 = smov 123   ;;  %s1316_s25 = smov 122   ;;  %v8_v8 = vstv %s1600_s2  ;;  %vm974_vm2 = vcmask 253952  }
   0x2   :  { %48 = vrot.lane.b32.xlu0 %v1351_v0, %s1311_s16  ;;  %1108 = vmatpush3.bf16.msra.mxu1 %v1351_v0  ;;  %v1372_v4 = vld [vmem:[%s1598_s1 + $0x18] sm:$0xff]   ;;  %s1314_s1 = smov 125   ;;  %v17_v5 = vld [vmem:[%s1599_s0] sm:$0x1]  ;;  %s1317_s26 = smov 121  }
   0x3   :  { %1109 = vmatprep.subr.bf16.mxu1 %v1310_v1  ;;  %52 = vrot.lane.b32.xlu1 %v1364_v3, %s1311_s16  ;;  %s1318_s27 = smov 120   ;;  %s1319_s28 = smov 118   ;;  %9 = vst [vmem:[#allocation2] sm:$0x1] %v8_v8  ;;  %v980_v16 = vld [vmem:[%s1599_s0 + $0x1] sm:$0x1] }
   0x4   :  { %1103 = vmatprep.mubr.msk.bf16.mxu0 %vm1312_vm0, %v1310_v1  ;;  %1115 = vmatprep.mubr.msk.bf16.mxu1 %vm1312_vm0, %v1310_v1  ;;  %s1320_s29 = smov 117   ;;  %s1321_s30 = smov 116   ;;  %v989_v22 = vld [vmem:[%s1599_s0 + $0x3] sm:$0x1]  ;;  %v987_v26 = vld [vmem:[%s1599_s0 + $0x2] sm:$0x1] }
   0x5   :  { %s1322_s4 = smov 115   ;;  %s1323_s5 = smov 113   ;;  %1305 = vset.pattern.permute.xlu0 %v1327_v7  ;;  %v993_v32 = vld [vmem:[%s1599_s0 + $0x5] sm:$0x1]  ;;  %v991_v36 = vld [vmem:[%s1599_s0 + $0x4] sm:$0x1] }
   0x6   :  { %50 = vrot.lane.b32.xlu0 %v1358_v2, %s1311_s16  ;;  %1110 = vmatpush3.bf16.msra.mxu1 %v1358_v2  ;;  %s1324_s6 = smov 112   ;;  %s1325_s7 = smov 111   ;;  %v997_v42 = vld [vmem:[%s1599_s0 + $0x7] sm:$0x1]  ;;  %v995_v46 = vld [vmem:[%s1599_s0 + $0x6] sm:$0x1] }
   0x7   :  { %1111 = vmatprep.subr.bf16.mxu1 %v1310_v1  ;;  %54 = vrot.lane.b32.xlu1 %v1372_v4, %s1311_s16  ;;  %s1326_s8 = smov 110   ;;  %v1001_v52 = vld [vmem:[%s1599_s0 + $0x9] sm:$0x1]  ;;  %v999_v56 = vld [vmem:[%s1599_s0 + $0x8] sm:$0x1] }
   0x8   :  { %v1005_v62 = vld [vmem:[%s1599_s0 + $0xb] sm:$0x1] }
   0xa   :  { %153 = vrot.lane.b32.xlu0 %v1351_v0, %s1313_s21  ;;  %1112 = vmatpush3.bf16.msra.mxu1 %v1364_v3  ;;  %v963_v13 = vld [vmem:[#allocation2] sm:$0x1] }
   0xb   :  { %1113 = vmatprep.subr.bf16.mxu1 %v1310_v1  ;;  %211 = vrot.lane.b32.xlu1 %v1351_v0, %s1314_s1 }
   0xe   :  { %155 = vrot.lane.b32.xlu0 %v1358_v2, %s1313_s21  ;;  %1114 = vmatpush3.bf16.msra.mxu1 %v1372_v4 }
   0xf   :  { %1131 = vmatprep.subr.bf16.mxu1 %v1310_v1  ;;  %213 = vrot.lane.b32.xlu1 %v1358_v2, %s1314_s1 }
  0x11   :  { %1116 = vmatmul.mubr.msk.bf16.vlgmr.msra.gmra.mrb[0].mxu1 %vm60_vm1, %v17_v5 }
  0x12   :  { %157 = vrot.lane.b32.xlu0 %v1364_v3, %s1313_s21  ;;  %1139 = vmatprep.mubr.msk.bf16.mxu1 %vm1312_vm0, %v1310_v1 }
  0x13   :  { %215 = vrot.lane.b32.xlu1 %v1364_v3, %s1314_s1 }
  0x16   :  { %159 = vrot.lane.b32.xlu0 %v1372_v4, %s1313_s21 }
  0x17   :  { %217 = vrot.lane.b32.xlu1 %v1372_v4, %s1314_s1 }
  0x1a   :  { %269 = vrot.lane.b32.xlu0 %v1351_v0, %s1315_s24 }
  0x1b   :  { %327 = vrot.lane.b32.xlu1 %v1351_v0, %s1316_s25 }
  0x1e   :  { %271 = vrot.lane.b32.xlu0 %v1358_v2, %s1315_s24 }
  0x1f   :  { %329 = vrot.lane.b32.xlu1 %v1358_v2, %s1316_s25 }
  0x22   :  { %273 = vrot.lane.b32.xlu0 %v1364_v3, %s1315_s24 }
  0x23   :  { %331 = vrot.lane.b32.xlu1 %v1364_v3, %s1316_s25 }
  0x26   :  { %275 = vrot.lane.b32.xlu0 %v1372_v4, %s1315_s24 }
  0x27   :  { %333 = vrot.lane.b32.xlu1 %v1372_v4, %s1316_s25 }
  0x2a   :  { %385 = vrot.lane.b32.xlu0 %v1351_v0, %s1317_s26 }
  0x2b   :  { %443 = vrot.lane.b32.xlu1 %v1351_v0, %s1318_s27 }
  0x2e   :  { %387 = vrot.lane.b32.xlu0 %v1358_v2, %s1317_s26 }
  0x2f   :  { %445 = vrot.lane.b32.xlu1 %v1358_v2, %s1318_s27 }
  0x32   :  { %389 = vrot.lane.b32.xlu0 %v1364_v3, %s1317_s26 }
  0x33   :  { %447 = vrot.lane.b32.xlu1 %v1364_v3, %s1318_s27 }
  0x36   :  { %391 = vrot.lane.b32.xlu0 %v1372_v4, %s1317_s26 }
  0x37   :  { %449 = vrot.lane.b32.xlu1 %v1372_v4, %s1318_s27 }
  0x3a   :  { %501 = vrot.lane.b32.xlu0 %v1351_v0, %s1319_s28 }
  0x3b   :  { %559 = vrot.lane.b32.xlu1 %v1351_v0, %s1320_s29 }
  0x3e   :  { %503 = vrot.lane.b32.xlu0 %v1358_v2, %s1319_s28 }
  0x3f   :  { %561 = vrot.lane.b32.xlu1 %v1358_v2, %s1320_s29 }
  0x42   :  { %505 = vrot.lane.b32.xlu0 %v1364_v3, %s1319_s28 }
  0x43   :  { %563 = vrot.lane.b32.xlu1 %v1364_v3, %s1320_s29 }
  0x46   :  { %507 = vrot.lane.b32.xlu0 %v1372_v4, %s1319_s28 }
  0x47   :  { %565 = vrot.lane.b32.xlu1 %v1372_v4, %s1320_s29 }
  0x4a   :  { %617 = vrot.lane.b32.xlu0 %v1351_v0, %s1321_s30 }
  0x4b   :  { %675 = vrot.lane.b32.xlu1 %v1351_v0, %s1322_s4 }
  0x4e   :  { %619 = vrot.lane.b32.xlu0 %v1358_v2, %s1321_s30 }
  0x4f   :  { %677 = vrot.lane.b32.xlu1 %v1358_v2, %s1322_s4 }
  0x52   :  { %621 = vrot.lane.b32.xlu0 %v1364_v3, %s1321_s30 }
  0x53   :  { %679 = vrot.lane.b32.xlu1 %v1364_v3, %s1322_s4 }
  0x56   :  { %623 = vrot.lane.b32.xlu0 %v1372_v4, %s1321_s30 }
  0x57   :  { %681 = vrot.lane.b32.xlu1 %v1372_v4, %s1322_s4 }
  0x5a   :  { %733 = vrot.lane.b32.xlu0 %v1351_v0, %s1323_s5 }
  0x5b   :  { %791 = vrot.lane.b32.xlu1 %v1351_v0, %s1324_s6 }
  0x5e   :  { %735 = vrot.lane.b32.xlu0 %v1358_v2, %s1323_s5 }
  0x5f   :  { %793 = vrot.lane.b32.xlu1 %v1358_v2, %s1324_s6 }
  0x62   :  { %737 = vrot.lane.b32.xlu0 %v1364_v3, %s1323_s5 }
  0x63   :  { %795 = vrot.lane.b32.xlu1 %v1364_v3, %s1324_s6 }
  0x66   :  { %739 = vrot.lane.b32.xlu0 %v1372_v4, %s1323_s5 }
  0x67   :  { %797 = vrot.lane.b32.xlu1 %v1372_v4, %s1324_s6 }
  0x6a   :  { %849 = vrot.lane.b32.xlu0 %v1351_v0, %s1325_s7 }
  0x6b   :  { %907 = vrot.lane.b32.xlu1 %v1351_v0, %s1326_s8 }
  0x6e   :  { %851 = vrot.lane.b32.xlu0 %v1358_v2, %s1325_s7 }
  0x6f   :  { %909 = vrot.lane.b32.xlu1 %v1358_v2, %s1326_s8 }
  0x72   :  { %853 = vrot.lane.b32.xlu0 %v1364_v3, %s1325_s7 }
  0x73   :  { %911 = vrot.lane.b32.xlu1 %v1364_v3, %s1326_s8  ;;  %v1003_v3 = vld [vmem:[%s1599_s0 + $0xa] sm:$0x1] }
  0x74   :  { %v49_v6 = vpop.permute.xlu0 %48 }
  0x75   :  { %1096 = vmatpush3.bf16.msra.mxu0 %v49_v6  ;;  %v53_v9 = vpop.permute.xlu1 %52 }
  0x76   :  { %1097 = vmatprep.subr.bf16.mxu0 %v1310_v1  ;;  %855 = vrot.lane.b32.xlu0 %v1372_v4, %s1325_s7 }
  0x77   :  { %913 = vrot.lane.b32.xlu1 %v1372_v4, %s1326_s8 }
  0x78   :  { %v51_v10 = vpop.permute.xlu0 %50 }
  0x79   :  { %1098 = vmatpush3.bf16.msra.mxu0 %v51_v10  ;;  %v55_v11 = vpop.permute.xlu1 %54 }
  0x7a   :  { %1099 = vmatprep.subr.bf16.mxu0 %v1310_v1  ;;  %966 = vperm.xlu0 %1305, %v963_v13  }
  0x7c   :  { %v154_v12 = vpop.permute.xlu0 %153 }
  0x7d   :  { %1100 = vmatpush3.bf16.msra.mxu0 %v53_v9  ;;  %v212_v14 = vpop.permute.xlu1 %211  ;;  %v1009_v9 = vld [vmem:[%s1599_s0 + $0xd] sm:$0x1] }
  0x7e   :  { %1101 = vmatprep.subr.bf16.mxu0 %v1310_v1  ;;  %1132 = vmatpush3.bf16.msra.mxu1 %v212_v14 }
  0x7f   :  { %1133 = vmatprep.subr.bf16.mxu1 %v1310_v1 }
  0x80   :  { %v156_v15 = vpop.permute.xlu0 %155 }
  0x81   :  { %1102 = vmatpush3.bf16.msra.mxu0 %v55_v11  ;;  %v214_v17 = vpop.permute.xlu1 %213 }
  0x82   :  { %1119 = vmatprep.subr.bf16.mxu0 %v1310_v1  ;;  %1134 = vmatpush3.bf16.msra.mxu1 %v214_v17 }
  0x83   :  { %1135 = vmatprep.subr.bf16.mxu1 %v1310_v1 }
  0x84   :  { %1104 = vmatmul.mubr.msk.bf16.vlgmr.msra.gmra.mrb[0].mxu0 %vm60_vm1, %v980_v16  ;;  %v158_v18 = vpop.permute.xlu0 %157 }
  0x85   :  { %1120 = vmatpush3.bf16.msra.mxu0 %v154_v12  ;;  %1127 = vmatprep.mubr.msk.bf16.mxu0 %vm1312_vm0, %v1310_v1  ;;  %v216_v19 = vpop.permute.xlu1 %215  ;;  %v1007_v12 = vld [vmem:[%s1599_s0 + $0xc] sm:$0x1] }
  0x86   :  { %1121 = vmatprep.subr.bf16.mxu0 %v1310_v1  ;;  %1136 = vmatpush3.bf16.msra.mxu1 %v216_v19 }
  0x87   :  { %1137 = vmatprep.subr.bf16.mxu1 %v1310_v1 }
  0x88   :  { %v160_v20 = vpop.permute.xlu0 %159 }
  0x89   :  { %1122 = vmatpush3.bf16.msra.mxu0 %v156_v15  ;;  %v218_v21 = vpop.permute.xlu1 %217 }
  0x8a   :  { %1123 = vmatprep.subr.bf16.mxu0 %v1310_v1  ;;  %1138 = vmatpush3.bf16.msra.mxu1 %v218_v21 }
  0x8b   :  { %1155 = vmatprep.subr.bf16.mxu1 %v1310_v1 }
  0x8c   :  { %v270_v23 = vpop.permute.xlu0 %269 }
  0x8d   :  { %1124 = vmatpush3.bf16.msra.mxu0 %v158_v18  ;;  %v328_v24 = vpop.permute.xlu1 %327  ;;  %1140 = vmatmul.mubr.msk.bf16.vlgmr.msra.gmra.mrb[4].mxu1 %vm60_vm1, %v989_v22  ;;  %v1013_v22 = vld [vmem:[%s1599_s0 + $0xf] sm:$0x1] }
  0x8e   :  { %1125 = vmatprep.subr.bf16.mxu0 %v1310_v1  ;;  %1156 = vmatpush3.bf16.msra.mxu1 %v328_v24  ;;  %v1011_v24 = vld [vmem:[%s1599_s0 + $0xe] sm:$0x1] }
  0x8f   :  { %1163 = vmatprep.mubr.msk.bf16.mxu1 %vm1312_vm0, %v1310_v1  ;;  %1157 = vmatprep.subr.bf16.mxu1 %v1310_v1 }
  0x90   :  { %v272_v25 = vpop.permute.xlu0 %271 }
  0x91   :  { %1126 = vmatpush3.bf16.msra.mxu0 %v160_v20  ;;  %v330_v27 = vpop.permute.xlu1 %329 }
  0x92   :  { %1143 = vmatprep.subr.bf16.mxu0 %v1310_v1  ;;  %1158 = vmatpush3.bf16.msra.mxu1 %v330_v27 }
  0x93   :  { %1159 = vmatprep.subr.bf16.mxu1 %v1310_v1 }
  0x94   :  { %1128 = vmatmul.mubr.msk.bf16.vlgmr.msra.gmra.mrb[4].mxu0 %vm60_vm1, %v987_v26  ;;  %v274_v28 = vpop.permute.xlu0 %273 }
  0x95   :  { %1144 = vmatpush3.bf16.msra.mxu0 %v270_v23  ;;  %1151 = vmatprep.mubr.msk.bf16.mxu0 %vm1312_vm0, %v1310_v1  ;;  %v332_v29 = vpop.permute.xlu1 %331 }
  0x96   :  { %1145 = vmatprep.subr.bf16.mxu0 %v1310_v1  ;;  %1160 = vmatpush3.bf16.msra.mxu1 %v332_v29 }
  0x97   :  { %1161 = vmatprep.subr.bf16.mxu1 %v1310_v1 }
  0x98   :  { %v276_v30 = vpop.permute.xlu0 %275 }
  0x99   :  { %1146 = vmatpush3.bf16.msra.mxu0 %v272_v25  ;;  %v334_v31 = vpop.permute.xlu1 %333 }
  0x9a   :  { %1147 = vmatprep.subr.bf16.mxu0 %v1310_v1  ;;  %1162 = vmatpush3.bf16.msra.mxu1 %v334_v31 }
  0x9b   :  { %1179 = vmatprep.subr.bf16.mxu1 %v1310_v1 }
  0x9c   :  { %v386_v33 = vpop.permute.xlu0 %385 }
  0x9d   :  { %1148 = vmatpush3.bf16.msra.mxu0 %v274_v28  ;;  %v444_v34 = vpop.permute.xlu1 %443  ;;  %1164 = vmatmul.mubr.msk.bf16.vlgmr.msra.gmra.mrb[8].mxu1 %vm60_vm1, %v993_v32 }
  0x9e   :  { %1149 = vmatprep.subr.bf16.mxu0 %v1310_v1  ;;  %1180 = vmatpush3.bf16.msra.mxu1 %v444_v34 }
  0x9f   :  { %1187 = vmatprep.mubr.msk.bf16.mxu1 %vm1312_vm0, %v1310_v1  ;;  %1181 = vmatprep.subr.bf16.mxu1 %v1310_v1 }
  0xa0   :  { %v388_v35 = vpop.permute.xlu0 %387 }
  0xa1   :  { %1150 = vmatpush3.bf16.msra.mxu0 %v276_v30  ;;  %v446_v37 = vpop.permute.xlu1 %445 }
  0xa2   :  { %1167 = vmatprep.subr.bf16.mxu0 %v1310_v1  ;;  %1182 = vmatpush3.bf16.msra.mxu1 %v446_v37 }
  0xa3   :  { %1183 = vmatprep.subr.bf16.mxu1 %v1310_v1 }
  0xa4   :  { %1152 = vmatmul.mubr.msk.bf16.vlgmr.msra.gmra.mrb[8].mxu0 %vm60_vm1, %v991_v36  ;;  %v390_v38 = vpop.permute.xlu0 %389 }
  0xa5   :  { %1168 = vmatpush3.bf16.msra.mxu0 %v386_v33  ;;  %1175 = vmatprep.mubr.msk.bf16.mxu0 %vm1312_vm0, %v1310_v1  ;;  %v448_v39 = vpop.permute.xlu1 %447 }
  0xa6   :  { %1169 = vmatprep.subr.bf16.mxu0 %v1310_v1  ;;  %1184 = vmatpush3.bf16.msra.mxu1 %v448_v39 }
  0xa7   :  { %1185 = vmatprep.subr.bf16.mxu1 %v1310_v1 }
  0xa8   :  { %v392_v40 = vpop.permute.xlu0 %391 }
  0xa9   :  { %1170 = vmatpush3.bf16.msra.mxu0 %v388_v35  ;;  %v450_v41 = vpop.permute.xlu1 %449 }
  0xaa   :  { %1171 = vmatprep.subr.bf16.mxu0 %v1310_v1  ;;  %1186 = vmatpush3.bf16.msra.mxu1 %v450_v41 }
  0xab   :  { %1203 = vmatprep.subr.bf16.mxu1 %v1310_v1 }
  0xac   :  { %v502_v43 = vpop.permute.xlu0 %501 }
  0xad   :  { %1172 = vmatpush3.bf16.msra.mxu0 %v390_v38  ;;  %v560_v44 = vpop.permute.xlu1 %559  ;;  %1188 = vmatmul.mubr.msk.bf16.vlgmr.msra.gmra.mrb[12].mxu1 %vm60_vm1, %v997_v42 }
  0xae   :  { %1173 = vmatprep.subr.bf16.mxu0 %v1310_v1  ;;  %1204 = vmatpush3.bf16.msra.mxu1 %v560_v44 }
  0xaf   :  { %1211 = vmatprep.mubr.msk.bf16.mxu1 %vm1312_vm0, %v1310_v1  ;;  %1205 = vmatprep.subr.bf16.mxu1 %v1310_v1 }
  0xb0   :  { %v504_v45 = vpop.permute.xlu0 %503 }
  0xb1   :  { %1174 = vmatpush3.bf16.msra.mxu0 %v392_v40  ;;  %v562_v47 = vpop.permute.xlu1 %561 }
  0xb2   :  { %1191 = vmatprep.subr.bf16.mxu0 %v1310_v1  ;;  %1206 = vmatpush3.bf16.msra.mxu1 %v562_v47 }
  0xb3   :  { %1207 = vmatprep.subr.bf16.mxu1 %v1310_v1 }
  0xb4   :  { %1176 = vmatmul.mubr.msk.bf16.vlgmr.msra.gmra.mrb[12].mxu0 %vm60_vm1, %v995_v46  ;;  %v506_v48 = vpop.permute.xlu0 %505 }
  0xb5   :  { %1192 = vmatpush3.bf16.msra.mxu0 %v502_v43  ;;  %1199 = vmatprep.mubr.msk.bf16.mxu0 %vm1312_vm0, %v1310_v1  ;;  %v564_v49 = vpop.permute.xlu1 %563 }
  0xb6   :  { %1193 = vmatprep.subr.bf16.mxu0 %v1310_v1  ;;  %1208 = vmatpush3.bf16.msra.mxu1 %v564_v49 }
  0xb7   :  { %1209 = vmatprep.subr.bf16.mxu1 %v1310_v1 }
  0xb8   :  { %v508_v50 = vpop.permute.xlu0 %507 }
  0xb9   :  { %1194 = vmatpush3.bf16.msra.mxu0 %v504_v45  ;;  %v566_v51 = vpop.permute.xlu1 %565 }
  0xba   :  { %1195 = vmatprep.subr.bf16.mxu0 %v1310_v1  ;;  %1210 = vmatpush3.bf16.msra.mxu1 %v566_v51 }
  0xbb   :  { %1227 = vmatprep.subr.bf16.mxu1 %v1310_v1 }
  0xbc   :  { %v618_v53 = vpop.permute.xlu0 %617 }
  0xbd   :  { %1196 = vmatpush3.bf16.msra.mxu0 %v506_v48  ;;  %v676_v54 = vpop.permute.xlu1 %675  ;;  %1212 = vmatmul.mubr.msk.bf16.vlgmr.msra.gmra.mrb[16].mxu1 %vm60_vm1, %v1001_v52 }
  0xbe   :  { %1197 = vmatprep.subr.bf16.mxu0 %v1310_v1  ;;  %1228 = vmatpush3.bf16.msra.mxu1 %v676_v54 }
  0xbf   :  { %1235 = vmatprep.mubr.msk.bf16.mxu1 %vm1312_vm0, %v1310_v1  ;;  %1229 = vmatprep.subr.bf16.mxu1 %v1310_v1 }
  0xc0   :  { %v620_v55 = vpop.permute.xlu0 %619 }
  0xc1   :  { %1198 = vmatpush3.bf16.msra.mxu0 %v508_v50  ;;  %v678_v57 = vpop.permute.xlu1 %677 }
  0xc2   :  { %1215 = vmatprep.subr.bf16.mxu0 %v1310_v1  ;;  %1230 = vmatpush3.bf16.msra.mxu1 %v678_v57 }
  0xc3   :  { %1231 = vmatprep.subr.bf16.mxu1 %v1310_v1 }
  0xc4   :  { %1200 = vmatmul.mubr.msk.bf16.vlgmr.msra.gmra.mrb[16].mxu0 %vm60_vm1, %v999_v56  ;;  %v622_v58 = vpop.permute.xlu0 %621 }
  0xc5   :  { %1216 = vmatpush3.bf16.msra.mxu0 %v618_v53  ;;  %1223 = vmatprep.mubr.msk.bf16.mxu0 %vm1312_vm0, %v1310_v1  ;;  %v680_v59 = vpop.permute.xlu1 %679 }
  0xc6   :  { %1217 = vmatprep.subr.bf16.mxu0 %v1310_v1  ;;  %1232 = vmatpush3.bf16.msra.mxu1 %v680_v59 }
  0xc7   :  { %1233 = vmatprep.subr.bf16.mxu1 %v1310_v1 }
  0xc8   :  { %v624_v60 = vpop.permute.xlu0 %623 }
  0xc9   :  { %1218 = vmatpush3.bf16.msra.mxu0 %v620_v55  ;;  %v682_v61 = vpop.permute.xlu1 %681 }
  0xca   :  { %1219 = vmatprep.subr.bf16.mxu0 %v1310_v1  ;;  %1234 = vmatpush3.bf16.msra.mxu1 %v682_v61 }
  0xcb   :  { %1251 = vmatprep.subr.bf16.mxu1 %v1310_v1 }
  0xcc   :  { %v734_v63 = vpop.permute.xlu0 %733 }
  0xcd   :  { %1220 = vmatpush3.bf16.msra.mxu0 %v622_v58  ;;  %v792_v0 = vpop.permute.xlu1 %791  ;;  %1236 = vmatmul.mubr.msk.bf16.vlgmr.msra.gmra.mrb[20].mxu1 %vm60_vm1, %v1005_v62 }
  0xce   :  { %1221 = vmatprep.subr.bf16.mxu0 %v1310_v1  ;;  %1252 = vmatpush3.bf16.msra.mxu1 %v792_v0 }
  0xcf   :  { %1259 = vmatprep.mubr.msk.bf16.mxu1 %vm1312_vm0, %v1310_v1  ;;  %1253 = vmatprep.subr.bf16.mxu1 %v1310_v1 }
  0xd0   :  { %v736_v2 = vpop.permute.xlu0 %735 }
  0xd1   :  { %1222 = vmatpush3.bf16.msra.mxu0 %v624_v60  ;;  %v794_v4 = vpop.permute.xlu1 %793 }
  0xd2   :  { %1239 = vmatprep.subr.bf16.mxu0 %v1310_v1  ;;  %1254 = vmatpush3.bf16.msra.mxu1 %v794_v4 }
  0xd3   :  { %1255 = vmatprep.subr.bf16.mxu1 %v1310_v1 }
  0xd4   :  { %1224 = vmatmul.mubr.msk.bf16.vlgmr.msra.gmra.mrb[20].mxu0 %vm60_vm1, %v1003_v3  ;;  %v738_v5 = vpop.permute.xlu0 %737 }
  0xd5   :  { %1240 = vmatpush3.bf16.msra.mxu0 %v734_v63  ;;  %1247 = vmatprep.mubr.msk.bf16.mxu0 %vm1312_vm0, %v1310_v1  ;;  %v796_v6 = vpop.permute.xlu1 %795 }
  0xd6   :  { %1241 = vmatprep.subr.bf16.mxu0 %v1310_v1  ;;  %1256 = vmatpush3.bf16.msra.mxu1 %v796_v6 }
  0xd7   :  { %1257 = vmatprep.subr.bf16.mxu1 %v1310_v1 }
  0xd8   :  { %v740_v7 = vpop.permute.xlu0 %739 }
  0xd9   :  { %1242 = vmatpush3.bf16.msra.mxu0 %v736_v2  ;;  %v798_v8 = vpop.permute.xlu1 %797 }
  0xda   :  { %1243 = vmatprep.subr.bf16.mxu0 %v1310_v1  ;;  %1258 = vmatpush3.bf16.msra.mxu1 %v798_v8 }
  0xdb   :  { %1275 = vmatprep.subr.bf16.mxu1 %v1310_v1 }
  0xdc   :  { %v850_v10 = vpop.permute.xlu0 %849 }
  0xdd   :  { %1244 = vmatpush3.bf16.msra.mxu0 %v738_v5  ;;  %v908_v11 = vpop.permute.xlu1 %907  ;;  %1260 = vmatmul.mubr.msk.bf16.vlgmr.msra.gmra.mrb[24].mxu1 %vm60_vm1, %v1009_v9 }
  0xde   :  { %1245 = vmatprep.subr.bf16.mxu0 %v1310_v1  ;;  %1276 = vmatpush3.bf16.msra.mxu1 %v908_v11 }
  0xdf   :  { %1283 = vmatprep.mubr.msk.bf16.mxu1 %vm1312_vm0, %v1310_v1  ;;  %1277 = vmatprep.subr.bf16.mxu1 %v1310_v1 }
  0xe0   :  { %v852_v14 = vpop.permute.xlu0 %851 }
  0xe1   :  { %1246 = vmatpush3.bf16.msra.mxu0 %v740_v7  ;;  %v910_v13 = vpop.permute.xlu1 %909 }
  0xe2   :  { %1263 = vmatprep.subr.bf16.mxu0 %v1310_v1  ;;  %1278 = vmatpush3.bf16.msra.mxu1 %v910_v13 }
  0xe3   :  { %1279 = vmatprep.subr.bf16.mxu1 %v1310_v1 }
  0xe4   :  { %1248 = vmatmul.mubr.msk.bf16.vlgmr.msra.gmra.mrb[24].mxu0 %vm60_vm1, %v1007_v12  ;;  %v145_v15 = vpop.f32.mrb[0].mxu1  ;;  %v854_v20 = vpop.permute.xlu0 %853 }
  0xe5   :  { %1264 = vmatpush3.bf16.msra.mxu0 %v850_v10  ;;  %1271 = vmatprep.mubr.msk.bf16.mxu0 %vm1312_vm0, %v1310_v1  ;;  %v1117_v16 = vpop.f32.mrb[1].mxu1  ;;  %v912_v17 = vpop.permute.xlu1 %911 }
  0xe6   :  { %1265 = vmatprep.subr.bf16.mxu0 %v1310_v1  ;;  %v148_v18 = vpop.f32.mrb[2].mxu1  ;;  %1280 = vmatpush3.bf16.msra.mxu1 %v912_v17 }
  0xe7   :  { %v1118_v19 = vpop.f32.mrb[3].mxu1  ;;  %1281 = vmatprep.subr.bf16.mxu1 %v1310_v1 }
  0xe8   :  { %v856_v23 = vpop.permute.xlu0 %855 }
  0xe9   :  { %1266 = vmatpush3.bf16.msra.mxu0 %v852_v14  ;;  %v914_v21 = vpop.permute.xlu1 %913 }
  0xea   :  { %1267 = vmatprep.subr.bf16.mxu0 %v1310_v1  ;;  %1282 = vmatpush3.bf16.msra.mxu1 %v914_v21 }
  0xed   :  { %1268 = vmatpush3.bf16.msra.mxu0 %v854_v20  ;;  %1284 = vmatmul.mubr.msk.bf16.vlgmr.msra.gmra.mrb[28].mxu1 %vm60_vm1, %v1013_v22 }
  0xee   :  { %1269 = vmatprep.subr.bf16.mxu0 %v1310_v1 }
  0xf1   :  { %1270 = vmatpush3.bf16.msra.mxu0 %v856_v23 }
  0xf4   :  { %1272 = vmatmul.mubr.msk.bf16.vlgmr.msra.gmra.mrb[28].mxu0 %vm60_vm1, %v1011_v24 }
 0x157   :  { %v98_v25 = vpop.f32.mrb[0].mxu0 }
 0x158   :  { %v146_v26 = vadd.f32 %v145_v15, %v98_v25  ;;  %v1105_v27 = vpop.f32.mrb[1].mxu0 }
 0x159   :  { %v101_v28 = vpop.f32.mrb[2].mxu0 }
 0x15a   :  { %v1106_v29 = vpop.f32.mrb[3].mxu0 }
 0x160   :  { %v260_v30 = vpop.f32.mrb[4].mxu1 }
 0x161   :  { %v1141_v31 = vpop.f32.mrb[5].mxu1 }
 0x162   :  { %v263_v32 = vpop.f32.mrb[6].mxu1 }
 0x163   :  { %v1142_v33 = vpop.f32.mrb[7].mxu1 }
 0x164   :  { %v967_v33 = vpop.permute.xlu0 %966 }
 0x167   :  { %v202_v34 = vpop.f32.mrb[4].mxu0 }
 0x168   :  { %v208_v1 = vadd.f32 %v202_v34, %v146_v26  ;;  %v1129_v35 = vpop.f32.mrb[5].mxu0  ;;  %v969_v26 = vlaneseq }
 0x169   :  { %v205_v36 = vpop.f32.mrb[6].mxu0 }
 0x16a   :  { %v266_v37 = vadd.f32 %v260_v30, %v208_v1  ;;  %v1130_v38 = vpop.f32.mrb[7].mxu0  ;;  %v970_v27 = vshrl.u32 %v969_v26, 7 }
 0x16c   :  { %v971_v31 = vsub.s32 0, %v970_v27 }
 0x16e   :  { %v972_v36 = vrot.slane %v967_v33, %v971_v31 }
 0x170   :  { %v376_v39 = vpop.f32.mrb[8].mxu1 }
 0x171   :  { %v1165_v40 = vpop.f32.mrb[9].mxu1 }
 0x172   :  { %v379_v41 = vpop.f32.mrb[10].mxu1 }
 0x173   :  { %v1166_v42 = vpop.f32.mrb[11].mxu1 }
 0x177   :  { %v318_v43 = vpop.f32.mrb[8].mxu0 }
 0x178   :  { %v324_v44 = vadd.f32 %v318_v43, %v266_v37  ;;  %v1153_v45 = vpop.f32.mrb[9].mxu0 }
 0x179   :  { %v321_v46 = vpop.f32.mrb[10].mxu0 }
 0x17a   :  { %v382_v47 = vadd.f32 %v376_v39, %v324_v44  ;;  %v1154_v48 = vpop.f32.mrb[11].mxu0 }
 0x180   :  { %v492_v49 = vpop.f32.mrb[12].mxu1 }
 0x181   :  { %v1189_v50 = vpop.f32.mrb[13].mxu1 }
 0x182   :  { %v495_v51 = vpop.f32.mrb[14].mxu1 }
 0x183   :  { %v1190_v52 = vpop.f32.mrb[15].mxu1 }
 0x187   :  { %v434_v53 = vpop.f32.mrb[12].mxu0 }
 0x188   :  { %v440_v54 = vadd.f32 %v434_v53, %v382_v47  ;;  %v1177_v55 = vpop.f32.mrb[13].mxu0 }
 0x189   :  { %v437_v56 = vpop.f32.mrb[14].mxu0 }
 0x18a   :  { %v498_v57 = vadd.f32 %v492_v49, %v440_v54  ;;  %v1178_v58 = vpop.f32.mrb[15].mxu0 }
 0x190   :  { %v608_v59 = vpop.f32.mrb[16].mxu1 }
 0x191   :  { %v1213_v60 = vpop.f32.mrb[17].mxu1 }
 0x192   :  { %v611_v61 = vpop.f32.mrb[18].mxu1 }
 0x193   :  { %v1214_v62 = vpop.f32.mrb[19].mxu1 }
 0x197   :  { %v550_v63 = vpop.f32.mrb[16].mxu0 }
 0x198   :  { %v556_v0 = vadd.f32 %v550_v63, %v498_v57  ;;  %v1201_v2 = vpop.f32.mrb[17].mxu0 }
 0x199   :  { %v553_v3 = vpop.f32.mrb[18].mxu0 }
 0x19a   :  { %v614_v4 = vadd.f32 %v608_v59, %v556_v0  ;;  %v1202_v5 = vpop.f32.mrb[19].mxu0 }
 0x1a0   :  { %v724_v6 = vpop.f32.mrb[20].mxu1 }
 0x1a1   :  { %v1237_v7 = vpop.f32.mrb[21].mxu1 }
 0x1a2   :  { %v727_v8 = vpop.f32.mrb[22].mxu1 }
 0x1a3   :  { %v1238_v9 = vpop.f32.mrb[23].mxu1 }
 0x1a7   :  { %v666_v10 = vpop.f32.mrb[20].mxu0 }
 0x1a8   :  { %v672_v11 = vadd.f32 %v666_v10, %v614_v4  ;;  %v1225_v12 = vpop.f32.mrb[21].mxu0 }
 0x1a9   :  { %v669_v13 = vpop.f32.mrb[22].mxu0 }
 0x1aa   :  { %v730_v14 = vadd.f32 %v724_v6, %v672_v11  ;;  %v1226_v15 = vpop.f32.mrb[23].mxu0 }
 0x1b0   :  { %v840_v16 = vpop.f32.mrb[24].mxu1 }
 0x1b1   :  { %v1261_v17 = vpop.f32.mrb[25].mxu1 }
 0x1b2   :  { %v843_v18 = vpop.f32.mrb[26].mxu1 }
 0x1b3   :  { %v1262_v19 = vpop.f32.mrb[27].mxu1 }
 0x1b7   :  { %v782_v20 = vpop.f32.mrb[24].mxu0 }
 0x1b8   :  { %v788_v21 = vadd.f32 %v782_v20, %v730_v14  ;;  %v1249_v22 = vpop.f32.mrb[25].mxu0 }
 0x1b9   :  { %v785_v23 = vpop.f32.mrb[26].mxu0 }
 0x1ba   :  { %v846_v24 = vadd.f32 %v840_v16, %v788_v21  ;;  %v1250_v25 = vpop.f32.mrb[27].mxu0 }
 0x1c0   :  { %v956_v28 = vpop.f32.mrb[28].mxu1 }
 0x1c1   :  { %v1285_v29 = vpop.f32.mrb[29].mxu1 }
 0x1c2   :  { %v959_v30 = vpop.f32.mrb[30].mxu1 }
 0x1c3   :  { %v1286_v32 = vpop.f32.mrb[31].mxu1 }
 0x1c7   :  { %v898_v34 = vpop.f32.mrb[28].mxu0 }
 0x1c8   :  { %v904_v1 = vadd.f32 %v898_v34, %v846_v24  ;;  %v1273_v35 = vpop.f32.mrb[29].mxu0 }
 0x1c9   :  { %v901_v37 = vpop.f32.mrb[30].mxu0 }
 0x1ca   :  { %v962_v38 = vadd.f32 %v956_v28, %v904_v1  ;;  %v1274_v39 = vpop.f32.mrb[31].mxu0 }
 0x1cc   :  { %v973_v40 = vadd.f32 %v972_v36, %v962_v38 }
 0x1ce   :  { %975 = vst.msk [vmem:[%s1601_s3] sm:$0x1] %vm974_vm2, %v973_v40 }

</bundles_post_ra>
